<compile_context>
chip_gen: v5e
topology: v5e:2x2
jax: 0.10.0
libtpu: 0.0.40
codegen_flags: <defaults>
</compile_context>

<pallas_src>
import functools

import jax
import jax.numpy as jnp
import numpy as np
from jax.experimental import pallas as pl
from jax.experimental.pallas import tpu as pltpu


# ----------------------------------------------------------------------------
# numerically stable log-sigmoid usable both inside and outside Pallas kernels
# ----------------------------------------------------------------------------
def _log_sigmoid(x):
    return jnp.minimum(x, 0.0) - jnp.log(1.0 + jnp.exp(-jnp.abs(x)))


# ----------------------------------------------------------------------------
# Fused forward kernel:
#   stacked bi-directional LSTM (unrolled time loop) -> concat -> MLP -> NS loss
#
# ref order (positional):
#   x, [w_ih_l, w_hh_l, b_l] * n_layers, w1a, w1b, b1, w2, b2, pos, neg,
#   out, l2r_buf (scratch), r2l_buf (scratch)
# ----------------------------------------------------------------------------
def _fused_kernel(*refs, n_layers):
    # --- positional ref parsing ---------------------------------------------
    x_ref = refs[0]
    p = 1
    lstm_refs = []
    for _ in range(n_layers):
        lstm_refs.append((refs[p], refs[p + 1], refs[p + 2]))
        p += 3
    w1a_ref, w1b_ref, b1_ref, w2_ref, b2_ref = refs[p:p + 5]
    p += 5
    pos_ref, neg_ref = refs[p], refs[p + 1]
    p += 2
    out_ref = refs[p]
    l2r_buf, r2l_buf = refs[p + 1], refs[p + 2]

    f32 = jnp.float32
    Tc, _, B, _ = x_ref.shape                 # (Tc, 2, B, E)
    H = lstm_refs[0][1].shape[1]              # w_hh: (2, H, 4H)

    # --- load everything once (all tiny; lives in vregs/VMEM) ----------------
    x_all = x_ref[...]                        # (Tc, 2, B, E)
    layer_w = []
    for wih_ref, whh_ref, b_ref in lstm_refs:
        wih = wih_ref[...]                    # (2, Din, 4H)
        whh = whh_ref[...]                    # (2, H,   4H)
        b = b_ref[...]                        # (2, 1,   4H)
        layer_w.append(((wih[0], wih[1]), (whh[0], whh[1]), (b[0], b[1])))

    h = [[jnp.zeros((B, H), f32), jnp.zeros((B, H), f32)] for _ in range(n_layers)]
    c = [[jnp.zeros((B, H), f32), jnp.zeros((B, H), f32)] for _ in range(n_layers)]

    # --- stacked bi-directional LSTM, time loop fully unrolled ---------------
    # Only the first Tc = S-2 timesteps are consumed downstream (PyTorch drops
    # the last LSTM output of both directions), so the dead step is skipped.
    for t in range(Tc):
        for d in range(2):                    # 0 = l2r, 1 = r2l
            inp = x_all[t, d]                 # (B, E)
            for l in range(n_layers):
                wih_d = layer_w[l][0][d]
                whh_d = layer_w[l][1][d]
                b_d = layer_w[l][2][d]
                gates = (
                    jnp.dot(inp.astype(wih_d.dtype), wih_d,
                            preferred_element_type=f32)
                    + jnp.dot(h[l][d].astype(whh_d.dtype), whh_d,
                              preferred_element_type=f32)
                    + b_d.astype(f32)
                )                                               # (B, 4H) fp32
                # full-vreg EUP activations, then static lane slices (i,f,g,o)
                sg = jax.nn.sigmoid(gates)
                tg = jnp.tanh(gates)
                i_g = sg[:, 0:H]
                f_g = sg[:, H:2 * H]
                g_g = tg[:, 2 * H:3 * H]
                o_g = sg[:, 3 * H:4 * H]
                c_new = f_g * c[l][d] + i_g * g_g
                h_new = o_g * jnp.tanh(c_new)
                c[l][d] = c_new
                h[l][d] = h_new
                inp = h_new
        # stash top-layer outputs into lane-dense (N, H) VMEM buffers; r2l is
        # written time-reversed so no flip is needed afterwards.
        l2r_buf[t * B:(t + 1) * B, :] = h[n_layers - 1][0]
        r2l_buf[(Tc - 1 - t) * B:(Tc - t) * B, :] = h[n_layers - 1][1]

    # --- MLP head: cat(l2r, r2l) @ W1 -> ReLU -> @ W2 ------------------------
    # (concat folded into two matmuls against the split W1; dropout = identity)
    w1a = w1a_ref[...]
    w1b = w1b_ref[...]
    w2 = w2_ref[...]
    h1 = (jnp.dot(l2r_buf[...].astype(w1a.dtype), w1a, preferred_element_type=f32)
          + jnp.dot(r2l_buf[...].astype(w1b.dtype), w1b, preferred_element_type=f32)
          + b1_ref[...].astype(f32))
    h1 = jnp.maximum(h1, 0.0)
    c_i = (jnp.dot(h1.astype(w2.dtype), w2, preferred_element_type=f32)
           + b2_ref[...].astype(f32))                           # (N, H)

    # --- NegativeSampling loss ------------------------------------------------
    pos = pos_ref[...].astype(f32)                              # (N, H)
    neg = neg_ref[...].astype(f32)                              # (K, N, H)
    pos_score = jnp.sum(pos * c_i, axis=-1, keepdims=True)      # (N, 1)
    neg_score = jnp.sum(neg * c_i[None, :, :], axis=-1)         # (K, N)
    pos_part = jnp.sum(_log_sigmoid(pos_score), axis=0, keepdims=True)       # (1,1)
    neg_part = jnp.sum(jnp.sum(_log_sigmoid(-neg_score), axis=-1, keepdims=True),
                       axis=0, keepdims=True)                                # (1,1)
    out_ref[...] = -(pos_part + neg_part)


# ----------------------------------------------------------------------------
# Full Context2vec forward (training path, use_mlp=True, is_inference=False)
# ----------------------------------------------------------------------------
def context2vec_forward(params, sentences, target, neg_samples, *,
                        matmul_dtype=jnp.float32):
    B, S = sentences.shape
    Tc = S - 2                                   # number of context positions
    n_layers = len(params["l2r_rnn"])
    H = params["l2r_rnn"][0][1].shape[0]         # w_hh_t: (H, 4H)
    E = params["l2r_emb"].shape[1]
    N = B * Tc
    K = neg_samples.shape[-1]

    # --- embedding gathers / direction stacking (plain JAX glue) -------------
    rev = jnp.flip(sentences, axis=1)
    l2r_x = jnp.take(params["l2r_emb"], sentences[:, :Tc], axis=0)   # (B, Tc, E)
    r2l_x = jnp.take(params["r2l_emb"], rev[:, :Tc], axis=0)         # (B, Tc, E)
    x = jnp.stack([jnp.transpose(l2r_x, (1, 0, 2)),
                   jnp.transpose(r2l_x, (1, 0, 2))], axis=1)          # (Tc, 2, B, E)
    x = x.astype(matmul_dtype)

    # direction-stacked LSTM weights (already transposed to (in, out))
    lstm_in = []
    for l in range(n_layers):
        wih_a, whh_a, b_a = params["l2r_rnn"][l]
        wih_b, whh_b, b_b = params["r2l_rnn"][l]
        lstm_in += [jnp.stack([wih_a, wih_b]).astype(matmul_dtype),   # (2, Din, 4H)
                    jnp.stack([whh_a, whh_b]).astype(matmul_dtype),   # (2, H, 4H)
                    jnp.stack([b_a, b_b])]                            # (2, 1, 4H)

    # MLP weights; W1 split so the concat becomes two matmuls in-kernel
    w1, b1, w2, b2 = params["mlp"]
    mlp_in = [w1[:H].astype(matmul_dtype), w1[H:].astype(matmul_dtype),
              b1, w2.astype(matmul_dtype), b2]

    # NS embeddings, reordered to the kernel's (time-major, batch-minor) rows
    pos_ids = jnp.transpose(target).reshape(N)                        # row = j*B + b
    pos_emb = jnp.take(params["ns_W"], pos_ids, axis=0)               # (N, H)
    neg_ids = jnp.transpose(neg_samples, (2, 1, 0)).reshape(K, N)
    neg_emb = jnp.take(params["ns_W"], neg_ids, axis=0)               # (K, N, H)

    inputs = [x] + lstm_in + mlp_in + [pos_emb, neg_emb]

    def full_spec(a):
        return pl.BlockSpec(a.shape, lambda i, nd=a.ndim: (0,) * nd)

    # advisory cost estimate so XLA schedules the call against the gathers
    flops = 0
    for l in range(n_layers):
        din = E if l == 0 else H
        flops += 2 * (2 * Tc * B) * (din + H) * (4 * H)
    flops += 2 * N * H * (2 * H) * 2 + 2 * N * (2 * H) * H
    flops += 2 * N * (K + 1) * H
    transcendentals = 2 * Tc * n_layers * B * (4 * H + 4 * H + H) + N * (K + 1)
    bytes_accessed = sum(int(np.prod(a.shape)) * jnp.dtype(a.dtype).itemsize
                         for a in inputs) + 4

    out = pl.pallas_call(
        functools.partial(_fused_kernel, n_layers=n_layers),
        out_shape=jax.ShapeDtypeStruct((1, 1), jnp.float32),
        grid_spec=pltpu.PrefetchScalarGridSpec(
            num_scalar_prefetch=0,
            grid=(1,),
            in_specs=[full_spec(a) for a in inputs],
            out_specs=pl.BlockSpec((1, 1), lambda i: (0, 0)),
            scratch_shapes=[pltpu.VMEM((N, H), jnp.float32),
                            pltpu.VMEM((N, H), jnp.float32)],
        ),
        compiler_params=pltpu.CompilerParams(dimension_semantics=("arbitrary",)),
        cost_estimate=pl.CostEstimate(flops=int(flops),
                                      transcendentals=int(transcendentals),
                                      bytes_accessed=int(bytes_accessed)),
    )(*inputs)
    return out[0, 0]


# ----------------------------------------------------------------------------
# Pure-JAX reference (matches the PyTorch module's math; for a sanity check)
# ----------------------------------------------------------------------------
def _lstm_ref(x_tbe, w_ih_t, w_hh_t, b):
    T, B, _ = x_tbe.shape
    H = w_hh_t.shape[0]

    def step(carry, xt):
        h, c = carry
        g = xt @ w_ih_t + h @ w_hh_t + b
        i = jax.nn.sigmoid(g[:, :H])
        f = jax.nn.sigmoid(g[:, H:2 * H])
        gg = jnp.tanh(g[:, 2 * H:3 * H])
        o = jax.nn.sigmoid(g[:, 3 * H:])
        c = f * c + i * gg
        h = o * jnp.tanh(c)
        return (h, c), h

    (_, _), ys = jax.lax.scan(step, (jnp.zeros((B, H)), jnp.zeros((B, H))), x_tbe)
    return ys


def context2vec_ref(params, sentences, target, neg_samples):
    reversed_sentences = jnp.flip(sentences, axis=1)[:, :-1]
    sentences_ = sentences[:, :-1]
    l2r_x = jnp.take(params["l2r_emb"], sentences_, axis=0)
    r2l_x = jnp.take(params["r2l_emb"], reversed_sentences, axis=0)

    def run(x, layers):
        h = jnp.transpose(x, (1, 0, 2))
        for (w_ih_t, w_hh_t, b) in layers:
            h = _lstm_ref(h, w_ih_t, w_hh_t, b)
        return jnp.transpose(h, (1, 0, 2))

    out_l2r = run(l2r_x, params["l2r_rnn"])[:, :-1, :]
    out_r2l = jnp.flip(run(r2l_x, params["r2l_rnn"])[:, :-1, :], axis=1)
    B, Tc, H = out_l2r.shape
    cat = jnp.concatenate([out_l2r, out_r2l], axis=-1).reshape(B * Tc, 2 * H)
    w1, b1, w2, b2 = params["mlp"]
    c_i = jnp.maximum(cat @ w1 + b1, 0.0) @ w2 + b2
    pos_emb = jnp.take(params["ns_W"], target.reshape(-1), axis=0)
    K = neg_samples.shape[-1]
    neg_emb = jnp.take(params["ns_W"], neg_samples.reshape(-1), axis=0).reshape(B * Tc, K, H)
    pos_loss = _log_sigmoid(jnp.sum(pos_emb * c_i, axis=-1))
    neg_loss = jnp.sum(_log_sigmoid(jnp.sum(-neg_emb * c_i[:, None, :], axis=-1)), axis=-1)
    return -jnp.sum(pos_loss + neg_loss)


# ----------------------------------------------------------------------------
# deterministic parameter construction
# ----------------------------------------------------------------------------
def init_params(key, vocab_size, E, H, n_layers, pad_index):
    keys = jax.random.split(key, 32)
    ki = iter(keys)

    std = 1.0 / np.sqrt(E)
    l2r_emb = jax.random.normal(next(ki), (vocab_size, E), jnp.float32) * std
    r2l_emb = jax.random.normal(next(ki), (vocab_size, E), jnp.float32) * std
    l2r_emb = l2r_emb.at[pad_index].set(0.0)
    r2l_emb = r2l_emb.at[pad_index].set(0.0)

    def lstm_stack():
        layers = []
        bound = 1.0 / np.sqrt(H)
        for layer in range(n_layers):
            din = E if layer == 0 else H
            w_ih = jax.random.uniform(next(ki), (4 * H, din), jnp.float32, -bound, bound)
            w_hh = jax.random.uniform(next(ki), (4 * H, H), jnp.float32, -bound, bound)
            b_ih = jax.random.uniform(next(ki), (4 * H,), jnp.float32, -bound, bound)
            b_hh = jax.random.uniform(next(ki), (4 * H,), jnp.float32, -bound, bound)
            layers.append((w_ih.T, w_hh.T, (b_ih + b_hh).reshape(1, 4 * H)))
        return layers

    l2r_rnn = lstm_stack()
    r2l_rnn = lstm_stack()

    # MLP: Linear(2H -> 2H), ReLU, Linear(2H -> H); weights stored (in, out)
    def linear(din, dout):
        bound = 1.0 / np.sqrt(din)
        w = jax.random.uniform(next(ki), (din, dout), jnp.float32, -bound, bound)
        b = jax.random.uniform(next(ki), (1, dout), jnp.float32, -bound, bound)
        return w, b

    w1, b1 = linear(2 * H, 2 * H)
    w2, b2 = linear(2 * H, H)

    # NegativeSampling embedding W: original __init__ zeroes it (which would make
    # the loss constant); use small deterministic values instead, pad row zeroed.
    ns_W = jax.random.normal(next(ki), (vocab_size, H), jnp.float32) * 0.1
    ns_W = ns_W.at[pad_index].set(0.0)

    return {
        "l2r_emb": l2r_emb,
        "r2l_emb": r2l_emb,
        "l2r_rnn": l2r_rnn,
        "r2l_rnn": r2l_rnn,
        "mlp": (w1, b1, w2, b2),
        "ns_W": ns_W,
    }


if __name__ == "__main__":
    # small shapes consistent with the module
    VOCAB, E, H, N_LAYERS = 50, 32, 32, 2
    B, S = 2, 8                    # sentences: (B, S) -> context positions = S - 2
    PAD = 0
    N_NEG = 10

    key = jax.random.PRNGKey(0)
    k_par, k_sent, k_tgt, k_neg = jax.random.split(key, 4)

    params = init_params(k_par, VOCAB, E, H, N_LAYERS, PAD)

    sentences = jax.random.randint(k_sent, (B, S), 1, VOCAB, dtype=jnp.int32)
    target = jax.random.randint(k_tgt, (B, S - 2), 1, VOCAB, dtype=jnp.int32)

    # TODO(synk): WalkerAlias unigram^0.75 negative sampler is host-side numpy RNG;
    # replaced by an equivalent deterministic categorical draw over counter^0.75.
    counter = np.arange(1, VOCAB + 1, dtype=np.float32)
    logits = jnp.asarray(0.75 * np.log(counter))
    neg_samples = jax.random.categorical(k_neg, logits, shape=(B, S - 2, N_NEG)).astype(jnp.int32)

    # TODO(synk): nn.Dropout is stochastic at train time; treated as identity (eval mode).

    # On v6e/v7x, pass matmul_dtype=jnp.bfloat16 for halved weight/activation DMA
    # (fp32 accumulate + fp32 gate math are kept either way).
    fwd = jax.jit(context2vec_forward)
    loss = jax.block_until_ready(fwd(params, sentences, target, neg_samples))

    loss_ref = jax.block_until_ready(
        context2vec_ref(params, sentences, target, neg_samples))

    np.testing.assert_allclose(np.asarray(loss), np.asarray(loss_ref), rtol=5e-3, atol=5e-3)
    print("KERNEL_OK")
</pallas_src>

<mosaic_0001>
module attributes {stable_mosaic.version = 11 : i64} {
  func.func @_fused_kernel(%arg0: i32, %arg1: memref<6x2x2x32xf32, #tpu.memory_space<vmem>>, %arg2: memref<2x32x128xf32, #tpu.memory_space<vmem>>, %arg3: memref<2x32x128xf32, #tpu.memory_space<vmem>>, %arg4: memref<2x1x128xf32, #tpu.memory_space<vmem>>, %arg5: memref<2x32x128xf32, #tpu.memory_space<vmem>>, %arg6: memref<2x32x128xf32, #tpu.memory_space<vmem>>, %arg7: memref<2x1x128xf32, #tpu.memory_space<vmem>>, %arg8: memref<32x64xf32, #tpu.memory_space<vmem>>, %arg9: memref<32x64xf32, #tpu.memory_space<vmem>>, %arg10: memref<1x64xf32, #tpu.memory_space<vmem>>, %arg11: memref<64x32xf32, #tpu.memory_space<vmem>>, %arg12: memref<1x32xf32, #tpu.memory_space<vmem>>, %arg13: memref<12x32xf32, #tpu.memory_space<vmem>>, %arg14: memref<10x12x32xf32, #tpu.memory_space<vmem>>, %arg15: memref<1x1xf32, #tpu.memory_space<vmem>>, %arg16: memref<12x32xf32, #tpu.memory_space<vmem>>, %arg17: memref<12x32xf32, #tpu.memory_space<vmem>>) attributes {dimension_semantics = [#tpu.dimension_semantics<arbitrary>], iteration_bounds = array<i64: 1>, scalar_prefetch = 0 : i64, scratch_operands = 2 : i64, tpu.core_type = #tpu.core_type<tc>, window_params = [{pipeline_mode = #tpu.pipeline_mode<synchronous>, transform_indices = @transform_0, window_bounds = array<i64: 6, 2, 2, 32>}, {pipeline_mode = #tpu.pipeline_mode<synchronous>, transform_indices = @transform_1, window_bounds = array<i64: 2, 32, 128>}, {pipeline_mode = #tpu.pipeline_mode<synchronous>, transform_indices = @transform_2, window_bounds = array<i64: 2, 32, 128>}, {pipeline_mode = #tpu.pipeline_mode<synchronous>, transform_indices = @transform_3, window_bounds = array<i64: 2, 1, 128>}, {pipeline_mode = #tpu.pipeline_mode<synchronous>, transform_indices = @transform_4, window_bounds = array<i64: 2, 32, 128>}, {pipeline_mode = #tpu.pipeline_mode<synchronous>, transform_indices = @transform_5, window_bounds = array<i64: 2, 32, 128>}, {pipeline_mode = #tpu.pipeline_mode<synchronous>, transform_indices = @transform_6, window_bounds = array<i64: 2, 1, 128>}, {pipeline_mode = #tpu.pipeline_mode<synchronous>, transform_indices = @transform_7, window_bounds = array<i64: 32, 64>}, {pipeline_mode = #tpu.pipeline_mode<synchronous>, transform_indices = @transform_8, window_bounds = array<i64: 32, 64>}, {pipeline_mode = #tpu.pipeline_mode<synchronous>, transform_indices = @transform_9, window_bounds = array<i64: 1, 64>}, {pipeline_mode = #tpu.pipeline_mode<synchronous>, transform_indices = @transform_10, window_bounds = array<i64: 64, 32>}, {pipeline_mode = #tpu.pipeline_mode<synchronous>, transform_indices = @transform_11, window_bounds = array<i64: 1, 32>}, {pipeline_mode = #tpu.pipeline_mode<synchronous>, transform_indices = @transform_12, window_bounds = array<i64: 12, 32>}, {pipeline_mode = #tpu.pipeline_mode<synchronous>, transform_indices = @transform_13, window_bounds = array<i64: 10, 12, 32>}, {pipeline_mode = #tpu.pipeline_mode<synchronous>, transform_indices = @transform_14, window_bounds = array<i64: 1, 1>}]} {
    %c0 = arith.constant 0 : index
    %c0_0 = arith.constant 0 : index
    %c0_1 = arith.constant 0 : index
    %c0_2 = arith.constant 0 : index
    %0 = vector.load %arg1[%c0, %c0_0, %c0_1, %c0_2] : memref<6x2x2x32xf32, #tpu.memory_space<vmem>>, vector<6x2x2x32xf32>
    %c0_3 = arith.constant 0 : index
    %c0_4 = arith.constant 0 : index
    %c0_5 = arith.constant 0 : index
    %1 = vector.load %arg2[%c0_3, %c0_4, %c0_5] : memref<2x32x128xf32, #tpu.memory_space<vmem>>, vector<2x32x128xf32>
    %c0_6 = arith.constant 0 : index
    %c0_7 = arith.constant 0 : index
    %c0_8 = arith.constant 0 : index
    %2 = vector.load %arg3[%c0_6, %c0_7, %c0_8] : memref<2x32x128xf32, #tpu.memory_space<vmem>>, vector<2x32x128xf32>
    %c0_9 = arith.constant 0 : index
    %c0_10 = arith.constant 0 : index
    %c0_11 = arith.constant 0 : index
    %3 = vector.load %arg4[%c0_9, %c0_10, %c0_11] : memref<2x1x128xf32, #tpu.memory_space<vmem>>, vector<2x1x128xf32>
    %4 = vector.extract_strided_slice %1 {offsets = [0, 0, 0], sizes = [1, 32, 128], strides = [1, 1, 1]} : vector<2x32x128xf32> to vector<1x32x128xf32>
    %5 = vector.shape_cast %4 : vector<1x32x128xf32> to vector<32x128xf32>
    %6 = vector.extract_strided_slice %1 {offsets = [1, 0, 0], sizes = [1, 32, 128], strides = [1, 1, 1]} : vector<2x32x128xf32> to vector<1x32x128xf32>
    %7 = vector.shape_cast %6 : vector<1x32x128xf32> to vector<32x128xf32>
    %8 = vector.extract_strided_slice %2 {offsets = [0, 0, 0], sizes = [1, 32, 128], strides = [1, 1, 1]} : vector<2x32x128xf32> to vector<1x32x128xf32>
    %9 = vector.shape_cast %8 : vector<1x32x128xf32> to vector<32x128xf32>
    %10 = vector.extract_strided_slice %2 {offsets = [1, 0, 0], sizes = [1, 32, 128], strides = [1, 1, 1]} : vector<2x32x128xf32> to vector<1x32x128xf32>
    %11 = vector.shape_cast %10 : vector<1x32x128xf32> to vector<32x128xf32>
    %12 = vector.extract_strided_slice %3 {offsets = [0, 0, 0], sizes = [1, 1, 128], strides = [1, 1, 1]} : vector<2x1x128xf32> to vector<1x1x128xf32>
    %13 = vector.shape_cast %12 : vector<1x1x128xf32> to vector<1x128xf32>
    %14 = vector.extract_strided_slice %3 {offsets = [1, 0, 0], sizes = [1, 1, 128], strides = [1, 1, 1]} : vector<2x1x128xf32> to vector<1x1x128xf32>
    %15 = vector.shape_cast %14 : vector<1x1x128xf32> to vector<1x128xf32>
    %c0_12 = arith.constant 0 : index
    %c0_13 = arith.constant 0 : index
    %c0_14 = arith.constant 0 : index
    %16 = vector.load %arg5[%c0_12, %c0_13, %c0_14] : memref<2x32x128xf32, #tpu.memory_space<vmem>>, vector<2x32x128xf32>
    %c0_15 = arith.constant 0 : index
    %c0_16 = arith.constant 0 : index
    %c0_17 = arith.constant 0 : index
    %17 = vector.load %arg6[%c0_15, %c0_16, %c0_17] : memref<2x32x128xf32, #tpu.memory_space<vmem>>, vector<2x32x128xf32>
    %c0_18 = arith.constant 0 : index
    %c0_19 = arith.constant 0 : index
    %c0_20 = arith.constant 0 : index
    %18 = vector.load %arg7[%c0_18, %c0_19, %c0_20] : memref<2x1x128xf32, #tpu.memory_space<vmem>>, vector<2x1x128xf32>
    %19 = vector.extract_strided_slice %16 {offsets = [0, 0, 0], sizes = [1, 32, 128], strides = [1, 1, 1]} : vector<2x32x128xf32> to vector<1x32x128xf32>
    %20 = vector.shape_cast %19 : vector<1x32x128xf32> to vector<32x128xf32>
    %21 = vector.extract_strided_slice %16 {offsets = [1, 0, 0], sizes = [1, 32, 128], strides = [1, 1, 1]} : vector<2x32x128xf32> to vector<1x32x128xf32>
    %22 = vector.shape_cast %21 : vector<1x32x128xf32> to vector<32x128xf32>
    %23 = vector.extract_strided_slice %17 {offsets = [0, 0, 0], sizes = [1, 32, 128], strides = [1, 1, 1]} : vector<2x32x128xf32> to vector<1x32x128xf32>
    %24 = vector.shape_cast %23 : vector<1x32x128xf32> to vector<32x128xf32>
    %25 = vector.extract_strided_slice %17 {offsets = [1, 0, 0], sizes = [1, 32, 128], strides = [1, 1, 1]} : vector<2x32x128xf32> to vector<1x32x128xf32>
    %26 = vector.shape_cast %25 : vector<1x32x128xf32> to vector<32x128xf32>
    %27 = vector.extract_strided_slice %18 {offsets = [0, 0, 0], sizes = [1, 1, 128], strides = [1, 1, 1]} : vector<2x1x128xf32> to vector<1x1x128xf32>
    %28 = vector.shape_cast %27 : vector<1x1x128xf32> to vector<1x128xf32>
    %29 = vector.extract_strided_slice %18 {offsets = [1, 0, 0], sizes = [1, 1, 128], strides = [1, 1, 1]} : vector<2x1x128xf32> to vector<1x1x128xf32>
    %30 = vector.shape_cast %29 : vector<1x1x128xf32> to vector<1x128xf32>
    %cst = arith.constant 0.000000e+00 : f32
    %31 = vector.broadcast %cst : f32 to vector<2x32xf32>
    %cst_21 = arith.constant 0.000000e+00 : f32
    %32 = vector.broadcast %cst_21 : f32 to vector<2x32xf32>
    %cst_22 = arith.constant 0.000000e+00 : f32
    %33 = vector.broadcast %cst_22 : f32 to vector<2x32xf32>
    %cst_23 = arith.constant 0.000000e+00 : f32
    %34 = vector.broadcast %cst_23 : f32 to vector<2x32xf32>
    %cst_24 = arith.constant 0.000000e+00 : f32
    %35 = vector.broadcast %cst_24 : f32 to vector<2x32xf32>
    %cst_25 = arith.constant 0.000000e+00 : f32
    %36 = vector.broadcast %cst_25 : f32 to vector<2x32xf32>
    %cst_26 = arith.constant 0.000000e+00 : f32
    %37 = vector.broadcast %cst_26 : f32 to vector<2x32xf32>
    %cst_27 = arith.constant 0.000000e+00 : f32
    %38 = vector.broadcast %cst_27 : f32 to vector<2x32xf32>
    %39 = vector.extract_strided_slice %0 {offsets = [0, 0, 0, 0], sizes = [1, 1, 2, 32], strides = [1, 1, 1, 1]} : vector<6x2x2x32xf32> to vector<1x1x2x32xf32>
    %40 = vector.shape_cast %39 : vector<1x1x2x32xf32> to vector<2x32xf32>
    %cst_28 = arith.constant dense<0.000000e+00> : vector<2x128xf32>
    %41 = tpu.matmul %40, %5, %cst_28 {dimension_numbers = #tpu.dot_dimension_numbers<[1], [0], [0], [1], [0, 0, 1, 1], [], []>} : vector<2x32xf32>, vector<32x128xf32>, vector<2x128xf32> -> vector<2x128xf32>
    %cst_29 = arith.constant dense<0.000000e+00> : vector<2x128xf32>
    %42 = tpu.matmul %31, %9, %cst_29 {dimension_numbers = #tpu.dot_dimension_numbers<[1], [0], [0], [1], [0, 0, 1, 1], [], []>} : vector<2x32xf32>, vector<32x128xf32>, vector<2x128xf32> -> vector<2x128xf32>
    %43 = arith.addf %41, %42 : vector<2x128xf32>
    %44 = vector.broadcast %13 : vector<1x128xf32> to vector<2x128xf32>
    %45 = arith.addf %43, %44 : vector<2x128xf32>
    %46 = arith.negf %45 : vector<2x128xf32>
    %47 = math.exp %46 : vector<2x128xf32>
    %cst_30 = arith.constant 1.000000e+00 : f32
    %48 = vector.broadcast %cst_30 : f32 to vector<2x128xf32>
    %49 = arith.addf %48, %47 : vector<2x128xf32>
    %50 = arith.divf %48, %49 : vector<2x128xf32>
    %51 = math.tanh %45 : vector<2x128xf32>
    %52 = vector.extract_strided_slice %50 {offsets = [0, 0], sizes = [2, 32], strides = [1, 1]} : vector<2x128xf32> to vector<2x32xf32>
    %53 = vector.extract_strided_slice %50 {offsets = [0, 32], sizes = [2, 32], strides = [1, 1]} : vector<2x128xf32> to vector<2x32xf32>
    %54 = vector.extract_strided_slice %51 {offsets = [0, 64], sizes = [2, 32], strides = [1, 1]} : vector<2x128xf32> to vector<2x32xf32>
    %55 = vector.extract_strided_slice %50 {offsets = [0, 96], sizes = [2, 32], strides = [1, 1]} : vector<2x128xf32> to vector<2x32xf32>
    %56 = arith.mulf %53, %35 : vector<2x32xf32>
    %57 = arith.mulf %52, %54 : vector<2x32xf32>
    %58 = arith.addf %56, %57 : vector<2x32xf32>
    %59 = math.tanh %58 : vector<2x32xf32>
    %60 = arith.mulf %55, %59 : vector<2x32xf32>
    %cst_31 = arith.constant dense<0.000000e+00> : vector<2x128xf32>
    %61 = tpu.matmul %60, %20, %cst_31 {dimension_numbers = #tpu.dot_dimension_numbers<[1], [0], [0], [1], [0, 0, 1, 1], [], []>} : vector<2x32xf32>, vector<32x128xf32>, vector<2x128xf32> -> vector<2x128xf32>
    %cst_32 = arith.constant dense<0.000000e+00> : vector<2x128xf32>
    %62 = tpu.matmul %33, %24, %cst_32 {dimension_numbers = #tpu.dot_dimension_numbers<[1], [0], [0], [1], [0, 0, 1, 1], [], []>} : vector<2x32xf32>, vector<32x128xf32>, vector<2x128xf32> -> vector<2x128xf32>
    %63 = arith.addf %61, %62 : vector<2x128xf32>
    %64 = vector.broadcast %28 : vector<1x128xf32> to vector<2x128xf32>
    %65 = arith.addf %63, %64 : vector<2x128xf32>
    %66 = arith.negf %65 : vector<2x128xf32>
    %67 = math.exp %66 : vector<2x128xf32>
    %cst_33 = arith.constant 1.000000e+00 : f32
    %68 = vector.broadcast %cst_33 : f32 to vector<2x128xf32>
    %69 = arith.addf %68, %67 : vector<2x128xf32>
    %70 = arith.divf %68, %69 : vector<2x128xf32>
    %71 = math.tanh %65 : vector<2x128xf32>
    %72 = vector.extract_strided_slice %70 {offsets = [0, 0], sizes = [2, 32], strides = [1, 1]} : vector<2x128xf32> to vector<2x32xf32>
    %73 = vector.extract_strided_slice %70 {offsets = [0, 32], sizes = [2, 32], strides = [1, 1]} : vector<2x128xf32> to vector<2x32xf32>
    %74 = vector.extract_strided_slice %71 {offsets = [0, 64], sizes = [2, 32], strides = [1, 1]} : vector<2x128xf32> to vector<2x32xf32>
    %75 = vector.extract_strided_slice %70 {offsets = [0, 96], sizes = [2, 32], strides = [1, 1]} : vector<2x128xf32> to vector<2x32xf32>
    %76 = arith.mulf %73, %37 : vector<2x32xf32>
    %77 = arith.mulf %72, %74 : vector<2x32xf32>
    %78 = arith.addf %76, %77 : vector<2x32xf32>
    %79 = math.tanh %78 : vector<2x32xf32>
    %80 = arith.mulf %75, %79 : vector<2x32xf32>
    %81 = vector.extract_strided_slice %0 {offsets = [0, 1, 0, 0], sizes = [1, 1, 2, 32], strides = [1, 1, 1, 1]} : vector<6x2x2x32xf32> to vector<1x1x2x32xf32>
    %82 = vector.shape_cast %81 : vector<1x1x2x32xf32> to vector<2x32xf32>
    %cst_34 = arith.constant dense<0.000000e+00> : vector<2x128xf32>
    %83 = tpu.matmul %82, %7, %cst_34 {dimension_numbers = #tpu.dot_dimension_numbers<[1], [0], [0], [1], [0, 0, 1, 1], [], []>} : vector<2x32xf32>, vector<32x128xf32>, vector<2x128xf32> -> vector<2x128xf32>
    %cst_35 = arith.constant dense<0.000000e+00> : vector<2x128xf32>
    %84 = tpu.matmul %32, %11, %cst_35 {dimension_numbers = #tpu.dot_dimension_numbers<[1], [0], [0], [1], [0, 0, 1, 1], [], []>} : vector<2x32xf32>, vector<32x128xf32>, vector<2x128xf32> -> vector<2x128xf32>
    %85 = arith.addf %83, %84 : vector<2x128xf32>
    %86 = vector.broadcast %15 : vector<1x128xf32> to vector<2x128xf32>
    %87 = arith.addf %85, %86 : vector<2x128xf32>
    %88 = arith.negf %87 : vector<2x128xf32>
    %89 = math.exp %88 : vector<2x128xf32>
    %cst_36 = arith.constant 1.000000e+00 : f32
    %90 = vector.broadcast %cst_36 : f32 to vector<2x128xf32>
    %91 = arith.addf %90, %89 : vector<2x128xf32>
    %92 = arith.divf %90, %91 : vector<2x128xf32>
    %93 = math.tanh %87 : vector<2x128xf32>
    %94 = vector.extract_strided_slice %92 {offsets = [0, 0], sizes = [2, 32], strides = [1, 1]} : vector<2x128xf32> to vector<2x32xf32>
    %95 = vector.extract_strided_slice %92 {offsets = [0, 32], sizes = [2, 32], strides = [1, 1]} : vector<2x128xf32> to vector<2x32xf32>
    %96 = vector.extract_strided_slice %93 {offsets = [0, 64], sizes = [2, 32], strides = [1, 1]} : vector<2x128xf32> to vector<2x32xf32>
    %97 = vector.extract_strided_slice %92 {offsets = [0, 96], sizes = [2, 32], strides = [1, 1]} : vector<2x128xf32> to vector<2x32xf32>
    %98 = arith.mulf %95, %36 : vector<2x32xf32>
    %99 = arith.mulf %94, %96 : vector<2x32xf32>
    %100 = arith.addf %98, %99 : vector<2x32xf32>
    %101 = math.tanh %100 : vector<2x32xf32>
    %102 = arith.mulf %97, %101 : vector<2x32xf32>
    %cst_37 = arith.constant dense<0.000000e+00> : vector<2x128xf32>
    %103 = tpu.matmul %102, %22, %cst_37 {dimension_numbers = #tpu.dot_dimension_numbers<[1], [0], [0], [1], [0, 0, 1, 1], [], []>} : vector<2x32xf32>, vector<32x128xf32>, vector<2x128xf32> -> vector<2x128xf32>
    %cst_38 = arith.constant dense<0.000000e+00> : vector<2x128xf32>
    %104 = tpu.matmul %34, %26, %cst_38 {dimension_numbers = #tpu.dot_dimension_numbers<[1], [0], [0], [1], [0, 0, 1, 1], [], []>} : vector<2x32xf32>, vector<32x128xf32>, vector<2x128xf32> -> vector<2x128xf32>
    %105 = arith.addf %103, %104 : vector<2x128xf32>
    %106 = vector.broadcast %30 : vector<1x128xf32> to vector<2x128xf32>
    %107 = arith.addf %105, %106 : vector<2x128xf32>
    %108 = arith.negf %107 : vector<2x128xf32>
    %109 = math.exp %108 : vector<2x128xf32>
    %cst_39 = arith.constant 1.000000e+00 : f32
    %110 = vector.broadcast %cst_39 : f32 to vector<2x128xf32>
    %111 = arith.addf %110, %109 : vector<2x128xf32>
    %112 = arith.divf %110, %111 : vector<2x128xf32>
    %113 = math.tanh %107 : vector<2x128xf32>
    %114 = vector.extract_strided_slice %112 {offsets = [0, 0], sizes = [2, 32], strides = [1, 1]} : vector<2x128xf32> to vector<2x32xf32>
    %115 = vector.extract_strided_slice %112 {offsets = [0, 32], sizes = [2, 32], strides = [1, 1]} : vector<2x128xf32> to vector<2x32xf32>
    %116 = vector.extract_strided_slice %113 {offsets = [0, 64], sizes = [2, 32], strides = [1, 1]} : vector<2x128xf32> to vector<2x32xf32>
    %117 = vector.extract_strided_slice %112 {offsets = [0, 96], sizes = [2, 32], strides = [1, 1]} : vector<2x128xf32> to vector<2x32xf32>
    %118 = arith.mulf %115, %38 : vector<2x32xf32>
    %119 = arith.mulf %114, %116 : vector<2x32xf32>
    %120 = arith.addf %118, %119 : vector<2x32xf32>
    %121 = math.tanh %120 : vector<2x32xf32>
    %122 = arith.mulf %117, %121 : vector<2x32xf32>
    %c0_40 = arith.constant 0 : index
    %c0_41 = arith.constant 0 : index
    %123 = vector.load %arg16[%c0_40, %c0_41] : memref<12x32xf32, #tpu.memory_space<vmem>>, vector<2x32xf32>
    tpu.vector_store %arg16[%c0_40, %c0_41], %80 {strides = array<i32>} : memref<12x32xf32, #tpu.memory_space<vmem>>, vector<2x32xf32>,
    %c10 = arith.constant 10 : index
    %c0_42 = arith.constant 0 : index
    %124 = vector.load %arg17[%c10, %c0_42] : memref<12x32xf32, #tpu.memory_space<vmem>>, vector<2x32xf32>
    tpu.vector_store %arg17[%c10, %c0_42], %122 {strides = array<i32>} : memref<12x32xf32, #tpu.memory_space<vmem>>, vector<2x32xf32>,
    %125 = vector.extract_strided_slice %0 {offsets = [1, 0, 0, 0], sizes = [1, 1, 2, 32], strides = [1, 1, 1, 1]} : vector<6x2x2x32xf32> to vector<1x1x2x32xf32>
    %126 = vector.shape_cast %125 : vector<1x1x2x32xf32> to vector<2x32xf32>
    %cst_43 = arith.constant dense<0.000000e+00> : vector<2x128xf32>
    %127 = tpu.matmul %126, %5, %cst_43 {dimension_numbers = #tpu.dot_dimension_numbers<[1], [0], [0], [1], [0, 0, 1, 1], [], []>} : vector<2x32xf32>, vector<32x128xf32>, vector<2x128xf32> -> vector<2x128xf32>
    %cst_44 = arith.constant dense<0.000000e+00> : vector<2x128xf32>
    %128 = tpu.matmul %60, %9, %cst_44 {dimension_numbers = #tpu.dot_dimension_numbers<[1], [0], [0], [1], [0, 0, 1, 1], [], []>} : vector<2x32xf32>, vector<32x128xf32>, vector<2x128xf32> -> vector<2x128xf32>
    %129 = arith.addf %127, %128 : vector<2x128xf32>
    %130 = vector.broadcast %13 : vector<1x128xf32> to vector<2x128xf32>
    %131 = arith.addf %129, %130 : vector<2x128xf32>
    %132 = arith.negf %131 : vector<2x128xf32>
    %133 = math.exp %132 : vector<2x128xf32>
    %cst_45 = arith.constant 1.000000e+00 : f32
    %134 = vector.broadcast %cst_45 : f32 to vector<2x128xf32>
    %135 = arith.addf %134, %133 : vector<2x128xf32>
    %136 = arith.divf %134, %135 : vector<2x128xf32>
    %137 = math.tanh %131 : vector<2x128xf32>
    %138 = vector.extract_strided_slice %136 {offsets = [0, 0], sizes = [2, 32], strides = [1, 1]} : vector<2x128xf32> to vector<2x32xf32>
    %139 = vector.extract_strided_slice %136 {offsets = [0, 32], sizes = [2, 32], strides = [1, 1]} : vector<2x128xf32> to vector<2x32xf32>
    %140 = vector.extract_strided_slice %137 {offsets = [0, 64], sizes = [2, 32], strides = [1, 1]} : vector<2x128xf32> to vector<2x32xf32>
    %141 = vector.extract_strided_slice %136 {offsets = [0, 96], sizes = [2, 32], strides = [1, 1]} : vector<2x128xf32> to vector<2x32xf32>
    %142 = arith.mulf %139, %58 : vector<2x32xf32>
    %143 = arith.mulf %138, %140 : vector<2x32xf32>
    %144 = arith.addf %142, %143 : vector<2x32xf32>
    %145 = math.tanh %144 : vector<2x32xf32>
    %146 = arith.mulf %141, %145 : vector<2x32xf32>
    %cst_46 = arith.constant dense<0.000000e+00> : vector<2x128xf32>
    %147 = tpu.matmul %146, %20, %cst_46 {dimension_numbers = #tpu.dot_dimension_numbers<[1], [0], [0], [1], [0, 0, 1, 1], [], []>} : vector<2x32xf32>, vector<32x128xf32>, vector<2x128xf32> -> vector<2x128xf32>
    %cst_47 = arith.constant dense<0.000000e+00> : vector<2x128xf32>
    %148 = tpu.matmul %80, %24, %cst_47 {dimension_numbers = #tpu.dot_dimension_numbers<[1], [0], [0], [1], [0, 0, 1, 1], [], []>} : vector<2x32xf32>, vector<32x128xf32>, vector<2x128xf32> -> vector<2x128xf32>
    %149 = arith.addf %147, %148 : vector<2x128xf32>
    %150 = vector.broadcast %28 : vector<1x128xf32> to vector<2x128xf32>
    %151 = arith.addf %149, %150 : vector<2x128xf32>
    %152 = arith.negf %151 : vector<2x128xf32>
    %153 = math.exp %152 : vector<2x128xf32>
    %cst_48 = arith.constant 1.000000e+00 : f32
    %154 = vector.broadcast %cst_48 : f32 to vector<2x128xf32>
    %155 = arith.addf %154, %153 : vector<2x128xf32>
    %156 = arith.divf %154, %155 : vector<2x128xf32>
    %157 = math.tanh %151 : vector<2x128xf32>
    %158 = vector.extract_strided_slice %156 {offsets = [0, 0], sizes = [2, 32], strides = [1, 1]} : vector<2x128xf32> to vector<2x32xf32>
    %159 = vector.extract_strided_slice %156 {offsets = [0, 32], sizes = [2, 32], strides = [1, 1]} : vector<2x128xf32> to vector<2x32xf32>
    %160 = vector.extract_strided_slice %157 {offsets = [0, 64], sizes = [2, 32], strides = [1, 1]} : vector<2x128xf32> to vector<2x32xf32>
    %161 = vector.extract_strided_slice %156 {offsets = [0, 96], sizes = [2, 32], strides = [1, 1]} : vector<2x128xf32> to vector<2x32xf32>
    %162 = arith.mulf %159, %78 : vector<2x32xf32>
    %163 = arith.mulf %158, %160 : vector<2x32xf32>
    %164 = arith.addf %162, %163 : vector<2x32xf32>
    %165 = math.tanh %164 : vector<2x32xf32>
    %166 = arith.mulf %161, %165 : vector<2x32xf32>
    %167 = vector.extract_strided_slice %0 {offsets = [1, 1, 0, 0], sizes = [1, 1, 2, 32], strides = [1, 1, 1, 1]} : vector<6x2x2x32xf32> to vector<1x1x2x32xf32>
    %168 = vector.shape_cast %167 : vector<1x1x2x32xf32> to vector<2x32xf32>
    %cst_49 = arith.constant dense<0.000000e+00> : vector<2x128xf32>
    %169 = tpu.matmul %168, %7, %cst_49 {dimension_numbers = #tpu.dot_dimension_numbers<[1], [0], [0], [1], [0, 0, 1, 1], [], []>} : vector<2x32xf32>, vector<32x128xf32>, vector<2x128xf32> -> vector<2x128xf32>
    %cst_50 = arith.constant dense<0.000000e+00> : vector<2x128xf32>
    %170 = tpu.matmul %102, %11, %cst_50 {dimension_numbers = #tpu.dot_dimension_numbers<[1], [0], [0], [1], [0, 0, 1, 1], [], []>} : vector<2x32xf32>, vector<32x128xf32>, vector<2x128xf32> -> vector<2x128xf32>
    %171 = arith.addf %169, %170 : vector<2x128xf32>
    %172 = vector.broadcast %15 : vector<1x128xf32> to vector<2x128xf32>
    %173 = arith.addf %171, %172 : vector<2x128xf32>
    %174 = arith.negf %173 : vector<2x128xf32>
    %175 = math.exp %174 : vector<2x128xf32>
    %cst_51 = arith.constant 1.000000e+00 : f32
    %176 = vector.broadcast %cst_51 : f32 to vector<2x128xf32>
    %177 = arith.addf %176, %175 : vector<2x128xf32>
    %178 = arith.divf %176, %177 : vector<2x128xf32>
    %179 = math.tanh %173 : vector<2x128xf32>
    %180 = vector.extract_strided_slice %178 {offsets = [0, 0], sizes = [2, 32], strides = [1, 1]} : vector<2x128xf32> to vector<2x32xf32>
    %181 = vector.extract_strided_slice %178 {offsets = [0, 32], sizes = [2, 32], strides = [1, 1]} : vector<2x128xf32> to vector<2x32xf32>
    %182 = vector.extract_strided_slice %179 {offsets = [0, 64], sizes = [2, 32], strides = [1, 1]} : vector<2x128xf32> to vector<2x32xf32>
    %183 = vector.extract_strided_slice %178 {offsets = [0, 96], sizes = [2, 32], strides = [1, 1]} : vector<2x128xf32> to vector<2x32xf32>
    %184 = arith.mulf %181, %100 : vector<2x32xf32>
    %185 = arith.mulf %180, %182 : vector<2x32xf32>
    %186 = arith.addf %184, %185 : vector<2x32xf32>
    %187 = math.tanh %186 : vector<2x32xf32>
    %188 = arith.mulf %183, %187 : vector<2x32xf32>
    %cst_52 = arith.constant dense<0.000000e+00> : vector<2x128xf32>
    %189 = tpu.matmul %188, %22, %cst_52 {dimension_numbers = #tpu.dot_dimension_numbers<[1], [0], [0], [1], [0, 0, 1, 1], [], []>} : vector<2x32xf32>, vector<32x128xf32>, vector<2x128xf32> -> vector<2x128xf32>
    %cst_53 = arith.constant dense<0.000000e+00> : vector<2x128xf32>
    %190 = tpu.matmul %122, %26, %cst_53 {dimension_numbers = #tpu.dot_dimension_numbers<[1], [0], [0], [1], [0, 0, 1, 1], [], []>} : vector<2x32xf32>, vector<32x128xf32>, vector<2x128xf32> -> vector<2x128xf32>
    %191 = arith.addf %189, %190 : vector<2x128xf32>
    %192 = vector.broadcast %30 : vector<1x128xf32> to vector<2x128xf32>
    %193 = arith.addf %191, %192 : vector<2x128xf32>
    %194 = arith.negf %193 : vector<2x128xf32>
    %195 = math.exp %194 : vector<2x128xf32>
    %cst_54 = arith.constant 1.000000e+00 : f32
    %196 = vector.broadcast %cst_54 : f32 to vector<2x128xf32>
    %197 = arith.addf %196, %195 : vector<2x128xf32>
    %198 = arith.divf %196, %197 : vector<2x128xf32>
    %199 = math.tanh %193 : vector<2x128xf32>
    %200 = vector.extract_strided_slice %198 {offsets = [0, 0], sizes = [2, 32], strides = [1, 1]} : vector<2x128xf32> to vector<2x32xf32>
    %201 = vector.extract_strided_slice %198 {offsets = [0, 32], sizes = [2, 32], strides = [1, 1]} : vector<2x128xf32> to vector<2x32xf32>
    %202 = vector.extract_strided_slice %199 {offsets = [0, 64], sizes = [2, 32], strides = [1, 1]} : vector<2x128xf32> to vector<2x32xf32>
    %203 = vector.extract_strided_slice %198 {offsets = [0, 96], sizes = [2, 32], strides = [1, 1]} : vector<2x128xf32> to vector<2x32xf32>
    %204 = arith.mulf %201, %120 : vector<2x32xf32>
    %205 = arith.mulf %200, %202 : vector<2x32xf32>
    %206 = arith.addf %204, %205 : vector<2x32xf32>
    %207 = math.tanh %206 : vector<2x32xf32>
    %208 = arith.mulf %203, %207 : vector<2x32xf32>
    %c2 = arith.constant 2 : index
    %c0_55 = arith.constant 0 : index
    %209 = vector.load %arg16[%c2, %c0_55] : memref<12x32xf32, #tpu.memory_space<vmem>>, vector<2x32xf32>
    tpu.vector_store %arg16[%c2, %c0_55], %166 {strides = array<i32>} : memref<12x32xf32, #tpu.memory_space<vmem>>, vector<2x32xf32>,
    %c8 = arith.constant 8 : index
    %c0_56 = arith.constant 0 : index
    %210 = vector.load %arg17[%c8, %c0_56] : memref<12x32xf32, #tpu.memory_space<vmem>>, vector<2x32xf32>
    tpu.vector_store %arg17[%c8, %c0_56], %208 {strides = array<i32>} : memref<12x32xf32, #tpu.memory_space<vmem>>, vector<2x32xf32>,
    %211 = vector.extract_strided_slice %0 {offsets = [2, 0, 0, 0], sizes = [1, 1, 2, 32], strides = [1, 1, 1, 1]} : vector<6x2x2x32xf32> to vector<1x1x2x32xf32>
    %212 = vector.shape_cast %211 : vector<1x1x2x32xf32> to vector<2x32xf32>
    %cst_57 = arith.constant dense<0.000000e+00> : vector<2x128xf32>
    %213 = tpu.matmul %212, %5, %cst_57 {dimension_numbers = #tpu.dot_dimension_numbers<[1], [0], [0], [1], [0, 0, 1, 1], [], []>} : vector<2x32xf32>, vector<32x128xf32>, vector<2x128xf32> -> vector<2x128xf32>
    %cst_58 = arith.constant dense<0.000000e+00> : vector<2x128xf32>
    %214 = tpu.matmul %146, %9, %cst_58 {dimension_numbers = #tpu.dot_dimension_numbers<[1], [0], [0], [1], [0, 0, 1, 1], [], []>} : vector<2x32xf32>, vector<32x128xf32>, vector<2x128xf32> -> vector<2x128xf32>
    %215 = arith.addf %213, %214 : vector<2x128xf32>
    %216 = vector.broadcast %13 : vector<1x128xf32> to vector<2x128xf32>
    %217 = arith.addf %215, %216 : vector<2x128xf32>
    %218 = arith.negf %217 : vector<2x128xf32>
    %219 = math.exp %218 : vector<2x128xf32>
    %cst_59 = arith.constant 1.000000e+00 : f32
    %220 = vector.broadcast %cst_59 : f32 to vector<2x128xf32>
    %221 = arith.addf %220, %219 : vector<2x128xf32>
    %222 = arith.divf %220, %221 : vector<2x128xf32>
    %223 = math.tanh %217 : vector<2x128xf32>
    %224 = vector.extract_strided_slice %222 {offsets = [0, 0], sizes = [2, 32], strides = [1, 1]} : vector<2x128xf32> to vector<2x32xf32>
    %225 = vector.extract_strided_slice %222 {offsets = [0, 32], sizes = [2, 32], strides = [1, 1]} : vector<2x128xf32> to vector<2x32xf32>
    %226 = vector.extract_strided_slice %223 {offsets = [0, 64], sizes = [2, 32], strides = [1, 1]} : vector<2x128xf32> to vector<2x32xf32>
    %227 = vector.extract_strided_slice %222 {offsets = [0, 96], sizes = [2, 32], strides = [1, 1]} : vector<2x128xf32> to vector<2x32xf32>
    %228 = arith.mulf %225, %144 : vector<2x32xf32>
    %229 = arith.mulf %224, %226 : vector<2x32xf32>
    %230 = arith.addf %228, %229 : vector<2x32xf32>
    %231 = math.tanh %230 : vector<2x32xf32>
    %232 = arith.mulf %227, %231 : vector<2x32xf32>
    %cst_60 = arith.constant dense<0.000000e+00> : vector<2x128xf32>
    %233 = tpu.matmul %232, %20, %cst_60 {dimension_numbers = #tpu.dot_dimension_numbers<[1], [0], [0], [1], [0, 0, 1, 1], [], []>} : vector<2x32xf32>, vector<32x128xf32>, vector<2x128xf32> -> vector<2x128xf32>
    %cst_61 = arith.constant dense<0.000000e+00> : vector<2x128xf32>
    %234 = tpu.matmul %166, %24, %cst_61 {dimension_numbers = #tpu.dot_dimension_numbers<[1], [0], [0], [1], [0, 0, 1, 1], [], []>} : vector<2x32xf32>, vector<32x128xf32>, vector<2x128xf32> -> vector<2x128xf32>
    %235 = arith.addf %233, %234 : vector<2x128xf32>
    %236 = vector.broadcast %28 : vector<1x128xf32> to vector<2x128xf32>
    %237 = arith.addf %235, %236 : vector<2x128xf32>
    %238 = arith.negf %237 : vector<2x128xf32>
    %239 = math.exp %238 : vector<2x128xf32>
    %cst_62 = arith.constant 1.000000e+00 : f32
    %240 = vector.broadcast %cst_62 : f32 to vector<2x128xf32>
    %241 = arith.addf %240, %239 : vector<2x128xf32>
    %242 = arith.divf %240, %241 : vector<2x128xf32>
    %243 = math.tanh %237 : vector<2x128xf32>
    %244 = vector.extract_strided_slice %242 {offsets = [0, 0], sizes = [2, 32], strides = [1, 1]} : vector<2x128xf32> to vector<2x32xf32>
    %245 = vector.extract_strided_slice %242 {offsets = [0, 32], sizes = [2, 32], strides = [1, 1]} : vector<2x128xf32> to vector<2x32xf32>
    %246 = vector.extract_strided_slice %243 {offsets = [0, 64], sizes = [2, 32], strides = [1, 1]} : vector<2x128xf32> to vector<2x32xf32>
    %247 = vector.extract_strided_slice %242 {offsets = [0, 96], sizes = [2, 32], strides = [1, 1]} : vector<2x128xf32> to vector<2x32xf32>
    %248 = arith.mulf %245, %164 : vector<2x32xf32>
    %249 = arith.mulf %244, %246 : vector<2x32xf32>
    %250 = arith.addf %248, %249 : vector<2x32xf32>
    %251 = math.tanh %250 : vector<2x32xf32>
    %252 = arith.mulf %247, %251 : vector<2x32xf32>
    %253 = vector.extract_strided_slice %0 {offsets = [2, 1, 0, 0], sizes = [1, 1, 2, 32], strides = [1, 1, 1, 1]} : vector<6x2x2x32xf32> to vector<1x1x2x32xf32>
    %254 = vector.shape_cast %253 : vector<1x1x2x32xf32> to vector<2x32xf32>
    %cst_63 = arith.constant dense<0.000000e+00> : vector<2x128xf32>
    %255 = tpu.matmul %254, %7, %cst_63 {dimension_numbers = #tpu.dot_dimension_numbers<[1], [0], [0], [1], [0, 0, 1, 1], [], []>} : vector<2x32xf32>, vector<32x128xf32>, vector<2x128xf32> -> vector<2x128xf32>
    %cst_64 = arith.constant dense<0.000000e+00> : vector<2x128xf32>
    %256 = tpu.matmul %188, %11, %cst_64 {dimension_numbers = #tpu.dot_dimension_numbers<[1], [0], [0], [1], [0, 0, 1, 1], [], []>} : vector<2x32xf32>, vector<32x128xf32>, vector<2x128xf32> -> vector<2x128xf32>
    %257 = arith.addf %255, %256 : vector<2x128xf32>
    %258 = vector.broadcast %15 : vector<1x128xf32> to vector<2x128xf32>
    %259 = arith.addf %257, %258 : vector<2x128xf32>
    %260 = arith.negf %259 : vector<2x128xf32>
    %261 = math.exp %260 : vector<2x128xf32>
    %cst_65 = arith.constant 1.000000e+00 : f32
    %262 = vector.broadcast %cst_65 : f32 to vector<2x128xf32>
    %263 = arith.addf %262, %261 : vector<2x128xf32>
    %264 = arith.divf %262, %263 : vector<2x128xf32>
    %265 = math.tanh %259 : vector<2x128xf32>
    %266 = vector.extract_strided_slice %264 {offsets = [0, 0], sizes = [2, 32], strides = [1, 1]} : vector<2x128xf32> to vector<2x32xf32>
    %267 = vector.extract_strided_slice %264 {offsets = [0, 32], sizes = [2, 32], strides = [1, 1]} : vector<2x128xf32> to vector<2x32xf32>
    %268 = vector.extract_strided_slice %265 {offsets = [0, 64], sizes = [2, 32], strides = [1, 1]} : vector<2x128xf32> to vector<2x32xf32>
    %269 = vector.extract_strided_slice %264 {offsets = [0, 96], sizes = [2, 32], strides = [1, 1]} : vector<2x128xf32> to vector<2x32xf32>
    %270 = arith.mulf %267, %186 : vector<2x32xf32>
    %271 = arith.mulf %266, %268 : vector<2x32xf32>
    %272 = arith.addf %270, %271 : vector<2x32xf32>
    %273 = math.tanh %272 : vector<2x32xf32>
    %274 = arith.mulf %269, %273 : vector<2x32xf32>
    %cst_66 = arith.constant dense<0.000000e+00> : vector<2x128xf32>
    %275 = tpu.matmul %274, %22, %cst_66 {dimension_numbers = #tpu.dot_dimension_numbers<[1], [0], [0], [1], [0, 0, 1, 1], [], []>} : vector<2x32xf32>, vector<32x128xf32>, vector<2x128xf32> -> vector<2x128xf32>
    %cst_67 = arith.constant dense<0.000000e+00> : vector<2x128xf32>
    %276 = tpu.matmul %208, %26, %cst_67 {dimension_numbers = #tpu.dot_dimension_numbers<[1], [0], [0], [1], [0, 0, 1, 1], [], []>} : vector<2x32xf32>, vector<32x128xf32>, vector<2x128xf32> -> vector<2x128xf32>
    %277 = arith.addf %275, %276 : vector<2x128xf32>
    %278 = vector.broadcast %30 : vector<1x128xf32> to vector<2x128xf32>
    %279 = arith.addf %277, %278 : vector<2x128xf32>
    %280 = arith.negf %279 : vector<2x128xf32>
    %281 = math.exp %280 : vector<2x128xf32>
    %cst_68 = arith.constant 1.000000e+00 : f32
    %282 = vector.broadcast %cst_68 : f32 to vector<2x128xf32>
    %283 = arith.addf %282, %281 : vector<2x128xf32>
    %284 = arith.divf %282, %283 : vector<2x128xf32>
    %285 = math.tanh %279 : vector<2x128xf32>
    %286 = vector.extract_strided_slice %284 {offsets = [0, 0], sizes = [2, 32], strides = [1, 1]} : vector<2x128xf32> to vector<2x32xf32>
    %287 = vector.extract_strided_slice %284 {offsets = [0, 32], sizes = [2, 32], strides = [1, 1]} : vector<2x128xf32> to vector<2x32xf32>
    %288 = vector.extract_strided_slice %285 {offsets = [0, 64], sizes = [2, 32], strides = [1, 1]} : vector<2x128xf32> to vector<2x32xf32>
    %289 = vector.extract_strided_slice %284 {offsets = [0, 96], sizes = [2, 32], strides = [1, 1]} : vector<2x128xf32> to vector<2x32xf32>
    %290 = arith.mulf %287, %206 : vector<2x32xf32>
    %291 = arith.mulf %286, %288 : vector<2x32xf32>
    %292 = arith.addf %290, %291 : vector<2x32xf32>
    %293 = math.tanh %292 : vector<2x32xf32>
    %294 = arith.mulf %289, %293 : vector<2x32xf32>
    %c4 = arith.constant 4 : index
    %c0_69 = arith.constant 0 : index
    %295 = vector.load %arg16[%c4, %c0_69] : memref<12x32xf32, #tpu.memory_space<vmem>>, vector<2x32xf32>
    tpu.vector_store %arg16[%c4, %c0_69], %252 {strides = array<i32>} : memref<12x32xf32, #tpu.memory_space<vmem>>, vector<2x32xf32>,
    %c6 = arith.constant 6 : index
    %c0_70 = arith.constant 0 : index
    %296 = vector.load %arg17[%c6, %c0_70] : memref<12x32xf32, #tpu.memory_space<vmem>>, vector<2x32xf32>
    tpu.vector_store %arg17[%c6, %c0_70], %294 {strides = array<i32>} : memref<12x32xf32, #tpu.memory_space<vmem>>, vector<2x32xf32>,
    %297 = vector.extract_strided_slice %0 {offsets = [3, 0, 0, 0], sizes = [1, 1, 2, 32], strides = [1, 1, 1, 1]} : vector<6x2x2x32xf32> to vector<1x1x2x32xf32>
    %298 = vector.shape_cast %297 : vector<1x1x2x32xf32> to vector<2x32xf32>
    %cst_71 = arith.constant dense<0.000000e+00> : vector<2x128xf32>
    %299 = tpu.matmul %298, %5, %cst_71 {dimension_numbers = #tpu.dot_dimension_numbers<[1], [0], [0], [1], [0, 0, 1, 1], [], []>} : vector<2x32xf32>, vector<32x128xf32>, vector<2x128xf32> -> vector<2x128xf32>
    %cst_72 = arith.constant dense<0.000000e+00> : vector<2x128xf32>
    %300 = tpu.matmul %232, %9, %cst_72 {dimension_numbers = #tpu.dot_dimension_numbers<[1], [0], [0], [1], [0, 0, 1, 1], [], []>} : vector<2x32xf32>, vector<32x128xf32>, vector<2x128xf32> -> vector<2x128xf32>
    %301 = arith.addf %299, %300 : vector<2x128xf32>
    %302 = vector.broadcast %13 : vector<1x128xf32> to vector<2x128xf32>
    %303 = arith.addf %301, %302 : vector<2x128xf32>
    %304 = arith.negf %303 : vector<2x128xf32>
    %305 = math.exp %304 : vector<2x128xf32>
    %cst_73 = arith.constant 1.000000e+00 : f32
    %306 = vector.broadcast %cst_73 : f32 to vector<2x128xf32>
    %307 = arith.addf %306, %305 : vector<2x128xf32>
    %308 = arith.divf %306, %307 : vector<2x128xf32>
    %309 = math.tanh %303 : vector<2x128xf32>
    %310 = vector.extract_strided_slice %308 {offsets = [0, 0], sizes = [2, 32], strides = [1, 1]} : vector<2x128xf32> to vector<2x32xf32>
    %311 = vector.extract_strided_slice %308 {offsets = [0, 32], sizes = [2, 32], strides = [1, 1]} : vector<2x128xf32> to vector<2x32xf32>
    %312 = vector.extract_strided_slice %309 {offsets = [0, 64], sizes = [2, 32], strides = [1, 1]} : vector<2x128xf32> to vector<2x32xf32>
    %313 = vector.extract_strided_slice %308 {offsets = [0, 96], sizes = [2, 32], strides = [1, 1]} : vector<2x128xf32> to vector<2x32xf32>
    %314 = arith.mulf %311, %230 : vector<2x32xf32>
    %315 = arith.mulf %310, %312 : vector<2x32xf32>
    %316 = arith.addf %314, %315 : vector<2x32xf32>
    %317 = math.tanh %316 : vector<2x32xf32>
    %318 = arith.mulf %313, %317 : vector<2x32xf32>
    %cst_74 = arith.constant dense<0.000000e+00> : vector<2x128xf32>
    %319 = tpu.matmul %318, %20, %cst_74 {dimension_numbers = #tpu.dot_dimension_numbers<[1], [0], [0], [1], [0, 0, 1, 1], [], []>} : vector<2x32xf32>, vector<32x128xf32>, vector<2x128xf32> -> vector<2x128xf32>
    %cst_75 = arith.constant dense<0.000000e+00> : vector<2x128xf32>
    %320 = tpu.matmul %252, %24, %cst_75 {dimension_numbers = #tpu.dot_dimension_numbers<[1], [0], [0], [1], [0, 0, 1, 1], [], []>} : vector<2x32xf32>, vector<32x128xf32>, vector<2x128xf32> -> vector<2x128xf32>
    %321 = arith.addf %319, %320 : vector<2x128xf32>
    %322 = vector.broadcast %28 : vector<1x128xf32> to vector<2x128xf32>
    %323 = arith.addf %321, %322 : vector<2x128xf32>
    %324 = arith.negf %323 : vector<2x128xf32>
    %325 = math.exp %324 : vector<2x128xf32>
    %cst_76 = arith.constant 1.000000e+00 : f32
    %326 = vector.broadcast %cst_76 : f32 to vector<2x128xf32>
    %327 = arith.addf %326, %325 : vector<2x128xf32>
    %328 = arith.divf %326, %327 : vector<2x128xf32>
    %329 = math.tanh %323 : vector<2x128xf32>
    %330 = vector.extract_strided_slice %328 {offsets = [0, 0], sizes = [2, 32], strides = [1, 1]} : vector<2x128xf32> to vector<2x32xf32>
    %331 = vector.extract_strided_slice %328 {offsets = [0, 32], sizes = [2, 32], strides = [1, 1]} : vector<2x128xf32> to vector<2x32xf32>
    %332 = vector.extract_strided_slice %329 {offsets = [0, 64], sizes = [2, 32], strides = [1, 1]} : vector<2x128xf32> to vector<2x32xf32>
    %333 = vector.extract_strided_slice %328 {offsets = [0, 96], sizes = [2, 32], strides = [1, 1]} : vector<2x128xf32> to vector<2x32xf32>
    %334 = arith.mulf %331, %250 : vector<2x32xf32>
    %335 = arith.mulf %330, %332 : vector<2x32xf32>
    %336 = arith.addf %334, %335 : vector<2x32xf32>
    %337 = math.tanh %336 : vector<2x32xf32>
    %338 = arith.mulf %333, %337 : vector<2x32xf32>
    %339 = vector.extract_strided_slice %0 {offsets = [3, 1, 0, 0], sizes = [1, 1, 2, 32], strides = [1, 1, 1, 1]} : vector<6x2x2x32xf32> to vector<1x1x2x32xf32>
    %340 = vector.shape_cast %339 : vector<1x1x2x32xf32> to vector<2x32xf32>
    %cst_77 = arith.constant dense<0.000000e+00> : vector<2x128xf32>
    %341 = tpu.matmul %340, %7, %cst_77 {dimension_numbers = #tpu.dot_dimension_numbers<[1], [0], [0], [1], [0, 0, 1, 1], [], []>} : vector<2x32xf32>, vector<32x128xf32>, vector<2x128xf32> -> vector<2x128xf32>
    %cst_78 = arith.constant dense<0.000000e+00> : vector<2x128xf32>
    %342 = tpu.matmul %274, %11, %cst_78 {dimension_numbers = #tpu.dot_dimension_numbers<[1], [0], [0], [1], [0, 0, 1, 1], [], []>} : vector<2x32xf32>, vector<32x128xf32>, vector<2x128xf32> -> vector<2x128xf32>
    %343 = arith.addf %341, %342 : vector<2x128xf32>
    %344 = vector.broadcast %15 : vector<1x128xf32> to vector<2x128xf32>
    %345 = arith.addf %343, %344 : vector<2x128xf32>
    %346 = arith.negf %345 : vector<2x128xf32>
    %347 = math.exp %346 : vector<2x128xf32>
    %cst_79 = arith.constant 1.000000e+00 : f32
    %348 = vector.broadcast %cst_79 : f32 to vector<2x128xf32>
    %349 = arith.addf %348, %347 : vector<2x128xf32>
    %350 = arith.divf %348, %349 : vector<2x128xf32>
    %351 = math.tanh %345 : vector<2x128xf32>
    %352 = vector.extract_strided_slice %350 {offsets = [0, 0], sizes = [2, 32], strides = [1, 1]} : vector<2x128xf32> to vector<2x32xf32>
    %353 = vector.extract_strided_slice %350 {offsets = [0, 32], sizes = [2, 32], strides = [1, 1]} : vector<2x128xf32> to vector<2x32xf32>
    %354 = vector.extract_strided_slice %351 {offsets = [0, 64], sizes = [2, 32], strides = [1, 1]} : vector<2x128xf32> to vector<2x32xf32>
    %355 = vector.extract_strided_slice %350 {offsets = [0, 96], sizes = [2, 32], strides = [1, 1]} : vector<2x128xf32> to vector<2x32xf32>
    %356 = arith.mulf %353, %272 : vector<2x32xf32>
    %357 = arith.mulf %352, %354 : vector<2x32xf32>
    %358 = arith.addf %356, %357 : vector<2x32xf32>
    %359 = math.tanh %358 : vector<2x32xf32>
    %360 = arith.mulf %355, %359 : vector<2x32xf32>
    %cst_80 = arith.constant dense<0.000000e+00> : vector<2x128xf32>
    %361 = tpu.matmul %360, %22, %cst_80 {dimension_numbers = #tpu.dot_dimension_numbers<[1], [0], [0], [1], [0, 0, 1, 1], [], []>} : vector<2x32xf32>, vector<32x128xf32>, vector<2x128xf32> -> vector<2x128xf32>
    %cst_81 = arith.constant dense<0.000000e+00> : vector<2x128xf32>
    %362 = tpu.matmul %294, %26, %cst_81 {dimension_numbers = #tpu.dot_dimension_numbers<[1], [0], [0], [1], [0, 0, 1, 1], [], []>} : vector<2x32xf32>, vector<32x128xf32>, vector<2x128xf32> -> vector<2x128xf32>
    %363 = arith.addf %361, %362 : vector<2x128xf32>
    %364 = vector.broadcast %30 : vector<1x128xf32> to vector<2x128xf32>
    %365 = arith.addf %363, %364 : vector<2x128xf32>
    %366 = arith.negf %365 : vector<2x128xf32>
    %367 = math.exp %366 : vector<2x128xf32>
    %cst_82 = arith.constant 1.000000e+00 : f32
    %368 = vector.broadcast %cst_82 : f32 to vector<2x128xf32>
    %369 = arith.addf %368, %367 : vector<2x128xf32>
    %370 = arith.divf %368, %369 : vector<2x128xf32>
    %371 = math.tanh %365 : vector<2x128xf32>
    %372 = vector.extract_strided_slice %370 {offsets = [0, 0], sizes = [2, 32], strides = [1, 1]} : vector<2x128xf32> to vector<2x32xf32>
    %373 = vector.extract_strided_slice %370 {offsets = [0, 32], sizes = [2, 32], strides = [1, 1]} : vector<2x128xf32> to vector<2x32xf32>
    %374 = vector.extract_strided_slice %371 {offsets = [0, 64], sizes = [2, 32], strides = [1, 1]} : vector<2x128xf32> to vector<2x32xf32>
    %375 = vector.extract_strided_slice %370 {offsets = [0, 96], sizes = [2, 32], strides = [1, 1]} : vector<2x128xf32> to vector<2x32xf32>
    %376 = arith.mulf %373, %292 : vector<2x32xf32>
    %377 = arith.mulf %372, %374 : vector<2x32xf32>
    %378 = arith.addf %376, %377 : vector<2x32xf32>
    %379 = math.tanh %378 : vector<2x32xf32>
    %380 = arith.mulf %375, %379 : vector<2x32xf32>
    %c6_83 = arith.constant 6 : index
    %c0_84 = arith.constant 0 : index
    %381 = vector.load %arg16[%c6_83, %c0_84] : memref<12x32xf32, #tpu.memory_space<vmem>>, vector<2x32xf32>
    tpu.vector_store %arg16[%c6_83, %c0_84], %338 {strides = array<i32>} : memref<12x32xf32, #tpu.memory_space<vmem>>, vector<2x32xf32>,
    %c4_85 = arith.constant 4 : index
    %c0_86 = arith.constant 0 : index
    %382 = vector.load %arg17[%c4_85, %c0_86] : memref<12x32xf32, #tpu.memory_space<vmem>>, vector<2x32xf32>
    tpu.vector_store %arg17[%c4_85, %c0_86], %380 {strides = array<i32>} : memref<12x32xf32, #tpu.memory_space<vmem>>, vector<2x32xf32>,
    %383 = vector.extract_strided_slice %0 {offsets = [4, 0, 0, 0], sizes = [1, 1, 2, 32], strides = [1, 1, 1, 1]} : vector<6x2x2x32xf32> to vector<1x1x2x32xf32>
    %384 = vector.shape_cast %383 : vector<1x1x2x32xf32> to vector<2x32xf32>
    %cst_87 = arith.constant dense<0.000000e+00> : vector<2x128xf32>
    %385 = tpu.matmul %384, %5, %cst_87 {dimension_numbers = #tpu.dot_dimension_numbers<[1], [0], [0], [1], [0, 0, 1, 1], [], []>} : vector<2x32xf32>, vector<32x128xf32>, vector<2x128xf32> -> vector<2x128xf32>
    %cst_88 = arith.constant dense<0.000000e+00> : vector<2x128xf32>
    %386 = tpu.matmul %318, %9, %cst_88 {dimension_numbers = #tpu.dot_dimension_numbers<[1], [0], [0], [1], [0, 0, 1, 1], [], []>} : vector<2x32xf32>, vector<32x128xf32>, vector<2x128xf32> -> vector<2x128xf32>
    %387 = arith.addf %385, %386 : vector<2x128xf32>
    %388 = vector.broadcast %13 : vector<1x128xf32> to vector<2x128xf32>
    %389 = arith.addf %387, %388 : vector<2x128xf32>
    %390 = arith.negf %389 : vector<2x128xf32>
    %391 = math.exp %390 : vector<2x128xf32>
    %cst_89 = arith.constant 1.000000e+00 : f32
    %392 = vector.broadcast %cst_89 : f32 to vector<2x128xf32>
    %393 = arith.addf %392, %391 : vector<2x128xf32>
    %394 = arith.divf %392, %393 : vector<2x128xf32>
    %395 = math.tanh %389 : vector<2x128xf32>
    %396 = vector.extract_strided_slice %394 {offsets = [0, 0], sizes = [2, 32], strides = [1, 1]} : vector<2x128xf32> to vector<2x32xf32>
    %397 = vector.extract_strided_slice %394 {offsets = [0, 32], sizes = [2, 32], strides = [1, 1]} : vector<2x128xf32> to vector<2x32xf32>
    %398 = vector.extract_strided_slice %395 {offsets = [0, 64], sizes = [2, 32], strides = [1, 1]} : vector<2x128xf32> to vector<2x32xf32>
    %399 = vector.extract_strided_slice %394 {offsets = [0, 96], sizes = [2, 32], strides = [1, 1]} : vector<2x128xf32> to vector<2x32xf32>
    %400 = arith.mulf %397, %316 : vector<2x32xf32>
    %401 = arith.mulf %396, %398 : vector<2x32xf32>
    %402 = arith.addf %400, %401 : vector<2x32xf32>
    %403 = math.tanh %402 : vector<2x32xf32>
    %404 = arith.mulf %399, %403 : vector<2x32xf32>
    %cst_90 = arith.constant dense<0.000000e+00> : vector<2x128xf32>
    %405 = tpu.matmul %404, %20, %cst_90 {dimension_numbers = #tpu.dot_dimension_numbers<[1], [0], [0], [1], [0, 0, 1, 1], [], []>} : vector<2x32xf32>, vector<32x128xf32>, vector<2x128xf32> -> vector<2x128xf32>
    %cst_91 = arith.constant dense<0.000000e+00> : vector<2x128xf32>
    %406 = tpu.matmul %338, %24, %cst_91 {dimension_numbers = #tpu.dot_dimension_numbers<[1], [0], [0], [1], [0, 0, 1, 1], [], []>} : vector<2x32xf32>, vector<32x128xf32>, vector<2x128xf32> -> vector<2x128xf32>
    %407 = arith.addf %405, %406 : vector<2x128xf32>
    %408 = vector.broadcast %28 : vector<1x128xf32> to vector<2x128xf32>
    %409 = arith.addf %407, %408 : vector<2x128xf32>
    %410 = arith.negf %409 : vector<2x128xf32>
    %411 = math.exp %410 : vector<2x128xf32>
    %cst_92 = arith.constant 1.000000e+00 : f32
    %412 = vector.broadcast %cst_92 : f32 to vector<2x128xf32>
    %413 = arith.addf %412, %411 : vector<2x128xf32>
    %414 = arith.divf %412, %413 : vector<2x128xf32>
    %415 = math.tanh %409 : vector<2x128xf32>
    %416 = vector.extract_strided_slice %414 {offsets = [0, 0], sizes = [2, 32], strides = [1, 1]} : vector<2x128xf32> to vector<2x32xf32>
    %417 = vector.extract_strided_slice %414 {offsets = [0, 32], sizes = [2, 32], strides = [1, 1]} : vector<2x128xf32> to vector<2x32xf32>
    %418 = vector.extract_strided_slice %415 {offsets = [0, 64], sizes = [2, 32], strides = [1, 1]} : vector<2x128xf32> to vector<2x32xf32>
    %419 = vector.extract_strided_slice %414 {offsets = [0, 96], sizes = [2, 32], strides = [1, 1]} : vector<2x128xf32> to vector<2x32xf32>
    %420 = arith.mulf %417, %336 : vector<2x32xf32>
    %421 = arith.mulf %416, %418 : vector<2x32xf32>
    %422 = arith.addf %420, %421 : vector<2x32xf32>
    %423 = math.tanh %422 : vector<2x32xf32>
    %424 = arith.mulf %419, %423 : vector<2x32xf32>
    %425 = vector.extract_strided_slice %0 {offsets = [4, 1, 0, 0], sizes = [1, 1, 2, 32], strides = [1, 1, 1, 1]} : vector<6x2x2x32xf32> to vector<1x1x2x32xf32>
    %426 = vector.shape_cast %425 : vector<1x1x2x32xf32> to vector<2x32xf32>
    %cst_93 = arith.constant dense<0.000000e+00> : vector<2x128xf32>
    %427 = tpu.matmul %426, %7, %cst_93 {dimension_numbers = #tpu.dot_dimension_numbers<[1], [0], [0], [1], [0, 0, 1, 1], [], []>} : vector<2x32xf32>, vector<32x128xf32>, vector<2x128xf32> -> vector<2x128xf32>
    %cst_94 = arith.constant dense<0.000000e+00> : vector<2x128xf32>
    %428 = tpu.matmul %360, %11, %cst_94 {dimension_numbers = #tpu.dot_dimension_numbers<[1], [0], [0], [1], [0, 0, 1, 1], [], []>} : vector<2x32xf32>, vector<32x128xf32>, vector<2x128xf32> -> vector<2x128xf32>
    %429 = arith.addf %427, %428 : vector<2x128xf32>
    %430 = vector.broadcast %15 : vector<1x128xf32> to vector<2x128xf32>
    %431 = arith.addf %429, %430 : vector<2x128xf32>
    %432 = arith.negf %431 : vector<2x128xf32>
    %433 = math.exp %432 : vector<2x128xf32>
    %cst_95 = arith.constant 1.000000e+00 : f32
    %434 = vector.broadcast %cst_95 : f32 to vector<2x128xf32>
    %435 = arith.addf %434, %433 : vector<2x128xf32>
    %436 = arith.divf %434, %435 : vector<2x128xf32>
    %437 = math.tanh %431 : vector<2x128xf32>
    %438 = vector.extract_strided_slice %436 {offsets = [0, 0], sizes = [2, 32], strides = [1, 1]} : vector<2x128xf32> to vector<2x32xf32>
    %439 = vector.extract_strided_slice %436 {offsets = [0, 32], sizes = [2, 32], strides = [1, 1]} : vector<2x128xf32> to vector<2x32xf32>
    %440 = vector.extract_strided_slice %437 {offsets = [0, 64], sizes = [2, 32], strides = [1, 1]} : vector<2x128xf32> to vector<2x32xf32>
    %441 = vector.extract_strided_slice %436 {offsets = [0, 96], sizes = [2, 32], strides = [1, 1]} : vector<2x128xf32> to vector<2x32xf32>
    %442 = arith.mulf %439, %358 : vector<2x32xf32>
    %443 = arith.mulf %438, %440 : vector<2x32xf32>
    %444 = arith.addf %442, %443 : vector<2x32xf32>
    %445 = math.tanh %444 : vector<2x32xf32>
    %446 = arith.mulf %441, %445 : vector<2x32xf32>
    %cst_96 = arith.constant dense<0.000000e+00> : vector<2x128xf32>
    %447 = tpu.matmul %446, %22, %cst_96 {dimension_numbers = #tpu.dot_dimension_numbers<[1], [0], [0], [1], [0, 0, 1, 1], [], []>} : vector<2x32xf32>, vector<32x128xf32>, vector<2x128xf32> -> vector<2x128xf32>
    %cst_97 = arith.constant dense<0.000000e+00> : vector<2x128xf32>
    %448 = tpu.matmul %380, %26, %cst_97 {dimension_numbers = #tpu.dot_dimension_numbers<[1], [0], [0], [1], [0, 0, 1, 1], [], []>} : vector<2x32xf32>, vector<32x128xf32>, vector<2x128xf32> -> vector<2x128xf32>
    %449 = arith.addf %447, %448 : vector<2x128xf32>
    %450 = vector.broadcast %30 : vector<1x128xf32> to vector<2x128xf32>
    %451 = arith.addf %449, %450 : vector<2x128xf32>
    %452 = arith.negf %451 : vector<2x128xf32>
    %453 = math.exp %452 : vector<2x128xf32>
    %cst_98 = arith.constant 1.000000e+00 : f32
    %454 = vector.broadcast %cst_98 : f32 to vector<2x128xf32>
    %455 = arith.addf %454, %453 : vector<2x128xf32>
    %456 = arith.divf %454, %455 : vector<2x128xf32>
    %457 = math.tanh %451 : vector<2x128xf32>
    %458 = vector.extract_strided_slice %456 {offsets = [0, 0], sizes = [2, 32], strides = [1, 1]} : vector<2x128xf32> to vector<2x32xf32>
    %459 = vector.extract_strided_slice %456 {offsets = [0, 32], sizes = [2, 32], strides = [1, 1]} : vector<2x128xf32> to vector<2x32xf32>
    %460 = vector.extract_strided_slice %457 {offsets = [0, 64], sizes = [2, 32], strides = [1, 1]} : vector<2x128xf32> to vector<2x32xf32>
    %461 = vector.extract_strided_slice %456 {offsets = [0, 96], sizes = [2, 32], strides = [1, 1]} : vector<2x128xf32> to vector<2x32xf32>
    %462 = arith.mulf %459, %378 : vector<2x32xf32>
    %463 = arith.mulf %458, %460 : vector<2x32xf32>
    %464 = arith.addf %462, %463 : vector<2x32xf32>
    %465 = math.tanh %464 : vector<2x32xf32>
    %466 = arith.mulf %461, %465 : vector<2x32xf32>
    %c8_99 = arith.constant 8 : index
    %c0_100 = arith.constant 0 : index
    %467 = vector.load %arg16[%c8_99, %c0_100] : memref<12x32xf32, #tpu.memory_space<vmem>>, vector<2x32xf32>
    tpu.vector_store %arg16[%c8_99, %c0_100], %424 {strides = array<i32>} : memref<12x32xf32, #tpu.memory_space<vmem>>, vector<2x32xf32>,
    %c2_101 = arith.constant 2 : index
    %c0_102 = arith.constant 0 : index
    %468 = vector.load %arg17[%c2_101, %c0_102] : memref<12x32xf32, #tpu.memory_space<vmem>>, vector<2x32xf32>
    tpu.vector_store %arg17[%c2_101, %c0_102], %466 {strides = array<i32>} : memref<12x32xf32, #tpu.memory_space<vmem>>, vector<2x32xf32>,
    %469 = vector.extract_strided_slice %0 {offsets = [5, 0, 0, 0], sizes = [1, 1, 2, 32], strides = [1, 1, 1, 1]} : vector<6x2x2x32xf32> to vector<1x1x2x32xf32>
    %470 = vector.shape_cast %469 : vector<1x1x2x32xf32> to vector<2x32xf32>
    %cst_103 = arith.constant dense<0.000000e+00> : vector<2x128xf32>
    %471 = tpu.matmul %470, %5, %cst_103 {dimension_numbers = #tpu.dot_dimension_numbers<[1], [0], [0], [1], [0, 0, 1, 1], [], []>} : vector<2x32xf32>, vector<32x128xf32>, vector<2x128xf32> -> vector<2x128xf32>
    %cst_104 = arith.constant dense<0.000000e+00> : vector<2x128xf32>
    %472 = tpu.matmul %404, %9, %cst_104 {dimension_numbers = #tpu.dot_dimension_numbers<[1], [0], [0], [1], [0, 0, 1, 1], [], []>} : vector<2x32xf32>, vector<32x128xf32>, vector<2x128xf32> -> vector<2x128xf32>
    %473 = arith.addf %471, %472 : vector<2x128xf32>
    %474 = vector.broadcast %13 : vector<1x128xf32> to vector<2x128xf32>
    %475 = arith.addf %473, %474 : vector<2x128xf32>
    %476 = arith.negf %475 : vector<2x128xf32>
    %477 = math.exp %476 : vector<2x128xf32>
    %cst_105 = arith.constant 1.000000e+00 : f32
    %478 = vector.broadcast %cst_105 : f32 to vector<2x128xf32>
    %479 = arith.addf %478, %477 : vector<2x128xf32>
    %480 = arith.divf %478, %479 : vector<2x128xf32>
    %481 = math.tanh %475 : vector<2x128xf32>
    %482 = vector.extract_strided_slice %480 {offsets = [0, 0], sizes = [2, 32], strides = [1, 1]} : vector<2x128xf32> to vector<2x32xf32>
    %483 = vector.extract_strided_slice %480 {offsets = [0, 32], sizes = [2, 32], strides = [1, 1]} : vector<2x128xf32> to vector<2x32xf32>
    %484 = vector.extract_strided_slice %481 {offsets = [0, 64], sizes = [2, 32], strides = [1, 1]} : vector<2x128xf32> to vector<2x32xf32>
    %485 = vector.extract_strided_slice %480 {offsets = [0, 96], sizes = [2, 32], strides = [1, 1]} : vector<2x128xf32> to vector<2x32xf32>
    %486 = arith.mulf %483, %402 : vector<2x32xf32>
    %487 = arith.mulf %482, %484 : vector<2x32xf32>
    %488 = arith.addf %486, %487 : vector<2x32xf32>
    %489 = math.tanh %488 : vector<2x32xf32>
    %490 = arith.mulf %485, %489 : vector<2x32xf32>
    %cst_106 = arith.constant dense<0.000000e+00> : vector<2x128xf32>
    %491 = tpu.matmul %490, %20, %cst_106 {dimension_numbers = #tpu.dot_dimension_numbers<[1], [0], [0], [1], [0, 0, 1, 1], [], []>} : vector<2x32xf32>, vector<32x128xf32>, vector<2x128xf32> -> vector<2x128xf32>
    %cst_107 = arith.constant dense<0.000000e+00> : vector<2x128xf32>
    %492 = tpu.matmul %424, %24, %cst_107 {dimension_numbers = #tpu.dot_dimension_numbers<[1], [0], [0], [1], [0, 0, 1, 1], [], []>} : vector<2x32xf32>, vector<32x128xf32>, vector<2x128xf32> -> vector<2x128xf32>
    %493 = arith.addf %491, %492 : vector<2x128xf32>
    %494 = vector.broadcast %28 : vector<1x128xf32> to vector<2x128xf32>
    %495 = arith.addf %493, %494 : vector<2x128xf32>
    %496 = arith.negf %495 : vector<2x128xf32>
    %497 = math.exp %496 : vector<2x128xf32>
    %cst_108 = arith.constant 1.000000e+00 : f32
    %498 = vector.broadcast %cst_108 : f32 to vector<2x128xf32>
    %499 = arith.addf %498, %497 : vector<2x128xf32>
    %500 = arith.divf %498, %499 : vector<2x128xf32>
    %501 = math.tanh %495 : vector<2x128xf32>
    %502 = vector.extract_strided_slice %500 {offsets = [0, 0], sizes = [2, 32], strides = [1, 1]} : vector<2x128xf32> to vector<2x32xf32>
    %503 = vector.extract_strided_slice %500 {offsets = [0, 32], sizes = [2, 32], strides = [1, 1]} : vector<2x128xf32> to vector<2x32xf32>
    %504 = vector.extract_strided_slice %501 {offsets = [0, 64], sizes = [2, 32], strides = [1, 1]} : vector<2x128xf32> to vector<2x32xf32>
    %505 = vector.extract_strided_slice %500 {offsets = [0, 96], sizes = [2, 32], strides = [1, 1]} : vector<2x128xf32> to vector<2x32xf32>
    %506 = arith.mulf %503, %422 : vector<2x32xf32>
    %507 = arith.mulf %502, %504 : vector<2x32xf32>
    %508 = arith.addf %506, %507 : vector<2x32xf32>
    %509 = math.tanh %508 : vector<2x32xf32>
    %510 = arith.mulf %505, %509 : vector<2x32xf32>
    %511 = vector.extract_strided_slice %0 {offsets = [5, 1, 0, 0], sizes = [1, 1, 2, 32], strides = [1, 1, 1, 1]} : vector<6x2x2x32xf32> to vector<1x1x2x32xf32>
    %512 = vector.shape_cast %511 : vector<1x1x2x32xf32> to vector<2x32xf32>
    %cst_109 = arith.constant dense<0.000000e+00> : vector<2x128xf32>
    %513 = tpu.matmul %512, %7, %cst_109 {dimension_numbers = #tpu.dot_dimension_numbers<[1], [0], [0], [1], [0, 0, 1, 1], [], []>} : vector<2x32xf32>, vector<32x128xf32>, vector<2x128xf32> -> vector<2x128xf32>
    %cst_110 = arith.constant dense<0.000000e+00> : vector<2x128xf32>
    %514 = tpu.matmul %446, %11, %cst_110 {dimension_numbers = #tpu.dot_dimension_numbers<[1], [0], [0], [1], [0, 0, 1, 1], [], []>} : vector<2x32xf32>, vector<32x128xf32>, vector<2x128xf32> -> vector<2x128xf32>
    %515 = arith.addf %513, %514 : vector<2x128xf32>
    %516 = vector.broadcast %15 : vector<1x128xf32> to vector<2x128xf32>
    %517 = arith.addf %515, %516 : vector<2x128xf32>
    %518 = arith.negf %517 : vector<2x128xf32>
    %519 = math.exp %518 : vector<2x128xf32>
    %cst_111 = arith.constant 1.000000e+00 : f32
    %520 = vector.broadcast %cst_111 : f32 to vector<2x128xf32>
    %521 = arith.addf %520, %519 : vector<2x128xf32>
    %522 = arith.divf %520, %521 : vector<2x128xf32>
    %523 = math.tanh %517 : vector<2x128xf32>
    %524 = vector.extract_strided_slice %522 {offsets = [0, 0], sizes = [2, 32], strides = [1, 1]} : vector<2x128xf32> to vector<2x32xf32>
    %525 = vector.extract_strided_slice %522 {offsets = [0, 32], sizes = [2, 32], strides = [1, 1]} : vector<2x128xf32> to vector<2x32xf32>
    %526 = vector.extract_strided_slice %523 {offsets = [0, 64], sizes = [2, 32], strides = [1, 1]} : vector<2x128xf32> to vector<2x32xf32>
    %527 = vector.extract_strided_slice %522 {offsets = [0, 96], sizes = [2, 32], strides = [1, 1]} : vector<2x128xf32> to vector<2x32xf32>
    %528 = arith.mulf %525, %444 : vector<2x32xf32>
    %529 = arith.mulf %524, %526 : vector<2x32xf32>
    %530 = arith.addf %528, %529 : vector<2x32xf32>
    %531 = math.tanh %530 : vector<2x32xf32>
    %532 = arith.mulf %527, %531 : vector<2x32xf32>
    %cst_112 = arith.constant dense<0.000000e+00> : vector<2x128xf32>
    %533 = tpu.matmul %532, %22, %cst_112 {dimension_numbers = #tpu.dot_dimension_numbers<[1], [0], [0], [1], [0, 0, 1, 1], [], []>} : vector<2x32xf32>, vector<32x128xf32>, vector<2x128xf32> -> vector<2x128xf32>
    %cst_113 = arith.constant dense<0.000000e+00> : vector<2x128xf32>
    %534 = tpu.matmul %466, %26, %cst_113 {dimension_numbers = #tpu.dot_dimension_numbers<[1], [0], [0], [1], [0, 0, 1, 1], [], []>} : vector<2x32xf32>, vector<32x128xf32>, vector<2x128xf32> -> vector<2x128xf32>
    %535 = arith.addf %533, %534 : vector<2x128xf32>
    %536 = vector.broadcast %30 : vector<1x128xf32> to vector<2x128xf32>
    %537 = arith.addf %535, %536 : vector<2x128xf32>
    %538 = arith.negf %537 : vector<2x128xf32>
    %539 = math.exp %538 : vector<2x128xf32>
    %cst_114 = arith.constant 1.000000e+00 : f32
    %540 = vector.broadcast %cst_114 : f32 to vector<2x128xf32>
    %541 = arith.addf %540, %539 : vector<2x128xf32>
    %542 = arith.divf %540, %541 : vector<2x128xf32>
    %543 = math.tanh %537 : vector<2x128xf32>
    %544 = vector.extract_strided_slice %542 {offsets = [0, 0], sizes = [2, 32], strides = [1, 1]} : vector<2x128xf32> to vector<2x32xf32>
    %545 = vector.extract_strided_slice %542 {offsets = [0, 32], sizes = [2, 32], strides = [1, 1]} : vector<2x128xf32> to vector<2x32xf32>
    %546 = vector.extract_strided_slice %543 {offsets = [0, 64], sizes = [2, 32], strides = [1, 1]} : vector<2x128xf32> to vector<2x32xf32>
    %547 = vector.extract_strided_slice %542 {offsets = [0, 96], sizes = [2, 32], strides = [1, 1]} : vector<2x128xf32> to vector<2x32xf32>
    %548 = arith.mulf %545, %464 : vector<2x32xf32>
    %549 = arith.mulf %544, %546 : vector<2x32xf32>
    %550 = arith.addf %548, %549 : vector<2x32xf32>
    %551 = math.tanh %550 : vector<2x32xf32>
    %552 = arith.mulf %547, %551 : vector<2x32xf32>
    %c10_115 = arith.constant 10 : index
    %c0_116 = arith.constant 0 : index
    %553 = vector.load %arg16[%c10_115, %c0_116] : memref<12x32xf32, #tpu.memory_space<vmem>>, vector<2x32xf32>
    tpu.vector_store %arg16[%c10_115, %c0_116], %510 {strides = array<i32>} : memref<12x32xf32, #tpu.memory_space<vmem>>, vector<2x32xf32>,
    %c0_117 = arith.constant 0 : index
    %c0_118 = arith.constant 0 : index
    %554 = vector.load %arg17[%c0_117, %c0_118] : memref<12x32xf32, #tpu.memory_space<vmem>>, vector<2x32xf32>
    tpu.vector_store %arg17[%c0_117, %c0_118], %552 {strides = array<i32>} : memref<12x32xf32, #tpu.memory_space<vmem>>, vector<2x32xf32>,
    %c0_119 = arith.constant 0 : index
    %c0_120 = arith.constant 0 : index
    %555 = vector.load %arg8[%c0_119, %c0_120] : memref<32x64xf32, #tpu.memory_space<vmem>>, vector<32x64xf32>
    %c0_121 = arith.constant 0 : index
    %c0_122 = arith.constant 0 : index
    %556 = vector.load %arg9[%c0_121, %c0_122] : memref<32x64xf32, #tpu.memory_space<vmem>>, vector<32x64xf32>
    %c0_123 = arith.constant 0 : index
    %c0_124 = arith.constant 0 : index
    %557 = vector.load %arg11[%c0_123, %c0_124] : memref<64x32xf32, #tpu.memory_space<vmem>>, vector<64x32xf32>
    %c0_125 = arith.constant 0 : index
    %c0_126 = arith.constant 0 : index
    %558 = vector.load %arg16[%c0_125, %c0_126] : memref<12x32xf32, #tpu.memory_space<vmem>>, vector<12x32xf32>
    %cst_127 = arith.constant dense<0.000000e+00> : vector<12x64xf32>
    %559 = tpu.matmul %558, %555, %cst_127 {dimension_numbers = #tpu.dot_dimension_numbers<[1], [0], [0], [1], [0, 0, 1, 1], [], []>} : vector<12x32xf32>, vector<32x64xf32>, vector<12x64xf32> -> vector<12x64xf32>
    %c0_128 = arith.constant 0 : index
    %c0_129 = arith.constant 0 : index
    %560 = vector.load %arg17[%c0_128, %c0_129] : memref<12x32xf32, #tpu.memory_space<vmem>>, vector<12x32xf32>
    %cst_130 = arith.constant dense<0.000000e+00> : vector<12x64xf32>
    %561 = tpu.matmul %560, %556, %cst_130 {dimension_numbers = #tpu.dot_dimension_numbers<[1], [0], [0], [1], [0, 0, 1, 1], [], []>} : vector<12x32xf32>, vector<32x64xf32>, vector<12x64xf32> -> vector<12x64xf32>
    %562 = arith.addf %559, %561 : vector<12x64xf32>
    %c0_131 = arith.constant 0 : index
    %c0_132 = arith.constant 0 : index
    %563 = vector.load %arg10[%c0_131, %c0_132] : memref<1x64xf32, #tpu.memory_space<vmem>>, vector<1x64xf32>
    %564 = vector.broadcast %563 : vector<1x64xf32> to vector<12x64xf32>
    %565 = arith.addf %562, %564 : vector<12x64xf32>
    %cst_133 = arith.constant 0.000000e+00 : f32
    %566 = vector.broadcast %cst_133 : f32 to vector<12x64xf32>
    %567 = arith.maximumf %565, %566 : vector<12x64xf32>
    %cst_134 = arith.constant dense<0.000000e+00> : vector<12x32xf32>
    %568 = tpu.matmul %567, %557, %cst_134 {dimension_numbers = #tpu.dot_dimension_numbers<[1], [0], [0], [1], [0, 0, 1, 1], [], []>} : vector<12x64xf32>, vector<64x32xf32>, vector<12x32xf32> -> vector<12x32xf32>
    %c0_135 = arith.constant 0 : index
    %c0_136 = arith.constant 0 : index
    %569 = vector.load %arg12[%c0_135, %c0_136] : memref<1x32xf32, #tpu.memory_space<vmem>>, vector<1x32xf32>
    %570 = vector.broadcast %569 : vector<1x32xf32> to vector<12x32xf32>
    %571 = arith.addf %568, %570 : vector<12x32xf32>
    %c0_137 = arith.constant 0 : index
    %c0_138 = arith.constant 0 : index
    %572 = vector.load %arg13[%c0_137, %c0_138] : memref<12x32xf32, #tpu.memory_space<vmem>>, vector<12x32xf32>
    %c0_139 = arith.constant 0 : index
    %c0_140 = arith.constant 0 : index
    %c0_141 = arith.constant 0 : index
    %573 = vector.load %arg14[%c0_139, %c0_140, %c0_141] : memref<10x12x32xf32, #tpu.memory_space<vmem>>, vector<10x12x32xf32>
    %574 = arith.mulf %572, %571 : vector<12x32xf32>
    %cst_142 = arith.constant dense<0.000000e+00> : vector<12xf32>
    %575 = vector.multi_reduction <add>, %574, %cst_142 [1] : vector<12x32xf32> to vector<12xf32>
    %576 = vector.shape_cast %575 : vector<12xf32> to vector<12x1xf32>
    %577 = vector.shape_cast %571 : vector<12x32xf32> to vector<1x12x32xf32>
    %578 = vector.broadcast %577 : vector<1x12x32xf32> to vector<10x12x32xf32>
    %579 = arith.mulf %573, %578 : vector<10x12x32xf32>
    %cst_143 = arith.constant dense<0.000000e+00> : vector<10x12xf32>
    %580 = vector.multi_reduction <add>, %579, %cst_143 [2] : vector<10x12x32xf32> to vector<10x12xf32>
    %cst_144 = arith.constant 0.000000e+00 : f32
    %581 = vector.broadcast %cst_144 : f32 to vector<12x1xf32>
    %582 = arith.minimumf %576, %581 : vector<12x1xf32>
    %583 = math.absf %576 : vector<12x1xf32>
    %cst_145 = arith.constant 0.000000e+00 : f32
    %584 = vector.broadcast %cst_145 : f32 to vector<12x1xf32>
    %585 = arith.subf %584, %583 : vector<12x1xf32>
    %586 = math.exp %585 : vector<12x1xf32>
    %cst_146 = arith.constant 1.000000e+00 : f32
    %587 = vector.broadcast %cst_146 : f32 to vector<12x1xf32>
    %588 = arith.addf %587, %586 : vector<12x1xf32>
    %589 = math.log %588 : vector<12x1xf32>
    %590 = arith.subf %582, %589 : vector<12x1xf32>
    %cst_147 = arith.constant dense<0.000000e+00> : vector<1xf32>
    %591 = vector.multi_reduction <add>, %590, %cst_147 [0] : vector<12x1xf32> to vector<1xf32>
    %592 = vector.shape_cast %591 : vector<1xf32> to vector<1x1xf32>
    %cst_148 = arith.constant 0.000000e+00 : f32
    %593 = vector.broadcast %cst_148 : f32 to vector<10x12xf32>
    %594 = arith.subf %593, %580 : vector<10x12xf32>
    %cst_149 = arith.constant 0.000000e+00 : f32
    %595 = vector.broadcast %cst_149 : f32 to vector<10x12xf32>
    %596 = arith.minimumf %594, %595 : vector<10x12xf32>
    %597 = math.absf %594 : vector<10x12xf32>
    %cst_150 = arith.constant 0.000000e+00 : f32
    %598 = vector.broadcast %cst_150 : f32 to vector<10x12xf32>
    %599 = arith.subf %598, %597 : vector<10x12xf32>
    %600 = math.exp %599 : vector<10x12xf32>
    %cst_151 = arith.constant 1.000000e+00 : f32
    %601 = vector.broadcast %cst_151 : f32 to vector<10x12xf32>
    %602 = arith.addf %601, %600 : vector<10x12xf32>
    %603 = math.log %602 : vector<10x12xf32>
    %604 = arith.subf %596, %603 : vector<10x12xf32>
    %cst_152 = arith.constant dense<0.000000e+00> : vector<10xf32>
    %605 = vector.multi_reduction <add>, %604, %cst_152 [1] : vector<10x12xf32> to vector<10xf32>
    %606 = vector.shape_cast %605 : vector<10xf32> to vector<10x1xf32>
    %cst_153 = arith.constant dense<0.000000e+00> : vector<1xf32>
    %607 = vector.multi_reduction <add>, %606, %cst_153 [0] : vector<10x1xf32> to vector<1xf32>
    %608 = vector.shape_cast %607 : vector<1xf32> to vector<1x1xf32>
    %609 = arith.addf %592, %608 : vector<1x1xf32>
    %cst_154 = arith.constant 0.000000e+00 : f32
    %610 = vector.broadcast %cst_154 : f32 to vector<1x1xf32>
    %611 = arith.subf %610, %609 : vector<1x1xf32>
    %c0_155 = arith.constant 0 : index
    %c0_156 = arith.constant 0 : index
    %612 = vector.load %arg15[%c0_155, %c0_156] : memref<1x1xf32, #tpu.memory_space<vmem>>, vector<1x1xf32>
    tpu.vector_store %arg15[%c0_155, %c0_156], %611 {strides = array<i32>} : memref<1x1xf32, #tpu.memory_space<vmem>>, vector<1x1xf32>,
    return
  }
  func.func @transform_0(%arg0: i32) -> (i32, i32, i32, i32) {
    %c0_i32 = arith.constant 0 : i32
    %c0_i32_0 = arith.constant 0 : i32
    %c0_i32_1 = arith.constant 0 : i32
    %c0_i32_2 = arith.constant 0 : i32
    %c0_i32_3 = arith.constant 0 : i32
    return %c0_i32, %c0_i32_0, %c0_i32_1, %c0_i32_2 : i32, i32, i32, i32
  }
  func.func @transform_1(%arg0: i32) -> (i32, i32, i32) {
    %c0_i32 = arith.constant 0 : i32
    %c0_i32_0 = arith.constant 0 : i32
    %c0_i32_1 = arith.constant 0 : i32
    %c0_i32_2 = arith.constant 0 : i32
    return %c0_i32, %c0_i32_0, %c0_i32_1 : i32, i32, i32
  }
  func.func @transform_2(%arg0: i32) -> (i32, i32, i32) {
    %c0_i32 = arith.constant 0 : i32
    %c0_i32_0 = arith.constant 0 : i32
    %c0_i32_1 = arith.constant 0 : i32
    %c0_i32_2 = arith.constant 0 : i32
    return %c0_i32, %c0_i32_0, %c0_i32_1 : i32, i32, i32
  }
  func.func @transform_3(%arg0: i32) -> (i32, i32, i32) {
    %c0_i32 = arith.constant 0 : i32
    %c0_i32_0 = arith.constant 0 : i32
    %c0_i32_1 = arith.constant 0 : i32
    %c0_i32_2 = arith.constant 0 : i32
    return %c0_i32, %c0_i32_0, %c0_i32_1 : i32, i32, i32
  }
  func.func @transform_4(%arg0: i32) -> (i32, i32, i32) {
    %c0_i32 = arith.constant 0 : i32
    %c0_i32_0 = arith.constant 0 : i32
    %c0_i32_1 = arith.constant 0 : i32
    %c0_i32_2 = arith.constant 0 : i32
    return %c0_i32, %c0_i32_0, %c0_i32_1 : i32, i32, i32
  }
  func.func @transform_5(%arg0: i32) -> (i32, i32, i32) {
    %c0_i32 = arith.constant 0 : i32
    %c0_i32_0 = arith.constant 0 : i32
    %c0_i32_1 = arith.constant 0 : i32
    %c0_i32_2 = arith.constant 0 : i32
    return %c0_i32, %c0_i32_0, %c0_i32_1 : i32, i32, i32
  }
  func.func @transform_6(%arg0: i32) -> (i32, i32, i32) {
    %c0_i32 = arith.constant 0 : i32
    %c0_i32_0 = arith.constant 0 : i32
    %c0_i32_1 = arith.constant 0 : i32
    %c0_i32_2 = arith.constant 0 : i32
    return %c0_i32, %c0_i32_0, %c0_i32_1 : i32, i32, i32
  }
  func.func @transform_7(%arg0: i32) -> (i32, i32) {
    %c0_i32 = arith.constant 0 : i32
    %c0_i32_0 = arith.constant 0 : i32
    %c0_i32_1 = arith.constant 0 : i32
    return %c0_i32, %c0_i32_0 : i32, i32
  }
  func.func @transform_8(%arg0: i32) -> (i32, i32) {
    %c0_i32 = arith.constant 0 : i32
    %c0_i32_0 = arith.constant 0 : i32
    %c0_i32_1 = arith.constant 0 : i32
    return %c0_i32, %c0_i32_0 : i32, i32
  }
  func.func @transform_9(%arg0: i32) -> (i32, i32) {
    %c0_i32 = arith.constant 0 : i32
    %c0_i32_0 = arith.constant 0 : i32
    %c0_i32_1 = arith.constant 0 : i32
    return %c0_i32, %c0_i32_0 : i32, i32
  }
  func.func @transform_10(%arg0: i32) -> (i32, i32) {
    %c0_i32 = arith.constant 0 : i32
    %c0_i32_0 = arith.constant 0 : i32
    %c0_i32_1 = arith.constant 0 : i32
    return %c0_i32, %c0_i32_0 : i32, i32
  }
  func.func @transform_11(%arg0: i32) -> (i32, i32) {
    %c0_i32 = arith.constant 0 : i32
    %c0_i32_0 = arith.constant 0 : i32
    %c0_i32_1 = arith.constant 0 : i32
    return %c0_i32, %c0_i32_0 : i32, i32
  }
  func.func @transform_12(%arg0: i32) -> (i32, i32) {
    %c0_i32 = arith.constant 0 : i32
    %c0_i32_0 = arith.constant 0 : i32
    %c0_i32_1 = arith.constant 0 : i32
    return %c0_i32, %c0_i32_0 : i32, i32
  }
  func.func @transform_13(%arg0: i32) -> (i32, i32, i32) {
    %c0_i32 = arith.constant 0 : i32
    %c0_i32_0 = arith.constant 0 : i32
    %c0_i32_1 = arith.constant 0 : i32
    %c0_i32_2 = arith.constant 0 : i32
    return %c0_i32, %c0_i32_0, %c0_i32_1 : i32, i32, i32
  }
  func.func @transform_14(%arg0: i32) -> (i32, i32) {
    %c0_i32 = arith.constant 0 : i32
    %c0_i32_0 = arith.constant 0 : i32
    %c0_i32_1 = arith.constant 0 : i32
    return %c0_i32, %c0_i32_0 : i32, i32
  }
}

</mosaic_0001>

<bundles_post_ra>
// kernel: reverse
= control target key start
LH: loop header
LB: loop body
LE: loop exit
PB: predicated region body
PF: predicated region fallthrough
CT: control target
= control target key end

     0   :  { %v2_v0 = vlaneseq  ;;  %s109_s0 = inlined_call_operand.vmem [shape: s32[2,6], index: 0, kind: input, shape index: {}]   ;;  %s110_s1 = inlined_call_operand.vmem [shape: s32[2,6], index: 1, kind: output, shape index: {}]  }
   0x2   :  { %v3_v1 = vsub.s32 5, %v2_v0 }
   0x4   :  { %4 = vset.pattern.permute.xlu0 %v3_v1 }
   0x5   :  { %v21_v2 = vld [vmem:[%s109_s0] sm:$0x3] }
   0x6   :  { %22 = vst [vmem:[#allocation1] sm:$0x3] %v21_v2 }
   0xd   :  { %v40_v3 = vld [vmem:[#allocation1] sm:$0x3] }
   0xe   :  { %41 = vst [vmem:[#allocation0] sm:$0x3] %v40_v3 }
  0x15   :  { %v42_v4 = vld [vmem:[#allocation0] sm:$0xff] }
  0x16   :  { %43 = vperm.xlu0 %4, %v42_v4  }
  0x88   :  { %v44_v5 = vpop.permute.xlu0 %43 }
  0x89   :  { %45 = vst [vmem:[#allocation2] sm:$0xff] %v44_v5 }
  0x90   :  { %v48_v6 = vld [vmem:[#allocation2] sm:$0x3] }
  0x91   :  { %51 = vst [vmem:[#allocation3] sm:$0x3] %v48_v6 }
  0x98   :  { %v68_v7 = vld [vmem:[#allocation3] sm:$0x3] }
  0x99   :  { %69 = vst [vmem:[%s110_s1] sm:$0x3] %v68_v7 }

// kernel: context2vec_forward.1
= control target key start
LH: loop header
LB: loop body
LE: loop exit
PB: predicated region body
PF: predicated region fallthrough
CT: control target
= control target key end

     0   :  { %vm96_vm0 = vcmask 261120   ;;  %v3153_v11 = vmov 0.0   ;;  %s4492_s0 = inlined_call_operand.vmem [shape: f32[6,2,2,32], index: 0, kind: input, shape index: {}]   ;;  %s4493_s1 = inlined_call_operand.vmem [shape: f32[2,32,128], index: 1, kind: input, shape index: {}]   ;;  %s4494_s2 = inlined_call_operand.vmem [shape: f32[2,32,128], index: 2, kind: input, shape index: {}]   ;;  %s4495_s3 = inlined_call_operand.vmem [shape: f32[2,1,128], index: 3, kind: input, shape index: {}]   ;;  %s4496_s4 = inlined_call_operand.vmem [shape: f32[2,32,128], index: 4, kind: input, shape index: {}]   ;;  %s4497_s5 = inlined_call_operand.vmem [shape: f32[2,32,128], index: 5, kind: input, shape index: {}]   ;;  %s4498_s6 = inlined_call_operand.vmem [shape: f32[2,1,128], index: 6, kind: input, shape index: {}]   ;;  %s4499_s7 = inlined_call_operand.vmem [shape: f32[32,64], index: 7, kind: input, shape index: {}]   ;;  %s4500_s8 = inlined_call_operand.vmem [shape: f32[32,64], index: 8, kind: input, shape index: {}]   ;;  %s4501_s9 = inlined_call_operand.vmem [shape: f32[1,64], index: 9, kind: input, shape index: {}]   ;;  %s4502_s10 = inlined_call_operand.vmem [shape: f32[64,32], index: 10, kind: input, shape index: {}]   ;;  %s4503_s11 = inlined_call_operand.vmem [shape: f32[1,32], index: 11, kind: input, shape index: {}]   ;;  %s4504_s12 = inlined_call_operand.vmem [shape: f32[12,32], index: 12, kind: input, shape index: {}]   ;;  %s4505_s13 = inlined_call_operand.vmem [shape: f32[10,12,32], index: 13, kind: input, shape index: {}]   ;;  %s4506_s14 = inlined_call_operand.hbm [shape: f32[1,1], index: 14, kind: output, shape index: {}]  }
   0x1   :  { %v3235_v0 = vld [vmem:[%s4494_s2 + $0x18] sm:$0xff]  ;;  %v3245_v2 = vld [vmem:[%s4494_s2 + $0x10] sm:$0xff]  ;;  %v3257_v4 = vld [vmem:[%s4494_s2 + $0x8] sm:$0xff] }
   0x2   :  { %v3240_v1 = vld [vmem:[%s4493_s1 + $0x18] sm:$0xff]  ;;  %112 = vmatpush.msra.mxu0 %v3235_v0  ;;  %v3252_v3 = vld [vmem:[%s4493_s1 + $0x10] sm:$0xff]  ;;  %v3262_v5 = vld [vmem:[%s4493_s1 + $0x8] sm:$0xff] }
   0x3   :  { %135 = vmatpush.msra.mxu1 %v3240_v1  ;;  %v3269_v6 = vld [vmem:[%s4494_s2] sm:$0xff]  ;;  %v3284_v9 = vld [vmem:[%s4494_s2 + $0x38] sm:$0xff]  ;;  %v3298_v12 = vld [vmem:[%s4494_s2 + $0x30] sm:$0xff] }
   0x4   :  { %113 = vmatpush.msra.mxu0 %v3245_v2  ;;  %v3274_v7 = vld [vmem:[%s4493_s1] sm:$0xff]  ;;  %v3289_v10 = vld [vmem:[%s4493_s1 + $0x38] sm:$0xff]  ;;  %v3303_v13 = vld [vmem:[%s4493_s1 + $0x30] sm:$0xff] }
   0x5   :  { %136 = vmatpush.msra.mxu1 %v3252_v3  ;;  %v48_v8 = vld [vmem:[%s4492_s0] sm:$0x3] }
   0x6   :  { %114 = vmatpush.msra.mxu0 %v3257_v4 }
   0x7   :  { %137 = vmatpush.msra.mxu1 %v3262_v5 }
   0x8   :  { %115 = vmatpush.msra.mxu0 %v3269_v6 }
   0x9   :  { %138 = vmatpush.msra.mxu1 %v3274_v7  ;;  %116 = vmatmul.f32.vlgmr.msra.gmra.mxu0 %v3153_v11 }
   0xa   :  { %2727 = vmatmul.msk.f32.vlgmr.msra.gmra.mxu1 %vm96_vm0, %v48_v8 }
   0xb   :  { %19 = vsyncpa [#allocation5], 0  ;;  %282 = vmatpush.msrb.mxu0 %v3284_v9  ;;  %305 = vmatpush.msrb.mxu1 %v3289_v10  ;;  %v3310_v14 = vld [vmem:[%s4494_s2 + $0x28] sm:$0xff]  ;;  %v3322_v16 = vld [vmem:[%s4494_s2 + $0x20] sm:$0xff]  ;;  %s3154_s21 = smov 64   ;;  %s3155_s22 = smov 32  }
   0xc   :  { %v3315_v15 = vld [vmem:[%s4493_s1 + $0x28] sm:$0xff]  ;;  %v3327_v17 = vld [vmem:[%s4493_s1 + $0x20] sm:$0xff]  ;;  %s2718_s27 = sshll.u32 %s4506_s14, 4  ;;  %s2719_s27 = int_to_ptr.hbm [resolvable:$true] %s2718_s27 }
   0xd   :  { %283 = vmatpush.msrb.mxu0 %v3298_v12  ;;  %306 = vmatpush.msrb.mxu1 %v3303_v13  ;;  %v49_v18 = vld [vmem:[%s4492_s0 + $0x2] sm:$0x3]  ;;  %v3357_v19 = vld [vmem:[%s4495_s3] ss:$0 sm:$0xff]  ;;  %v3363_v24 = vld [vmem:[%s4495_s3 + $0x1] ss:$0 sm:$0xff] }
   0xf   :  { %284 = vmatpush.msrb.mxu0 %v3310_v14  ;;  %307 = vmatpush.msrb.mxu1 %v3315_v15 }
  0x11   :  { %285 = vmatpush.msrb.mxu0 %v3322_v16  ;;  %308 = vmatpush.msrb.mxu1 %v3327_v17 }
  0x12   :  { %286 = vmatmul.f32.vlgmr.msrb.gmra.mxu0 %v3153_v11  ;;  %2731 = vmatmul.msk.f32.vlgmr.msrb.gmra.mxu1 %vm96_vm0, %v49_v18 }
  0x13   :  { %463 = vmatpush.msra.mxu0 %v3235_v0  ;;  %486 = vmatpush.msra.mxu1 %v3240_v1 }
  0x15   :  { %464 = vmatpush.msra.mxu0 %v3245_v2  ;;  %487 = vmatpush.msra.mxu1 %v3252_v3 }
  0x17   :  { %465 = vmatpush.msra.mxu0 %v3257_v4  ;;  %488 = vmatpush.msra.mxu1 %v3262_v5 }
  0x19   :  { %466 = vmatpush.msra.mxu0 %v3269_v6  ;;  %489 = vmatpush.msra.mxu1 %v3274_v7 }
  0x1b   :  { %629 = vmatpush.msrb.mxu0 %v3284_v9  ;;  %652 = vmatpush.msrb.mxu1 %v3289_v10 }
  0x1d   :  { %630 = vmatpush.msrb.mxu0 %v3298_v12  ;;  %653 = vmatpush.msrb.mxu1 %v3303_v13 }
  0x1f   :  { %631 = vmatpush.msrb.mxu0 %v3310_v14  ;;  %654 = vmatpush.msrb.mxu1 %v3315_v15 }
  0x21   :  { %632 = vmatpush.msrb.mxu0 %v3322_v16  ;;  %655 = vmatpush.msrb.mxu1 %v3327_v17 }
  0x86   :  { %v117_v20 = vpop.f32.mrf.mxu0 }
  0x87   :  { %v140_v21 = vpop.f32.mrf.mxu1 }
  0x88   :  { %v141_v22 = vadd.f32 %v140_v21, %v117_v20 }
  0x8a   :  { %v146_v23 = vadd.f32 %v3357_v19, %v141_v22 }
  0x8c   :  { %2811 = vtanh.f32 %v146_v23  ;;  %v2728_v31 = vmul.f32 -1.442695, %v146_v23  ;;  %v3381_v23 = vld [vmem:[%s4497_s5 + $0x18] sm:$0xff] }
  0x8d   :  { %196 = vmatpush.msra.mxu3 %v3381_v23 }
  0x8f   :  { %v287_v25 = vpop.f32.mrf.mxu0  ;;  %v310_v26 = vpop.f32.mrf.mxu1 }
  0x90   :  { %v311_v27 = vadd.f32 %v310_v26, %v287_v25  ;;  %v3386_v25 = vld [vmem:[%s4497_s5 + $0x10] sm:$0xff]  ;;  %v3392_v26 = vld [vmem:[%s4497_s5 + $0x8] sm:$0xff] }
  0x91   :  { %197 = vmatpush.msra.mxu3 %v3386_v25 }
  0x92   :  { %v2812_v28 = vpop.eup %2811  ;;  %v316_v29 = vadd.f32 %v3363_v24, %v311_v27  ;;  %v3398_v27 = vld [vmem:[%s4497_s5] sm:$0xff] }
  0x93   :  { %169 = vrot.lane.b32.xlu0 %v2812_v28, %s3154_s21  ;;  %198 = vmatpush.msra.mxu3 %v3392_v26  ;;  %v3404_v28 = vld [vmem:[%s4496_s4 + $0x18] sm:$0xff] }
  0x94   :  { %2813 = vtanh.f32 %v316_v29  ;;  %v2732_v32 = vmul.f32 -1.442695, %v316_v29  ;;  %v3411_v29 = vld [vmem:[%s4496_s4 + $0x10] sm:$0xff] }
  0x95   :  { %2815 = vpow2.f32 %v2728_v31  ;;  %199 = vmatpush.msra.mxu3 %v3398_v27  ;;  %v3423_v31 = vld [vmem:[%s4496_s4] sm:$0xff] }
  0x96   :  { %2817 = vpow2.f32 %v2732_v32  ;;  %200 = vmatmul.f32.vlgmr.msra.gmra.mxu3 %v3153_v11 }
  0x97   :  { %221 = vmatpush.msrb.mxu3 %v3404_v28 }
  0x99   :  { %222 = vmatpush.msrb.mxu3 %v3411_v29 }
  0x9a   :  { %v2814_v30 = vpop.eup %2813 }
  0x9b   :  { %339 = vrot.lane.b32.xlu0 %v2814_v30, %s3154_s21  ;;  %v2816_v33 = vpop.eup %2815  ;;  %v3417_v30 = vld [vmem:[%s4496_s4 + $0x8] sm:$0xff] }
  0x9c   :  { %v150_v34 = vadd.f32 1.0, %v2816_v33  ;;  %v2818_v35 = vpop.eup %2817  ;;  %223 = vmatpush.msrb.mxu3 %v3417_v30 }
  0x9d   :  { %v320_v36 = vadd.f32 1.0, %v2818_v35 }
  0x9e   :  { %2819 = vrcp.f32 %v150_v34  ;;  %v162_v45 = vand.u32 2147483648, %v150_v34  ;;  %vm156_vm2 = vweird.f32 %v150_v34  ;;  %v160_v46 = vand.u32 2147483647, %v150_v34  ;;  %224 = vmatpush.msrb.mxu3 %v3423_v31 }
  0x9f   :  { %2821 = vrcp.f32 %v320_v36  ;;  %vm326_vm5 = vweird.f32 %v320_v36  ;;  %v332_v52 = vand.u32 2147483648, %v320_v36  ;;  %v330_v55 = vand.u32 2147483647, %v320_v36 }
  0xa0   :  { %v163_v49 = vor.u32 1.1754944e-38, %v162_v45  ;;  %vm161_vm4 = vcmp.eq.f32.partialorder %v160_v46, 8.507059e+37  ;;  %v51_v45 = vld [vmem:[%s4492_s0 + $0x6] sm:$0x3] }
  0xa1   :  { %v333_v56 = vor.u32 1.1754944e-38, %v332_v52  ;;  %vm331_vm8 = vcmp.eq.f32.partialorder %v330_v55, 8.507059e+37  ;;  %v3526_v52 = vld [vmem:[%s4498_s6] ss:$0 sm:$0xff] }
  0xa4   :  { %v2820_v37 = vpop.eup %2819 }
  0xa5   :  { %v152_v38 = vmul.f32 %v2820_v37, %v150_v34  ;;  %v2822_v40 = vpop.eup %2821  ;;  %vm157_vm1 = vweird.f32 %v2820_v37 }
  0xa6   :  { %v322_v42 = vmul.f32 %v2822_v40, %v320_v36  ;;  %vm158_vm3 = vmor %vm156_vm2, %vm157_vm1  ;;  %vm327_vm6 = vweird.f32 %v2822_v40  ;;  %v50_v36 = vld [vmem:[%s4492_s0 + $0x4] sm:$0x3] }
  0xa7   :  { %v153_v39 = vsub.f32 1.0, %v152_v38  ;;  %vm328_vm7 = vmor %vm326_vm5, %vm327_vm6  ;;  %2736 = vmatmul.msk.f32.vlgmr.msra.gmra.mxu1 %vm96_vm0, %v50_v36  ;;  %v3441_v38 = vld [vmem:[%s4496_s4 + $0x38] sm:$0xff] }
  0xa8   :  { %v323_v44 = vsub.f32 1.0, %v322_v42  ;;  %391 = vmatpush.msra.mxu3 %v3441_v38  ;;  %v3463_v42 = vld [vmem:[%s4496_s4 + $0x28] sm:$0xff]  ;;  %828 = vmatpush.msra.mxu1 %v3240_v1 }
  0xa9   :  { %v154_v41 = vmul.f32 %v2820_v37, %v153_v39  ;;  %v3446_v39 = vld [vmem:[%s4497_s5 + $0x30] sm:$0xff] }
  0xaa   :  { %v324_v48 = vmul.f32 %v2822_v40, %v323_v44  ;;  %v3476_v44 = vld [vmem:[%s4496_s4 + $0x20] sm:$0xff]  ;;  %829 = vmatpush.msra.mxu1 %v3252_v3 }
  0xab   :  { %v155_v43 = vadd.f32 %v2820_v37, %v154_v41  ;;  %v3458_v41 = vld [vmem:[%s4497_s5 + $0x28] sm:$0xff] }
  0xac   :  { %v325_v54 = vadd.f32 %v2822_v40, %v324_v48  ;;  %830 = vmatpush.msra.mxu1 %v3262_v5 }
  0xad   :  { %v159_v47 = vsel %vm158_vm3, %v2820_v37, %v155_v43  ;;  %v3436_v37 = vld [vmem:[%s4497_s5 + $0x38] sm:$0xff]  ;;  %v3471_v43 = vld [vmem:[%s4497_s5 + $0x20] sm:$0xff] }
  0xae   :  { %v164_v51 = vsel %vm161_vm4, %v163_v49, %v159_v47  ;;  %v329_v57 = vsel %vm328_vm7, %v2822_v40, %v325_v54  ;;  %366 = vmatpush.msra.mxu2 %v3436_v37  ;;  %v3453_v40 = vld [vmem:[%s4496_s4 + $0x30] sm:$0xff]  ;;  %831 = vmatpush.msra.mxu1 %v3274_v7 }
  0xaf   :  { %v334_v58 = vsel %vm331_vm8, %v333_v56, %v329_v57  ;;  %v167_v61 = vmul.f32 0.0, %v164_v51  ;;  %392 = vmatpush.msra.mxu3 %v3453_v40  ;;  %2742 = vmatmul.msk.f32.vlgmr.msrb.gmra.mxu1 %vm96_vm0, %v51_v45 }
  0xb0   :  { %v337_v8 = vmul.f32 0.0, %v334_v58  ;;  %367 = vmatpush.msra.mxu2 %v3446_v39  ;;  %994 = vmatpush.msrb.mxu1 %v3289_v10 }
  0xb1   :  { %393 = vmatpush.msra.mxu3 %v3463_v42 }
  0xb2   :  { %368 = vmatpush.msra.mxu2 %v3458_v41  ;;  %995 = vmatpush.msrb.mxu1 %v3303_v13 }
  0xb3   :  { %394 = vmatpush.msra.mxu3 %v3476_v44 }
  0xb4   :  { %369 = vmatpush.msra.mxu2 %v3471_v43  ;;  %996 = vmatpush.msrb.mxu1 %v3315_v15 }
  0xb5   :  { %370 = vmatmul.f32.vlgmr.msra.gmra.mxu2 %v3153_v11 }
  0xb6   :  { %546 = vmatpush.msrb.mxu2 %v3381_v23  ;;  %997 = vmatpush.msrb.mxu1 %v3327_v17 }
  0xb8   :  { %547 = vmatpush.msrb.mxu2 %v3386_v25 }
  0xba   :  { %548 = vmatpush.msrb.mxu2 %v3392_v26 }
  0xbc   :  { %549 = vmatpush.msrb.mxu2 %v3398_v27 }
  0xbe   :  { %712 = vmatpush.msra.mxu2 %v3436_v37 }
  0xc0   :  { %713 = vmatpush.msra.mxu2 %v3446_v39 }
  0xc2   :  { %714 = vmatpush.msra.mxu2 %v3458_v41 }
  0xc4   :  { %715 = vmatpush.msra.mxu2 %v3471_v43 }
 0x105   :  { %v170_v50 = vpop.permute.xlu0 %169 }
 0x106   :  { %v172_v53 = vmul.f32 %v170_v50, %v164_v51 }
 0x108   :  { %174 = vrot.lane.b32.xlu1 %v172_v53, %s3155_s22 }
 0x10d   :  { %v340_v59 = vpop.permute.xlu0 %339 }
 0x10e   :  { %v342_v60 = vmul.f32 %v340_v59, %v334_v58 }
 0x110   :  { %344 = vrot.lane.b32.xlu1 %v342_v60, %s3155_s22 }
 0x119   :  { %v201_v47 = vpop.f32.mrf.mxu3 }
 0x124   :  { %v491_v48 = vpop.f32.mrf.mxu1 }
 0x12c   :  { %v657_v55 = vpop.f32.mrf.mxu1 }
 0x138   :  { %v371_v60 = vpop.f32.mrf.mxu2 }
 0x17a   :  { %v175_v62 = vpop.permute.xlu1 %174 }
 0x17b   :  { %v3370_v63 = vadd.f32 %v175_v62, %v167_v61  ;;  %v3533_v61 = vld [vmem:[%s4498_s6 + $0x1] ss:$0 sm:$0xff] }
 0x17d   :  { %2823 = vtanh.f32 %v3370_v63 }
 0x182   :  { %v345_v18 = vpop.permute.xlu1 %344 }
 0x183   :  { %v2824_v20 = vpop.eup %2823  ;;  %v3373_v21 = vadd.f32 %v345_v18, %v337_v8 }
 0x184   :  { %180 = vrot.lane.b32.xlu2 %v2824_v20, %s3154_s21 }
 0x185   :  { %2825 = vtanh.f32 %v3373_v21 }
 0x18b   :  { %v2826_v22 = vpop.eup %2825 }
 0x18c   :  { %350 = vrot.lane.b32.xlu2 %v2826_v22, %s3154_s21 }
 0x1de   :  { %v181_v32 = vpop.permute.xlu2 %180 }
 0x1df   :  { %v183_v33 = vmul.f32 %v181_v32, %v164_v51 }
 0x1e1   :  { %205 = vrot.lane.b32.xlu0 %v183_v33, %s3155_s22 }
 0x1e6   :  { %v351_v34 = vpop.permute.xlu2 %350 }
 0x1e7   :  { %v353_v35 = vmul.f32 %v351_v34, %v334_v58 }
 0x1e9   :  { %375 = vrot.lane.b32.xlu1 %v353_v35, %s3155_s22 }
 0x253   :  { %v206_v11 = vpop.permute.xlu0 %205 }
 0x254   :  { %2729 = vmatmul.msk.f32.vlgmr.msrb.gmra.mxu3 %vm96_vm0, %v206_v11  ;;  %2735 = vmatmul.msk.f32.vlgmr.msra.gmra.mxu0 %vm96_vm0, %v206_v11 }
 0x255   :  { %571 = vmatpush.msrb.mxu3 %v3404_v28  ;;  %805 = vmatpush.msra.mxu0 %v3235_v0 }
 0x257   :  { %572 = vmatpush.msrb.mxu3 %v3411_v29  ;;  %806 = vmatpush.msra.mxu0 %v3245_v2 }
 0x259   :  { %573 = vmatpush.msrb.mxu3 %v3417_v30  ;;  %807 = vmatpush.msra.mxu0 %v3257_v4 }
 0x25b   :  { %v376_v46 = vpop.permute.xlu1 %375  ;;  %574 = vmatpush.msrb.mxu3 %v3423_v31  ;;  %808 = vmatpush.msra.mxu0 %v3269_v6 }
 0x25c   :  { %2733 = vmatmul.msk.f32.vlgmr.msra.gmra.mxu3 %vm96_vm0, %v376_v46  ;;  %2741 = vmatmul.msk.f32.vlgmr.msrb.gmra.mxu0 %vm96_vm0, %v376_v46 }
 0x25d   :  { %737 = vmatpush.msra.mxu3 %v3441_v38  ;;  %971 = vmatpush.msrb.mxu0 %v3284_v9 }
 0x25f   :  { %738 = vmatpush.msra.mxu3 %v3453_v40  ;;  %972 = vmatpush.msrb.mxu0 %v3298_v12 }
 0x261   :  { %739 = vmatpush.msra.mxu3 %v3463_v42  ;;  %973 = vmatpush.msrb.mxu0 %v3310_v14 }
 0x263   :  { %740 = vmatpush.msra.mxu3 %v3476_v44  ;;  %974 = vmatpush.msrb.mxu0 %v3322_v16 }
 0x2d1   :  { %v468_v49 = vpop.f32.mrf.mxu0 }
 0x2d2   :  { %v492_v50 = vadd.f32 %v491_v48, %v468_v49 }
 0x2d4   :  { %v494_v51 = vadd.f32 %v3357_v19, %v492_v50 }
 0x2d6   :  { %2827 = vtanh.f32 %v494_v51  ;;  %v2737_v46 = vmul.f32 -1.442695, %v494_v51 }
 0x2d7   :  { %v226_v53 = vpop.f32.mrf.mxu3 }
 0x2d8   :  { %v227_v54 = vadd.f32 %v226_v53, %v201_v47 }
 0x2d9   :  { %v634_v56 = vpop.f32.mrf.mxu0 }
 0x2da   :  { %v232_v57 = vadd.f32 %v3526_v52, %v227_v54  ;;  %v658_v58 = vadd.f32 %v657_v55, %v634_v56 }
 0x2dc   :  { %v2828_v59 = vpop.eup %2827  ;;  %2829 = vtanh.f32 %v232_v57  ;;  %v660_v62 = vadd.f32 %v3363_v24, %v658_v58  ;;  %v2730_v34 = vmul.f32 -1.442695, %v232_v57 }
 0x2dd   :  { %517 = vrot.lane.b32.xlu0 %v2828_v59, %s3154_s21 }
 0x2de   :  { %2831 = vtanh.f32 %v660_v62  ;;  %v2743_v35 = vmul.f32 -1.442695, %v660_v62 }
 0x2df   :  { %v396_v8 = vpop.f32.mrf.mxu3 }
 0x2e0   :  { %v397_v18 = vadd.f32 %v396_v8, %v371_v60 }
 0x2e2   :  { %v2830_v20 = vpop.eup %2829  ;;  %v402_v22 = vadd.f32 %v3533_v61, %v397_v18 }
 0x2e3   :  { %255 = vrot.lane.b32.xlu2 %v2830_v20, %s3154_s21 }
 0x2e4   :  { %2833 = vtanh.f32 %v402_v22  ;;  %v2832_v32 = vpop.eup %2831  ;;  %v2734_v56 = vmul.f32 -1.442695, %v402_v22 }
 0x2e5   :  { %2835 = vpow2.f32 %v2730_v34 }
 0x2e6   :  { %2837 = vpow2.f32 %v2743_v35 }
 0x2ea   :  { %v2834_v33 = vpop.eup %2833 }
 0x2eb   :  { %683 = vrot.lane.b32.xlu2 %v2832_v32, %s3154_s21  ;;  %425 = vrot.lane.b32.xlu1 %v2834_v33, %s3154_s21  ;;  %v2836_v36 = vpop.eup %2835 }
 0x2ec   :  { %v236_v45 = vadd.f32 1.0, %v2836_v36  ;;  %v2838_v11 = vpop.eup %2837 }
 0x2ed   :  { %v664_v47 = vadd.f32 1.0, %v2838_v11 }
 0x2ee   :  { %2839 = vrcp.f32 %v236_v45  ;;  %v248_v62 = vand.u32 2147483648, %v236_v45  ;;  %vm242_vm10 = vweird.f32 %v236_v45  ;;  %v246_v51 = vand.u32 2147483647, %v236_v45 }
 0x2ef   :  { %2841 = vpow2.f32 %v2737_v46  ;;  %vm670_vm14 = vweird.f32 %v664_v47 }
 0x2f0   :  { %2843 = vrcp.f32 %v664_v47  ;;  %v249_v33 = vor.u32 1.1754944e-38, %v248_v62  ;;  %vm247_vm12 = vcmp.eq.f32.partialorder %v246_v51, 8.507059e+37 }
 0x2f4   :  { %v2840_v48 = vpop.eup %2839 }
 0x2f5   :  { %v238_v49 = vmul.f32 %v2840_v48, %v236_v45  ;;  %v2842_v50 = vpop.eup %2841  ;;  %vm243_vm9 = vweird.f32 %v2840_v48  ;;  %v674_v45 = vand.u32 2147483647, %v664_v47 }
 0x2f6   :  { %v2844_v54 = vpop.eup %2843  ;;  %v498_v55 = vadd.f32 1.0, %v2842_v50  ;;  %vm244_vm11 = vmor %vm242_vm10, %vm243_vm9  ;;  %vm444_vm10 = vcmask 254976  }
 0x2f7   :  { %v239_v53 = vsub.f32 1.0, %v238_v49  ;;  %v666_v57 = vmul.f32 %v2844_v54, %v664_v47  ;;  %vm671_vm13 = vweird.f32 %v2844_v54  ;;  %v676_v49 = vand.u32 2147483648, %v664_v47 }
 0x2f8   :  { %2845 = vrcp.f32 %v498_v55  ;;  %vm672_vm15 = vmor %vm670_vm14, %vm671_vm13  ;;  %vm675_vm1 = vcmp.eq.f32.partialorder %v674_v45, 8.507059e+37  ;;  %v510_v51 = vand.u32 2147483648, %v498_v55  ;;  %vm504_vm3 = vweird.f32 %v498_v55 }
 0x2f9   :  { %v240_v58 = vmul.f32 %v2840_v48, %v239_v53  ;;  %2847 = vpow2.f32 %v2734_v56  ;;  %v667_v60 = vsub.f32 1.0, %v666_v57  ;;  %v677_v53 = vor.u32 1.1754944e-38, %v676_v49 }
 0x2fa   :  { %v508_v47 = vand.u32 2147483647, %v498_v55 }
 0x2fb   :  { %v241_v59 = vadd.f32 %v2840_v48, %v240_v58  ;;  %v668_v32 = vmul.f32 %v2844_v54, %v667_v60 }
 0x2fc   :  { %vm509_vm5 = vcmp.eq.f32.partialorder %v508_v47, 8.507059e+37 }
 0x2fd   :  { %v245_v20 = vsel %vm244_vm11, %v2840_v48, %v241_v59  ;;  %v669_v46 = vadd.f32 %v2844_v54, %v668_v32 }
 0x2fe   :  { %v2846_v8 = vpop.eup %2845  ;;  %v3540_v22 = vsel %vm247_vm12, %v249_v33, %v245_v20 }
 0x2ff   :  { %v2848_v18 = vpop.eup %2847  ;;  %v500_v34 = vmul.f32 %v2846_v8, %v498_v55  ;;  %v673_v48 = vsel %vm672_vm15, %v2844_v54, %v669_v46  ;;  %vm505_vm2 = vweird.f32 %v2846_v8  ;;  %v511_v54 = vor.u32 1.1754944e-38, %v510_v51 }
 0x300   :  { %v406_v35 = vadd.f32 1.0, %v2848_v18  ;;  %v3544_v58 = vsel %vm675_vm1, %v677_v53, %v673_v48  ;;  %vm506_vm4 = vmor %vm504_vm3, %vm505_vm2 }
 0x301   :  { %v501_v50 = vsub.f32 1.0, %v500_v34 }
 0x302   :  { %2849 = vrcp.f32 %v406_v35  ;;  %v418_v49 = vand.u32 2147483648, %v406_v35  ;;  %vm412_vm7 = vweird.f32 %v406_v35  ;;  %v416_v45 = vand.u32 2147483647, %v406_v35 }
 0x303   :  { %v502_v56 = vmul.f32 %v2846_v8, %v501_v50 }
 0x304   :  { %v419_v55 = vor.u32 1.1754944e-38, %v418_v49  ;;  %vm417_vm9 = vcmp.eq.f32.partialorder %v416_v45, 8.507059e+37 }
 0x305   :  { %v503_v62 = vadd.f32 %v2846_v8, %v502_v56  ;;  %v253_v56 = vmul.f32 0.0, %v3540_v22 }
 0x307   :  { %v507_v20 = vsel %vm506_vm4, %v2846_v8, %v503_v62  ;;  %v681_v62 = vmul.f32 %v3544_v58, %v3373_v21 }
 0x308   :  { %v2850_v60 = vpop.eup %2849  ;;  %v512_v34 = vsel %vm509_vm5, %v511_v54, %v507_v20 }
 0x309   :  { %v408_v18 = vmul.f32 %v2850_v60, %v406_v35  ;;  %vm413_vm6 = vweird.f32 %v2850_v60 }
 0x30a   :  { %vm414_vm8 = vmor %vm412_vm7, %vm413_vm6 }
 0x30b   :  { %v409_v32 = vsub.f32 1.0, %v408_v18 }
 0x33d   :  { %v256_v36 = vpop.permute.xlu2 %255 }
 0x33e   :  { %v258_v11 = vmul.f32 %v256_v36, %v3540_v22 }
 0x340   :  { %260 = vrot.lane.b32.xlu0 %v258_v11, %s3155_s22  ;;  %v410_v11 = vmul.f32 %v2850_v60, %v409_v32  ;;  %v515_v32 = vmul.f32 %v512_v34, %v3370_v63 }
 0x342   :  { %v411_v46 = vadd.f32 %v2850_v60, %v410_v11 }
 0x344   :  { %v415_v50 = vsel %vm414_vm8, %v2850_v60, %v411_v46 }
 0x345   :  { %v684_v57 = vpop.permute.xlu2 %683  ;;  %v420_v8 = vsel %vm417_vm9, %v419_v55, %v415_v50 }
 0x346   :  { %v686_v59 = vmul.f32 %v684_v57, %v3544_v58  ;;  %v423_v35 = vmul.f32 0.0, %v420_v8 }
 0x348   :  { %688 = vrot.lane.b32.xlu0 %v686_v59, %s3155_s22 }
 0x34f   :  { %v518_v33 = vpop.permute.xlu0 %517 }
 0x350   :  { %v520_v36 = vmul.f32 %v518_v33, %v512_v34 }
 0x352   :  { %522 = vrot.lane.b32.xlu1 %v520_v36, %s3155_s22 }
 0x35d   :  { %v426_v48 = vpop.permute.xlu1 %425 }
 0x35e   :  { %v428_v53 = vmul.f32 %v426_v48, %v420_v8 }
 0x360   :  { %430 = vrot.lane.b32.xlu2 %v428_v53, %s3155_s22 }
 0x3b2   :  { %v261_v57 = vpop.permute.xlu0 %260 }
 0x3b3   :  { %v3551_v59 = vadd.f32 %v261_v57, %v253_v56 }
 0x3b5   :  { %2851 = vtanh.f32 %v3551_v59 }
 0x3ba   :  { %v689_v51 = vpop.permute.xlu0 %688  ;;  %v431_v60 = vpop.permute.xlu2 %430 }
 0x3bb   :  { %v2852_v47 = vpop.eup %2851  ;;  %v3556_v18 = vadd.f32 %v689_v51, %v681_v62  ;;  %v3558_v20 = vadd.f32 %v431_v60, %v423_v35 }
 0x3bc   :  { %266 = vrot.lane.b32.xlu1 %v2852_v47, %s3154_s21 }
 0x3bd   :  { %2853 = vtanh.f32 %v3556_v18 }
 0x3be   :  { %2855 = vtanh.f32 %v3558_v20 }
 0x3c3   :  { %v2854_v54 = vpop.eup %2853 }
 0x3c4   :  { %v2856_v33 = vpop.eup %2855  ;;  %v523_v36 = vpop.permute.xlu1 %522  ;;  %694 = vrot.lane.b32.xlu1 %v2854_v54, %s3154_s21 }
 0x3c5   :  { %v3565_v21 = vadd.f32 %v523_v36, %v515_v32  ;;  %436 = vrot.lane.b32.xlu0 %v2856_v33, %s3154_s21 }
 0x3c7   :  { %2857 = vtanh.f32 %v3565_v21 }
 0x3cd   :  { %v2858_v11 = vpop.eup %2857 }
 0x3ce   :  { %528 = vrot.lane.b32.xlu2 %v2858_v11, %s3154_s21 }
 0x428   :  { %v529_v46 = vpop.permute.xlu2 %528 }
 0x429   :  { %v531_v49 = vmul.f32 %v529_v46, %v512_v34  ;;  %v52_v34 = vld [vmem:[%s4492_s0 + $0x8] sm:$0x3] }
 0x42a   :  { %2748 = vmatmul.msk.f32.vlgmr.msra.gmra.mxu1 %vm96_vm0, %v52_v34 }
 0x42b   :  { %555 = vrot.lane.b32.xlu0 %v531_v49, %s3155_s22  ;;  %1170 = vmatpush.msra.mxu1 %v3240_v1 }
 0x42d   :  { %1171 = vmatpush.msra.mxu1 %v3252_v3 }
 0x42e   :  { %v267_v45 = vpop.permute.xlu1 %266 }
 0x42f   :  { %v269_v63 = vmul.f32 %v267_v45, %v3540_v22  ;;  %1172 = vmatpush.msra.mxu1 %v3262_v5  ;;  %v53_v22 = vld [vmem:[%s4492_s0 + $0xa] sm:$0x3] }
 0x431   :  { %441 = vrot.lane.b32.xlu2 %v269_v63, %s3155_s22  ;;  %1173 = vmatpush.msra.mxu1 %v3274_v7 }
 0x432   :  { %2754 = vmatmul.msk.f32.vlgmr.msrb.gmra.mxu1 %vm96_vm0, %v53_v22 }
 0x433   :  { %1336 = vmatpush.msrb.mxu1 %v3289_v10 }
 0x435   :  { %1337 = vmatpush.msrb.mxu1 %v3303_v13 }
 0x436   :  { %v695_v50 = vpop.permute.xlu1 %694 }
 0x437   :  { %v697_v55 = vmul.f32 %v695_v50, %v3544_v58  ;;  %v437_v48 = vpop.permute.xlu0 %436  ;;  %1338 = vmatpush.msrb.mxu1 %v3315_v15 }
 0x438   :  { %v439_v53 = vmul.f32 %v437_v48, %v420_v8 }
 0x439   :  { %721 = vrot.lane.b32.xlu2 %v697_v55, %s3155_s22  ;;  %1339 = vmatpush.msrb.mxu1 %v3327_v17 }
 0x43a   :  { %447 = vrot.lane.b32.xlu1 %v439_v53, %s3155_s22 }
 0x48b   :  { %v442_v58 = vpop.permute.xlu2 %441 }
 0x48c   :  { %445 = vst.msk [vmem:[#allocation2] sm:$0x3] %vm444_vm10, %v442_v58  ;;  %2738 = vmatmul.msk.f32.vlgmr.msrb.gmra.mxu2 %vm96_vm0, %v442_v58 }
 0x48d   :  { %888 = vmatpush.msrb.mxu2 %v3381_v23 }
 0x48f   :  { %889 = vmatpush.msrb.mxu2 %v3386_v25 }
 0x491   :  { %890 = vmatpush.msrb.mxu2 %v3392_v26 }
 0x493   :  { %891 = vmatpush.msrb.mxu2 %v3398_v27  ;;  %v722_v3 = vpop.permute.xlu2 %721 }
 0x49d   :  { %v556_v1 = vpop.permute.xlu0 %555 }
 0x49e   :  { %2739 = vmatmul.msk.f32.vlgmr.msrb.gmra.mxu3 %vm96_vm0, %v556_v1  ;;  %2747 = vmatmul.msk.f32.vlgmr.msra.gmra.mxu0 %vm96_vm0, %v556_v1 }
 0x49f   :  { %913 = vmatpush.msrb.mxu3 %v3404_v28  ;;  %1147 = vmatpush.msra.mxu0 %v3235_v0 }
 0x4a1   :  { %914 = vmatpush.msrb.mxu3 %v3411_v29  ;;  %1148 = vmatpush.msra.mxu0 %v3245_v2 }
 0x4a3   :  { %915 = vmatpush.msrb.mxu3 %v3417_v30  ;;  %1149 = vmatpush.msra.mxu0 %v3257_v4 }
 0x4a5   :  { %916 = vmatpush.msrb.mxu3 %v3423_v31  ;;  %1150 = vmatpush.msra.mxu0 %v3269_v6 }
 0x4a6   :  { %2745 = vmatmul.msk.f32.vlgmr.msra.gmra.mxu3 %vm96_vm0, %v722_v3  ;;  %2753 = vmatmul.msk.f32.vlgmr.msrb.gmra.mxu0 %vm96_vm0, %v722_v3 }
 0x4a7   :  { %1079 = vmatpush.msra.mxu3 %v3441_v38  ;;  %1313 = vmatpush.msrb.mxu0 %v3284_v9  ;;  %v833_v2 = vpop.f32.mrf.mxu1 }
 0x4a9   :  { %1080 = vmatpush.msra.mxu3 %v3453_v40  ;;  %1314 = vmatpush.msrb.mxu0 %v3298_v12 }
 0x4ab   :  { %1081 = vmatpush.msra.mxu3 %v3463_v42  ;;  %1315 = vmatpush.msrb.mxu0 %v3310_v14 }
 0x4ac   :  { %v448_v0 = vpop.permute.xlu1 %447 }
 0x4ad   :  { %450 = vst.msk [vmem:[#allocation3 + $0xa] sm:$0x3] %vm444_vm10, %v448_v0  ;;  %2744 = vmatmul.msk.f32.vlgmr.msra.gmra.mxu2 %vm96_vm0, %v448_v0  ;;  %1082 = vmatpush.msra.mxu3 %v3476_v44 }
 0x4ae   :  { %1054 = vmatpush.msra.mxu2 %v3436_v37  ;;  %1316 = vmatpush.msrb.mxu0 %v3322_v16 }
 0x4af   :  { %v999_v13 = vpop.f32.mrf.mxu1 }
 0x4b0   :  { %1055 = vmatpush.msra.mxu2 %v3446_v39 }
 0x4b2   :  { %1056 = vmatpush.msra.mxu2 %v3458_v41 }
 0x4b4   :  { %1057 = vmatpush.msra.mxu2 %v3471_v43 }
 0x50f   :  { %v551_v7 = vpop.f32.mrf.mxu2 }
 0x51b   :  { %v810_v4 = vpop.f32.mrf.mxu0 }
 0x51c   :  { %v834_v5 = vadd.f32 %v833_v2, %v810_v4 }
 0x51e   :  { %v836_v6 = vadd.f32 %v3357_v19, %v834_v5 }
 0x520   :  { %2859 = vtanh.f32 %v836_v6  ;;  %v2749_v47 = vmul.f32 -1.442695, %v836_v6 }
 0x521   :  { %v576_v9 = vpop.f32.mrf.mxu3 }
 0x522   :  { %v577_v10 = vadd.f32 %v576_v9, %v551_v7 }
 0x523   :  { %v976_v12 = vpop.f32.mrf.mxu0 }
 0x524   :  { %v579_v14 = vadd.f32 %v3526_v52, %v577_v10  ;;  %v1000_v16 = vadd.f32 %v999_v13, %v976_v12 }
 0x526   :  { %v2860_v15 = vpop.eup %2859  ;;  %2861 = vtanh.f32 %v579_v14  ;;  %v1002_v17 = vadd.f32 %v3363_v24, %v1000_v16  ;;  %v2740_v24 = vmul.f32 -1.442695, %v579_v14 }
 0x527   :  { %859 = vrot.lane.b32.xlu1 %v2860_v15, %s3154_s21 }
 0x528   :  { %2863 = vtanh.f32 %v1002_v17  ;;  %v2755_v11 = vmul.f32 -1.442695, %v1002_v17 }
 0x529   :  { %v742_v19 = vpop.f32.mrf.mxu3 }
 0x52c   :  { %v2862_v8 = vpop.eup %2861 }
 0x52d   :  { %602 = vrot.lane.b32.xlu0 %v2862_v8, %s3154_s21 }
 0x52e   :  { %v2864_v35 = vpop.eup %2863 }
 0x530   :  { %v717_v56 = vpop.f32.mrf.mxu2 }
 0x531   :  { %v743_v57 = vadd.f32 %v742_v19, %v717_v56 }
 0x533   :  { %v745_v62 = vadd.f32 %v3533_v61, %v743_v57 }
 0x535   :  { %2865 = vtanh.f32 %v745_v62  ;;  %1025 = vrot.lane.b32.xlu0 %v2864_v35, %s3154_s21  ;;  %v2746_v60 = vmul.f32 -1.442695, %v745_v62 }
 0x537   :  { %2867 = vpow2.f32 %v2746_v60 }
 0x538   :  { %2869 = vpow2.f32 %v2749_v47 }
 0x539   :  { %2871 = vpow2.f32 %v2740_v24 }
 0x53b   :  { %v2866_v51 = vpop.eup %2865 }
 0x53c   :  { %768 = vrot.lane.b32.xlu2 %v2866_v51, %s3154_s21 }
 0x53d   :  { %v2868_v54 = vpop.eup %2867 }
 0x53e   :  { %v2870_v32 = vpop.eup %2869  ;;  %v749_v33 = vadd.f32 1.0, %v2868_v54 }
 0x53f   :  { %v840_v36 = vadd.f32 1.0, %v2870_v32  ;;  %v2872_v46 = vpop.eup %2871 }
 0x540   :  { %2873 = vrcp.f32 %v749_v33  ;;  %v583_v49 = vadd.f32 1.0, %v2872_v46  ;;  %v761_v4 = vand.u32 2147483648, %v749_v33  ;;  %vm755_vm12 = vweird.f32 %v749_v33 }
 0x541   :  { %2875 = vrcp.f32 %v840_v36  ;;  %v759_v7 = vand.u32 2147483647, %v749_v33  ;;  %vm846_vm15 = vweird.f32 %v840_v36  ;;  %v852_v12 = vand.u32 2147483648, %v840_v36 }
 0x542   :  { %2877 = vpow2.f32 %v2755_v11  ;;  %v762_v13 = vor.u32 1.1754944e-38, %v761_v4  ;;  %v850_v14 = vand.u32 2147483647, %v840_v36  ;;  %v595_v47 = vand.u32 2147483648, %v583_v49 }
 0x543   :  { %2879 = vrcp.f32 %v583_v49  ;;  %vm760_vm1 = vcmp.eq.f32.partialorder %v759_v7, 8.507059e+37  ;;  %v853_v57 = vor.u32 1.1754944e-38, %v852_v12  ;;  %vm589_vm5 = vweird.f32 %v583_v49 }
 0x544   :  { %vm851_vm3 = vcmp.eq.f32.partialorder %v850_v14, 8.507059e+37  ;;  %v593_v54 = vand.u32 2147483647, %v583_v49 }
 0x546   :  { %v2874_v45 = vpop.eup %2873  ;;  %vm594_vm7 = vcmp.eq.f32.partialorder %v593_v54, 8.507059e+37  ;;  %v3706_v54 = vld [vmem:[%s4493_s1 + $0x30] sm:$0xff] }
 0x547   :  { %v2876_v63 = vpop.eup %2875  ;;  %v751_v50 = vmul.f32 %v2874_v45, %v749_v33  ;;  %vm756_vm11 = vweird.f32 %v2874_v45 }
 0x548   :  { %v2878_v55 = vpop.eup %2877  ;;  %v842_v48 = vmul.f32 %v2876_v63, %v840_v36  ;;  %vm757_vm13 = vmor %vm755_vm12, %vm756_vm11  ;;  %vm847_vm14 = vweird.f32 %v2876_v63  ;;  %v596_v36 = vor.u32 1.1754944e-38, %v595_v47  ;;  %v55_v47 = vld [vmem:[%s4492_s0 + $0xe] sm:$0x3] }
 0x549   :  { %v1006_v53 = vadd.f32 1.0, %v2878_v55  ;;  %v752_v34 = vsub.f32 1.0, %v751_v50  ;;  %v2880_v22 = vpop.eup %2879  ;;  %vm848_vm2 = vmor %vm846_vm15, %vm847_vm14 }
 0x54a   :  { %v843_v58 = vsub.f32 1.0, %v842_v48  ;;  %v585_v3 = vmul.f32 %v2880_v22, %v583_v49  ;;  %vm590_vm4 = vweird.f32 %v2880_v22 }
 0x54b   :  { %2881 = vrcp.f32 %v1006_v53  ;;  %v753_v1 = vmul.f32 %v2874_v45, %v752_v34  ;;  %vm591_vm6 = vmor %vm589_vm5, %vm590_vm4  ;;  %v1018_v50 = vand.u32 2147483648, %v1006_v53  ;;  %vm1012_vm9 = vweird.f32 %v1006_v53 }
 0x54c   :  { %v844_v0 = vmul.f32 %v2876_v63, %v843_v58  ;;  %v586_v5 = vsub.f32 1.0, %v585_v3  ;;  %v1016_v55 = vand.u32 2147483647, %v1006_v53 }
 0x54d   :  { %v754_v2 = vadd.f32 %v2874_v45, %v753_v1  ;;  %v1019_v49 = vor.u32 1.1754944e-38, %v1018_v50 }
 0x54e   :  { %v845_v9 = vadd.f32 %v2876_v63, %v844_v0  ;;  %v587_v15 = vmul.f32 %v2880_v22, %v586_v5  ;;  %vm1017_vm12 = vcmp.eq.f32.partialorder %v1016_v55, 8.507059e+37 }
 0x54f   :  { %v758_v10 = vsel %vm757_vm13, %v2874_v45, %v754_v2 }
 0x550   :  { %v3632_v8 = vsel %vm760_vm1, %v762_v13, %v758_v10  ;;  %v849_v19 = vsel %vm848_vm2, %v2876_v63, %v845_v9  ;;  %v588_v62 = vadd.f32 %v2880_v22, %v587_v15 }
 0x551   :  { %v2882_v6 = vpop.eup %2881  ;;  %v854_v60 = vsel %vm851_vm3, %v853_v57, %v849_v19 }
 0x552   :  { %v1008_v16 = vmul.f32 %v2882_v6, %v1006_v53  ;;  %v592_v32 = vsel %vm591_vm6, %v2880_v22, %v588_v62  ;;  %vm1013_vm8 = vweird.f32 %v2882_v6  ;;  %v857_v1 = vmul.f32 %v854_v60, %v3565_v21  ;;  %v54_v62 = vld [vmem:[%s4492_s0 + $0xc] sm:$0x3] }
 0x553   :  { %v597_v46 = vsel %vm594_vm7, %v596_v36, %v592_v32  ;;  %vm1014_vm11 = vmor %vm1012_vm9, %vm1013_vm8  ;;  %v766_v53 = vmul.f32 %v3632_v8, %v3558_v20  ;;  %2760 = vmatmul.msk.f32.vlgmr.msra.gmra.mxu1 %vm96_vm0, %v54_v62  ;;  %v3712_v32 = vld [vmem:[%s4493_s1 + $0x28] sm:$0xff] }
 0x554   :  { %v1009_v35 = vsub.f32 1.0, %v1008_v16 }
 0x556   :  { %v1010_v33 = vmul.f32 %v2882_v6, %v1009_v35  ;;  %v3672_v35 = vld [vmem:[%s4493_s1 + $0x18] sm:$0xff] }
 0x557   :  { %1512 = vmatpush.msra.mxu1 %v3672_v35 }
 0x558   :  { %v1011_v63 = vadd.f32 %v2882_v6, %v1010_v33  ;;  %v3718_v33 = vld [vmem:[%s4493_s1 + $0x20] sm:$0xff] }
 0x55a   :  { %v1015_v48 = vsel %vm1014_vm11, %v2882_v6, %v1011_v63  ;;  %v600_v6 = vmul.f32 %v597_v46, %v3551_v59 }
 0x55b   :  { %v1020_v58 = vsel %vm1017_vm12, %v1019_v49, %v1015_v48  ;;  %2766 = vmatmul.msk.f32.vlgmr.msrb.gmra.mxu1 %vm96_vm0, %v55_v47 }
 0x55c   :  { %v1023_v10 = vmul.f32 %v1020_v58, %v3556_v18 }
 0x596   :  { %v769_v17 = vpop.permute.xlu2 %768 }
 0x597   :  { %v771_v56 = vmul.f32 %v769_v17, %v3632_v8 }
 0x599   :  { %773 = vrot.lane.b32.xlu0 %v771_v56, %s3155_s22  ;;  %v860_v51 = vpop.permute.xlu1 %859 }
 0x59a   :  { %v862_v24 = vmul.f32 %v860_v51, %v854_v60  ;;  %v3678_v51 = vld [vmem:[%s4493_s1 + $0x10] sm:$0xff] }
 0x59b   :  { %1513 = vmatpush.msra.mxu1 %v3678_v51 }
 0x59c   :  { %864 = vrot.lane.b32.xlu2 %v862_v24, %s3155_s22  ;;  %v3700_v24 = vld [vmem:[%s4493_s1 + $0x38] sm:$0xff] }
 0x59f   :  { %v603_v11 = vpop.permute.xlu0 %602 }
 0x5a0   :  { %v605_v45 = vmul.f32 %v603_v11, %v597_v46 }
 0x5a2   :  { %607 = vrot.lane.b32.xlu1 %v605_v45, %s3155_s22  ;;  %v3735_v45 = vld [vmem:[%s4494_s2 + $0x10] sm:$0xff] }
 0x5a7   :  { %v1026_v34 = vpop.permute.xlu0 %1025 }
 0x5a8   :  { %v1028_v22 = vmul.f32 %v1026_v34, %v1020_v58  ;;  %v3804_v34 = vld [vmem:[%s4495_s3 + $0x1] ss:$0 sm:$0xff] }
 0x5aa   :  { %1030 = vrot.lane.b32.xlu1 %v1028_v22, %s3155_s22 }
 0x5f6   :  { %v865_v3 = vpop.permute.xlu2 %864 }
 0x5f7   :  { %v3640_v0 = vadd.f32 %v865_v3, %v857_v1 }
 0x5f9   :  { %2883 = vtanh.f32 %v3640_v0 }
 0x5ff   :  { %v2884_v2 = vpop.eup %2883 }
 0x600   :  { %870 = vrot.lane.b32.xlu0 %v2884_v2, %s3154_s21 }
 0x60b   :  { %v774_v4 = vpop.permute.xlu0 %773 }
 0x60c   :  { %v3646_v5 = vadd.f32 %v774_v4, %v766_v53 }
 0x60e   :  { %2885 = vtanh.f32 %v3646_v5 }
 0x614   :  { %v2886_v7 = vpop.eup %2885  ;;  %v608_v21 = vpop.permute.xlu1 %607 }
 0x615   :  { %v3650_v9 = vadd.f32 %v608_v21, %v600_v6  ;;  %779 = vrot.lane.b32.xlu1 %v2886_v7, %s3154_s21 }
 0x617   :  { %2887 = vtanh.f32 %v3650_v9 }
 0x61c   :  { %v1031_v12 = vpop.permute.xlu1 %1030 }
 0x61d   :  { %v2888_v13 = vpop.eup %2887  ;;  %v3655_v20 = vadd.f32 %v1031_v12, %v1023_v10 }
 0x61e   :  { %613 = vrot.lane.b32.xlu2 %v2888_v13, %s3154_s21 }
 0x61f   :  { %2889 = vtanh.f32 %v3655_v20 }
 0x625   :  { %v2890_v14 = vpop.eup %2889 }
 0x626   :  { %1036 = vrot.lane.b32.xlu2 %v2890_v14, %s3154_s21 }
 0x672   :  { %v871_v59 = vpop.permute.xlu0 %870 }
 0x673   :  { %v873_v15 = vmul.f32 %v871_v59, %v854_v60  ;;  %v3690_v60 = vld [vmem:[%s4493_s1] sm:$0xff] }
 0x675   :  { %897 = vrot.lane.b32.xlu1 %v873_v15, %s3155_s22 }
 0x678   :  { %v614_v16 = vpop.permute.xlu2 %613 }
 0x679   :  { %v616_v17 = vmul.f32 %v614_v16, %v597_v46  ;;  %v3728_v46 = vld [vmem:[%s4494_s2 + $0x18] sm:$0xff] }
 0x67b   :  { %784 = vrot.lane.b32.xlu0 %v616_v17, %s3155_s22 }
 0x680   :  { %v1037_v18 = vpop.permute.xlu2 %1036 }
 0x681   :  { %v1039_v19 = vmul.f32 %v1037_v18, %v1020_v58 }
 0x683   :  { %1063 = vrot.lane.b32.xlu0 %v1039_v19, %s3155_s22 }
 0x687   :  { %v780_v56 = vpop.permute.xlu1 %779 }
 0x688   :  { %v782_v57 = vmul.f32 %v780_v56, %v3632_v8  ;;  %v3684_v8 = vld [vmem:[%s4493_s1 + $0x8] sm:$0xff] }
 0x689   :  { %1514 = vmatpush.msra.mxu1 %v3684_v8 }
 0x68a   :  { %789 = vrot.lane.b32.xlu2 %v782_v57, %s3155_s22 }
 0x68b   :  { %1515 = vmatpush.msra.mxu1 %v3690_v60 }
 0x68d   :  { %1678 = vmatpush.msrb.mxu1 %v3700_v24 }
 0x68f   :  { %1679 = vmatpush.msrb.mxu1 %v3706_v54 }
 0x691   :  { %1680 = vmatpush.msrb.mxu1 %v3712_v32 }
 0x693   :  { %1681 = vmatpush.msrb.mxu1 %v3718_v33 }
 0x6e4   :  { %v790_v36 = vpop.permute.xlu2 %789 }
 0x6e5   :  { %792 = vst.msk [vmem:[#allocation3 + $0x8] sm:$0x3] %vm444_vm10, %v790_v36 }
 0x6e7   :  { %v898_v11 = vpop.permute.xlu1 %897 }
 0x6e8   :  { %2751 = vmatmul.msk.f32.vlgmr.msrb.gmra.mxu3 %vm96_vm0, %v898_v11  ;;  %2759 = vmatmul.msk.f32.vlgmr.msra.gmra.mxu0 %vm96_vm0, %v898_v11 }
 0x6e9   :  { %1255 = vmatpush.msrb.mxu3 %v3404_v28  ;;  %1489 = vmatpush.msra.mxu0 %v3728_v46  ;;  %v3742_v28 = vld [vmem:[%s4494_s2 + $0x8] sm:$0xff] }
 0x6eb   :  { %1256 = vmatpush.msrb.mxu3 %v3411_v29  ;;  %1490 = vmatpush.msra.mxu0 %v3735_v45  ;;  %v3751_v29 = vld [vmem:[%s4494_s2] sm:$0xff] }
 0x6ed   :  { %v785_v63 = vpop.permute.xlu0 %784  ;;  %1257 = vmatpush.msrb.mxu3 %v3417_v30  ;;  %1491 = vmatpush.msra.mxu0 %v3742_v28 }
 0x6ee   :  { %787 = vst.msk [vmem:[#allocation2 + $0x2] sm:$0x3] %vm444_vm10, %v785_v63  ;;  %2750 = vmatmul.msk.f32.vlgmr.msrb.gmra.mxu2 %vm96_vm0, %v785_v63 }
 0x6ef   :  { %1258 = vmatpush.msrb.mxu3 %v3423_v31  ;;  %1492 = vmatpush.msra.mxu0 %v3751_v29  ;;  %v1175_v31 = vpop.f32.mrf.mxu1 }
 0x6f0   :  { %1230 = vmatpush.msrb.mxu2 %v3381_v23  ;;  %v3766_v23 = vld [vmem:[%s4494_s2 + $0x38] sm:$0xff] }
 0x6f2   :  { %1231 = vmatpush.msrb.mxu2 %v3386_v25  ;;  %v3774_v25 = vld [vmem:[%s4494_s2 + $0x30] sm:$0xff] }
 0x6f4   :  { %1232 = vmatpush.msrb.mxu2 %v3392_v26  ;;  %v3782_v26 = vld [vmem:[%s4494_s2 + $0x28] sm:$0xff] }
 0x6f5   :  { %v1064_v30 = vpop.permute.xlu0 %1063 }
 0x6f6   :  { %2756 = vmatmul.msk.f32.vlgmr.msra.gmra.mxu2 %vm96_vm0, %v790_v36  ;;  %2757 = vmatmul.msk.f32.vlgmr.msra.gmra.mxu3 %vm96_vm0, %v1064_v30 }
 0x6f7   :  { %2765 = vmatmul.msk.f32.vlgmr.msrb.gmra.mxu0 %vm96_vm0, %v1064_v30  ;;  %1233 = vmatpush.msrb.mxu2 %v3398_v27  ;;  %v3790_v27 = vld [vmem:[%s4494_s2 + $0x20] sm:$0xff]  ;;  %v1341_v50 = vpop.f32.mrf.mxu1 }
 0x6f8   :  { %1421 = vmatpush.msra.mxu3 %v3441_v38  ;;  %1655 = vmatpush.msrb.mxu0 %v3766_v23 }
 0x6f9   :  { %1396 = vmatpush.msra.mxu2 %v3436_v37 }
 0x6fa   :  { %1422 = vmatpush.msra.mxu3 %v3453_v40  ;;  %1656 = vmatpush.msrb.mxu0 %v3774_v25 }
 0x6fb   :  { %1397 = vmatpush.msra.mxu2 %v3446_v39  ;;  %v3796_v39 = vld [vmem:[%s4495_s3] ss:$0 sm:$0xff] }
 0x6fc   :  { %1423 = vmatpush.msra.mxu3 %v3463_v42  ;;  %1657 = vmatpush.msrb.mxu0 %v3782_v26 }
 0x6fd   :  { %1398 = vmatpush.msra.mxu2 %v3458_v41 }
 0x6fe   :  { %1424 = vmatpush.msra.mxu3 %v3476_v44  ;;  %1658 = vmatpush.msrb.mxu0 %v3790_v27 }
 0x6ff   :  { %1399 = vmatpush.msra.mxu2 %v3471_v43 }
 0x765   :  { %v1152_v37 = vpop.f32.mrf.mxu0 }
 0x766   :  { %v1176_v38 = vadd.f32 %v1175_v31, %v1152_v37 }
 0x768   :  { %v1178_v40 = vadd.f32 %v3796_v39, %v1176_v38 }
 0x76a   :  { %2891 = vtanh.f32 %v1178_v40  ;;  %v2761_v6 = vmul.f32 -1.442695, %v1178_v40 }
 0x76b   :  { %v918_v42 = vpop.f32.mrf.mxu3 }
 0x770   :  { %v2892_v41 = vpop.eup %2891 }
 0x771   :  { %v893_v43 = vpop.f32.mrf.mxu2  ;;  %1201 = vrot.lane.b32.xlu2 %v2892_v41, %s3154_s21 }
 0x772   :  { %v919_v44 = vadd.f32 %v918_v42, %v893_v43 }
 0x774   :  { %v921_v55 = vadd.f32 %v3526_v52, %v919_v44  ;;  %v1318_v48 = vpop.f32.mrf.mxu0 }
 0x775   :  { %v1342_v49 = vadd.f32 %v1341_v50, %v1318_v48 }
 0x776   :  { %2893 = vtanh.f32 %v921_v55 }
 0x777   :  { %v1344_v58 = vadd.f32 %v3804_v34, %v1342_v49 }
 0x779   :  { %v1059_v22 = vpop.f32.mrf.mxu2  ;;  %v1084_v1 = vpop.f32.mrf.mxu3  ;;  %2895 = vtanh.f32 %v1344_v58  ;;  %v2767_v18 = vmul.f32 -1.442695, %v1344_v58 }
 0x77a   :  { %v1085_v3 = vadd.f32 %v1084_v1, %v1059_v22 }
 0x77c   :  { %v2894_v2 = vpop.eup %2893  ;;  %v1087_v53 = vadd.f32 %v3533_v61, %v1085_v3  ;;  %v2752_v61 = vmul.f32 -1.442695, %v921_v55 }
 0x77d   :  { %944 = vrot.lane.b32.xlu1 %v2894_v2, %s3154_s21 }
 0x77e   :  { %2897 = vtanh.f32 %v1087_v53  ;;  %v2758_v56 = vmul.f32 -1.442695, %v1087_v53 }
 0x77f   :  { %v2896_v52 = vpop.eup %2895  ;;  %2899 = vpow2.f32 %v2761_v6 }
 0x784   :  { %v2898_v4 = vpop.eup %2897 }
 0x785   :  { %1110 = vrot.lane.b32.xlu0 %v2898_v4, %s3154_s21  ;;  %1367 = vrot.lane.b32.xlu1 %v2896_v52, %s3154_s21  ;;  %v2900_v7 = vpop.eup %2899 }
 0x786   :  { %v1182_v21 = vadd.f32 1.0, %v2900_v7 }
 0x788   :  { %2901 = vrcp.f32 %v1182_v21  ;;  %v1194_v15 = vand.u32 2147483648, %v1182_v21  ;;  %vm1188_vm14 = vweird.f32 %v1182_v21  ;;  %v1192_v16 = vand.u32 2147483647, %v1182_v21 }
 0x789   :  { %2903 = vpow2.f32 %v2752_v61 }
 0x78a   :  { %v1195_v19 = vor.u32 1.1754944e-38, %v1194_v15  ;;  %vm1193_vm1 = vcmp.eq.f32.partialorder %v1192_v16, 8.507059e+37  ;;  %2905 = vpow2.f32 %v2767_v18 }
 0x78b   :  { %2907 = vpow2.f32 %v2758_v56 }
 0x78e   :  { %v2902_v10 = vpop.eup %2901 }
 0x78f   :  { %v1184_v12 = vmul.f32 %v2902_v10, %v1182_v21  ;;  %vm1189_vm13 = vweird.f32 %v2902_v10  ;;  %v2904_v47 = vpop.eup %2903 }
 0x790   :  { %vm1190_vm15 = vmor %vm1188_vm14, %vm1189_vm13  ;;  %v925_v11 = vadd.f32 1.0, %v2904_v47  ;;  %v2906_v63 = vpop.eup %2905 }
 0x791   :  { %v1185_v13 = vsub.f32 1.0, %v1184_v12  ;;  %v2908_v30 = vpop.eup %2907  ;;  %v1348_v31 = vadd.f32 1.0, %v2906_v63 }
 0x792   :  { %2909 = vrcp.f32 %v925_v11  ;;  %v1091_v37 = vadd.f32 1.0, %v2908_v30  ;;  %v937_v22 = vand.u32 2147483648, %v925_v11  ;;  %vm931_vm3 = vweird.f32 %v925_v11 }
 0x793   :  { %v1186_v14 = vmul.f32 %v2902_v10, %v1185_v13  ;;  %2911 = vrcp.f32 %v1348_v31  ;;  %v935_v1 = vand.u32 2147483647, %v925_v11  ;;  %vm1354_vm8 = vweird.f32 %v1348_v31 }
 0x794   :  { %2913 = vrcp.f32 %v1091_v37  ;;  %v938_v52 = vor.u32 1.1754944e-38, %v937_v22  ;;  %v1103_v12 = vand.u32 2147483648, %v1091_v37  ;;  %v1360_v13 = vand.u32 2147483648, %v1348_v31 }
 0x795   :  { %v1187_v59 = vadd.f32 %v2902_v10, %v1186_v14  ;;  %vm936_vm5 = vcmp.eq.f32.partialorder %v935_v1, 8.507059e+37  ;;  %vm1097_vm9 = vweird.f32 %v1091_v37  ;;  %v1101_v14 = vand.u32 2147483647, %v1091_v37 }
 0x796   :  { %v1358_v61 = vand.u32 2147483647, %v1348_v31  ;;  %v1104_v16 = vor.u32 1.1754944e-38, %v1103_v12 }
 0x797   :  { %v1191_v17 = vsel %vm1190_vm15, %v2902_v10, %v1187_v59  ;;  %vm1102_vm13 = vcmp.eq.f32.partialorder %v1101_v14, 8.507059e+37 }
 0x798   :  { %v3811_v62 = vsel %vm1193_vm1, %v1195_v19, %v1191_v17  ;;  %v2910_v38 = vpop.eup %2909  ;;  %v1361_v17 = vor.u32 1.1754944e-38, %v1360_v13  ;;  %vm1359_vm14 = vcmp.eq.f32.partialorder %v1358_v61, 8.507059e+37 }
 0x799   :  { %v927_v40 = vmul.f32 %v2910_v38, %v925_v11  ;;  %v2912_v41 = vpop.eup %2911  ;;  %vm932_vm2 = vweird.f32 %v2910_v38  ;;  %v1199_v11 = vmul.f32 %v3811_v62, %v3640_v0 }
 0x79a   :  { %v2914_v43 = vpop.eup %2913  ;;  %v1350_v55 = vmul.f32 %v2912_v41, %v1348_v31  ;;  %vm933_vm4 = vmor %vm931_vm3, %vm932_vm2  ;;  %vm1355_vm6 = vweird.f32 %v2912_v41 }
 0x79b   :  { %v928_v42 = vsub.f32 1.0, %v927_v40  ;;  %v1093_v50 = vmul.f32 %v2914_v43, %v1091_v37  ;;  %vm1098_vm7 = vweird.f32 %v2914_v43  ;;  %vm1356_vm11 = vmor %vm1354_vm8, %vm1355_vm6 }
 0x79c   :  { %v1351_v58 = vsub.f32 1.0, %v1350_v55  ;;  %vm1099_vm12 = vmor %vm1097_vm9, %vm1098_vm7 }
 0x79d   :  { %v929_v44 = vmul.f32 %v2910_v38, %v928_v42  ;;  %v1094_v49 = vsub.f32 1.0, %v1093_v50 }
 0x79e   :  { %v1352_v53 = vmul.f32 %v2912_v41, %v1351_v58 }
 0x79f   :  { %v930_v48 = vadd.f32 %v2910_v38, %v929_v44  ;;  %v1095_v2 = vmul.f32 %v2914_v43, %v1094_v49 }
 0x7a0   :  { %v1353_v10 = vadd.f32 %v2912_v41, %v1352_v53  ;;  %v56_v53 = vld [vmem:[%s4492_s0 + $0x10] sm:$0x3] }
 0x7a1   :  { %v934_v3 = vsel %vm933_vm4, %v2910_v38, %v930_v48  ;;  %v1096_v21 = vadd.f32 %v2914_v43, %v1095_v2  ;;  %2772 = vmatmul.msk.f32.vlgmr.msra.gmra.mxu1 %vm96_vm0, %v56_v53 }
 0x7a2   :  { %v939_v6 = vsel %vm936_vm5, %v938_v52, %v934_v3  ;;  %v1357_v15 = vsel %vm1356_vm11, %v2912_v41, %v1353_v10  ;;  %1854 = vmatpush.msra.mxu1 %v3672_v35  ;;  %v3857_v52 = vld [vmem:[%s4496_s4 + $0x18] sm:$0xff]  ;;  %v3864_v35 = vld [vmem:[%s4496_s4 + $0x10] sm:$0xff] }
 0x7a3   :  { %v1100_v59 = vsel %vm1099_vm12, %v2914_v43, %v1096_v21  ;;  %v1362_v56 = vsel %vm1359_vm14, %v1361_v17, %v1357_v15  ;;  %v942_v37 = vmul.f32 %v939_v6, %v3650_v9  ;;  %v3962_v21 = vld [vmem:[%s4496_s4 + $0x20] sm:$0xff] }
 0x7a4   :  { %v1105_v19 = vsel %vm1102_vm13, %v1104_v16, %v1100_v59  ;;  %v1365_v41 = vmul.f32 %v1362_v56, %v3655_v20  ;;  %1855 = vmatpush.msra.mxu1 %v3678_v51  ;;  %v3871_v51 = vld [vmem:[%s4496_s4 + $0x8] sm:$0xff]  ;;  %v3977_v17 = vld [vmem:[%s4498_s6] ss:$0 sm:$0xff] }
 0x7a5   :  { %v1108_v9 = vmul.f32 %v1105_v19, %v3646_v5 }
 0x7a6   :  { %1856 = vmatpush.msra.mxu1 %v3684_v8  ;;  %v3878_v8 = vld [vmem:[%s4496_s4] sm:$0xff] }
 0x7a8   :  { %1857 = vmatpush.msra.mxu1 %v3690_v60  ;;  %v57_v60 = vld [vmem:[%s4492_s0 + $0x12] sm:$0x3] }
 0x7a9   :  { %2778 = vmatmul.msk.f32.vlgmr.msrb.gmra.mxu1 %vm96_vm0, %v57_v60 }
 0x7aa   :  { %2020 = vmatpush.msrb.mxu1 %v3700_v24  ;;  %v3901_v24 = vld [vmem:[%s4497_s5 + $0x10] sm:$0xff] }
 0x7ac   :  { %2021 = vmatpush.msrb.mxu1 %v3706_v54  ;;  %v3907_v54 = vld [vmem:[%s4497_s5 + $0x8] sm:$0xff] }
 0x7ae   :  { %2022 = vmatpush.msrb.mxu1 %v3712_v32 }
 0x7b0   :  { %2023 = vmatpush.msrb.mxu1 %v3718_v33 }
 0x7cb   :  { %v1202_v57 = vpop.permute.xlu2 %1201 }
 0x7cc   :  { %v1204_v36 = vmul.f32 %v1202_v57, %v3811_v62 }
 0x7ce   :  { %1206 = vrot.lane.b32.xlu0 %v1204_v36, %s3155_s22 }
 0x7ef   :  { %v945_v4 = vpop.permute.xlu1 %944 }
 0x7f0   :  { %v947_v7 = vmul.f32 %v945_v4, %v939_v6  ;;  %v3930_v4 = vld [vmem:[%s4497_s5 + $0x38] sm:$0xff] }
 0x7f2   :  { %949 = vrot.lane.b32.xlu2 %v947_v7, %s3155_s22  ;;  %v3949_v7 = vld [vmem:[%s4496_s4 + $0x28] sm:$0xff] }
 0x7f7   :  { %v1111_v18 = vpop.permute.xlu0 %1110  ;;  %v1368_v57 = vpop.permute.xlu1 %1367 }
 0x7f8   :  { %v1113_v47 = vmul.f32 %v1111_v18, %v1105_v19  ;;  %v1370_v36 = vmul.f32 %v1368_v57, %v1362_v56 }
 0x7fa   :  { %1115 = vrot.lane.b32.xlu1 %v1113_v47, %s3155_s22  ;;  %1372 = vrot.lane.b32.xlu2 %v1370_v36, %s3155_s22 }
 0x81e   :  { %v1517_v10 = vpop.f32.mrf.mxu1 }
 0x840   :  { %v1207_v63 = vpop.permute.xlu0 %1206 }
 0x841   :  { %v3820_v30 = vadd.f32 %v1207_v63, %v1199_v11 }
 0x843   :  { %2915 = vtanh.f32 %v3820_v30 }
 0x849   :  { %v2916_v31 = vpop.eup %2915 }
 0x84a   :  { %1212 = vrot.lane.b32.xlu1 %v2916_v31, %s3154_s21  ;;  %v3984_v31 = vld [vmem:[%s4498_s6 + $0x1] ss:$0 sm:$0xff] }
 0x84c   :  { %v950_v38 = vpop.permute.xlu2 %949 }
 0x84d   :  { %v3825_v40 = vadd.f32 %v950_v38, %v942_v37 }
 0x84f   :  { %2917 = vtanh.f32 %v3825_v40 }
 0x854   :  { %v1373_v42 = vpop.permute.xlu2 %1372 }
 0x855   :  { %v2918_v43 = vpop.eup %2917  ;;  %v3829_v0 = vadd.f32 %v1373_v42, %v1365_v41 }
 0x856   :  { %955 = vrot.lane.b32.xlu0 %v2918_v43, %s3154_s21 }
 0x857   :  { %2919 = vtanh.f32 %v3829_v0 }
 0x85d   :  { %v2920_v44 = vpop.eup %2919 }
 0x85e   :  { %1378 = vrot.lane.b32.xlu0 %v2920_v44, %s3154_s21 }
 0x86c   :  { %v1116_v50 = vpop.permute.xlu1 %1115 }
 0x86d   :  { %v3835_v55 = vadd.f32 %v1116_v50, %v1108_v9 }
 0x86f   :  { %2921 = vtanh.f32 %v3835_v55 }
 0x875   :  { %v2922_v48 = vpop.eup %2921 }
 0x876   :  { %1121 = vrot.lane.b32.xlu2 %v2922_v48, %s3154_s21 }
 0x8bc   :  { %v1213_v20 = vpop.permute.xlu1 %1212 }
 0x8bd   :  { %v1215_v49 = vmul.f32 %v1213_v20, %v3811_v62 }
 0x8bf   :  { %1239 = vrot.lane.b32.xlu2 %v1215_v49, %s3155_s22 }
 0x8c8   :  { %v956_v58 = vpop.permute.xlu0 %955 }
 0x8c9   :  { %v958_v22 = vmul.f32 %v956_v58, %v939_v6  ;;  %v3936_v6 = vld [vmem:[%s4496_s4 + $0x30] sm:$0xff] }
 0x8cb   :  { %1126 = vrot.lane.b32.xlu1 %v958_v22, %s3155_s22 }
 0x8d0   :  { %v1122_v1 = vpop.permute.xlu2 %1121  ;;  %v1379_v3 = vpop.permute.xlu0 %1378 }
 0x8d1   :  { %v1124_v5 = vmul.f32 %v1122_v1, %v1105_v19  ;;  %v1381_v2 = vmul.f32 %v1379_v3, %v1362_v56 }
 0x8d3   :  { %1131 = vrot.lane.b32.xlu0 %v1124_v5, %s3155_s22  ;;  %1405 = vrot.lane.b32.xlu1 %v1381_v2, %s3155_s22 }
 0x919   :  { %v1240_v62 = vpop.permute.xlu2 %1239 }
 0x91a   :  { %2763 = vmatmul.msk.f32.vlgmr.msrb.gmra.mxu3 %vm96_vm0, %v1240_v62  ;;  %2771 = vmatmul.msk.f32.vlgmr.msra.gmra.mxu0 %vm96_vm0, %v1240_v62 }
 0x91b   :  { %1597 = vmatpush.msrb.mxu3 %v3857_v52  ;;  %1831 = vmatpush.msra.mxu0 %v3728_v46 }
 0x91d   :  { %1598 = vmatpush.msrb.mxu3 %v3864_v35  ;;  %1832 = vmatpush.msra.mxu0 %v3735_v45  ;;  %v3895_v45 = vld [vmem:[%s4497_s5 + $0x18] sm:$0xff] }
 0x91f   :  { %1599 = vmatpush.msrb.mxu3 %v3871_v51  ;;  %1833 = vmatpush.msra.mxu0 %v3742_v28  ;;  %v3913_v28 = vld [vmem:[%s4497_s5] sm:$0xff] }
 0x921   :  { %1600 = vmatpush.msrb.mxu3 %v3878_v8  ;;  %1834 = vmatpush.msra.mxu0 %v3751_v29  ;;  %v3923_v29 = vld [vmem:[%s4496_s4 + $0x38] sm:$0xff] }
 0x93d   :  { %v1127_v46 = vpop.permute.xlu1 %1126 }
 0x93e   :  { %1129 = vst.msk [vmem:[#allocation2 + $0x4] sm:$0x3] %vm444_vm10, %v1127_v46  ;;  %2762 = vmatmul.msk.f32.vlgmr.msrb.gmra.mxu2 %vm96_vm0, %v1127_v46 }
 0x93f   :  { %1572 = vmatpush.msrb.mxu2 %v3895_v45 }
 0x941   :  { %1573 = vmatpush.msrb.mxu2 %v3901_v24 }
 0x943   :  { %1574 = vmatpush.msrb.mxu2 %v3907_v54 }
 0x945   :  { %v1406_v32 = vpop.permute.xlu1 %1405  ;;  %v1132_v33 = vpop.permute.xlu0 %1131  ;;  %1575 = vmatpush.msrb.mxu2 %v3913_v28 }
 0x946   :  { %1134 = vst.msk [vmem:[#allocation3 + $0x6] sm:$0x3] %vm444_vm10, %v1132_v33  ;;  %2768 = vmatmul.msk.f32.vlgmr.msra.gmra.mxu2 %vm96_vm0, %v1132_v33  ;;  %2769 = vmatmul.msk.f32.vlgmr.msra.gmra.mxu3 %vm96_vm0, %v1406_v32 }
 0x947   :  { %2777 = vmatmul.msk.f32.vlgmr.msrb.gmra.mxu0 %vm96_vm0, %v1406_v32  ;;  %1763 = vmatpush.msra.mxu3 %v3923_v29 }
 0x948   :  { %1997 = vmatpush.msrb.mxu0 %v3766_v23  ;;  %1738 = vmatpush.msra.mxu2 %v3930_v4  ;;  %v3943_v23 = vld [vmem:[%s4497_s5 + $0x30] sm:$0xff] }
 0x949   :  { %1764 = vmatpush.msra.mxu3 %v3936_v6 }
 0x94a   :  { %1998 = vmatpush.msrb.mxu0 %v3774_v25  ;;  %1739 = vmatpush.msra.mxu2 %v3943_v23  ;;  %v3956_v25 = vld [vmem:[%s4497_s5 + $0x28] sm:$0xff] }
 0x94b   :  { %1765 = vmatpush.msra.mxu3 %v3949_v7 }
 0x94c   :  { %1999 = vmatpush.msrb.mxu0 %v3782_v26  ;;  %1740 = vmatpush.msra.mxu2 %v3956_v25  ;;  %v3969_v26 = vld [vmem:[%s4497_s5 + $0x20] sm:$0xff] }
 0x94d   :  { %1766 = vmatpush.msra.mxu3 %v3962_v21 }
 0x94e   :  { %2000 = vmatpush.msrb.mxu0 %v3790_v27  ;;  %1741 = vmatpush.msra.mxu2 %v3969_v26  ;;  %v1683_v27 = vpop.f32.mrf.mxu1 }
 0x997   :  { %v1494_v12 = vpop.f32.mrf.mxu0 }
 0x998   :  { %v1518_v13 = vadd.f32 %v1517_v10, %v1494_v12 }
 0x99a   :  { %v1520_v14 = vadd.f32 %v3796_v39, %v1518_v13 }
 0x99c   :  { %2923 = vtanh.f32 %v1520_v14  ;;  %v2773_v42 = vmul.f32 -1.442695, %v1520_v14 }
 0x99d   :  { %v1260_v59 = vpop.f32.mrf.mxu3 }
 0x9a2   :  { %v2924_v61 = vpop.eup %2923 }
 0x9a3   :  { %1543 = vrot.lane.b32.xlu0 %v2924_v61, %s3154_s21 }
 0x9c1   :  { %v1235_v15 = vpop.f32.mrf.mxu2 }
 0x9c2   :  { %v1261_v16 = vadd.f32 %v1260_v59, %v1235_v15 }
 0x9c4   :  { %v1263_v18 = vadd.f32 %v3977_v17, %v1261_v16  ;;  %v1660_v19 = vpop.f32.mrf.mxu0 }
 0x9c5   :  { %v1684_v56 = vadd.f32 %v1683_v27, %v1660_v19 }
 0x9c6   :  { %2925 = vtanh.f32 %v1263_v18  ;;  %v2764_v9 = vmul.f32 -1.442695, %v1263_v18 }
 0x9c7   :  { %v1686_v57 = vadd.f32 %v3804_v34, %v1684_v56 }
 0x9c9   :  { %v1401_v47 = vpop.f32.mrf.mxu2  ;;  %v1426_v36 = vpop.f32.mrf.mxu3  ;;  %2927 = vtanh.f32 %v1686_v57  ;;  %v2779_v48 = vmul.f32 -1.442695, %v1686_v57 }
 0x9ca   :  { %v1427_v11 = vadd.f32 %v1426_v36, %v1401_v47 }
 0x9cc   :  { %v2926_v63 = vpop.eup %2925  ;;  %v1429_v37 = vadd.f32 %v3984_v31, %v1427_v11 }
 0x9cd   :  { %1286 = vrot.lane.b32.xlu2 %v2926_v63, %s3154_s21 }
 0x9ce   :  { %2929 = vtanh.f32 %v1429_v37  ;;  %v2770_v59 = vmul.f32 -1.442695, %v1429_v37 }
 0x9cf   :  { %v2928_v38 = vpop.eup %2927  ;;  %2931 = vpow2.f32 %v2773_v42 }
 0x9d4   :  { %v2930_v41 = vpop.eup %2929 }
 0x9d5   :  { %1709 = vrot.lane.b32.xlu2 %v2928_v38, %s3154_s21  ;;  %1452 = vrot.lane.b32.xlu1 %v2930_v41, %s3154_s21  ;;  %v2932_v43 = vpop.eup %2931 }
 0x9d6   :  { %v1524_v44 = vadd.f32 1.0, %v2932_v43 }
 0x9d8   :  { %2933 = vrcp.f32 %v1524_v44  ;;  %v1536_v53 = vand.u32 2147483648, %v1524_v44  ;;  %vm1530_vm1 = vweird.f32 %v1524_v44  ;;  %v1534_v62 = vand.u32 2147483647, %v1524_v44 }
 0x9d9   :  { %2935 = vpow2.f32 %v2764_v9 }
 0x9da   :  { %2937 = vpow2.f32 %v2779_v48  ;;  %v1537_v32 = vor.u32 1.1754944e-38, %v1536_v53  ;;  %vm1535_vm3 = vcmp.eq.f32.partialorder %v1534_v62, 8.507059e+37 }
 0x9de   :  { %v2934_v50 = vpop.eup %2933 }
 0x9df   :  { %v1526_v20 = vmul.f32 %v2934_v50, %v1524_v44  ;;  %v2936_v49 = vpop.eup %2935  ;;  %vm1531_vm15 = vweird.f32 %v2934_v50 }
 0x9e0   :  { %v1267_v22 = vadd.f32 1.0, %v2936_v49  ;;  %v2938_v3 = vpop.eup %2937  ;;  %vm1532_vm2 = vmor %vm1530_vm1, %vm1531_vm15 }
 0x9e1   :  { %v1527_v58 = vsub.f32 1.0, %v1526_v20  ;;  %v1690_v2 = vadd.f32 1.0, %v2938_v3 }
 0x9e2   :  { %2939 = vrcp.f32 %v1267_v22  ;;  %v1279_v19 = vand.u32 2147483648, %v1267_v22  ;;  %vm1273_vm5 = vweird.f32 %v1267_v22  ;;  %v1277_v56 = vand.u32 2147483647, %v1267_v22 }
 0x9e3   :  { %v1528_v1 = vmul.f32 %v2934_v50, %v1527_v58  ;;  %2941 = vrcp.f32 %v1690_v2  ;;  %v1702_v43 = vand.u32 2147483648, %v1690_v2  ;;  %vm1696_vm9 = vweird.f32 %v1690_v2 }
 0x9e4   :  { %2943 = vpow2.f32 %v2770_v59  ;;  %v1280_v11 = vor.u32 1.1754944e-38, %v1279_v19  ;;  %vm1278_vm7 = vcmp.eq.f32.partialorder %v1277_v56, 8.507059e+37  ;;  %v1700_v44 = vand.u32 2147483647, %v1690_v2 }
 0x9e5   :  { %v1529_v5 = vadd.f32 %v2934_v50, %v1528_v1 }
 0x9e6   :  { %vm1701_vm12 = vcmp.eq.f32.partialorder %v1700_v44, 8.507059e+37  ;;  %v58_v44 = vld [vmem:[%s4492_s0 + $0x14] sm:$0x3] }
 0x9e7   :  { %v1533_v46 = vsel %vm1532_vm2, %v2934_v50, %v1529_v5  ;;  %v1703_v50 = vor.u32 1.1754944e-38, %v1702_v43  ;;  %2784 = vmatmul.msk.f32.vlgmr.msra.gmra.mxu1 %vm96_vm0, %v58_v44 }
 0x9e8   :  { %v2940_v60 = vpop.eup %2939  ;;  %v3990_v10 = vsel %vm1535_vm3, %v1537_v32, %v1533_v46 }
 0x9e9   :  { %v1269_v33 = vmul.f32 %v2940_v60, %v1267_v22  ;;  %v2942_v61 = vpop.eup %2941  ;;  %vm1274_vm4 = vweird.f32 %v2940_v60 }
 0x9ea   :  { %v1692_v16 = vmul.f32 %v2942_v61, %v1690_v2  ;;  %vm1275_vm6 = vmor %vm1273_vm5, %vm1274_vm4  ;;  %v2944_v57 = vpop.eup %2943  ;;  %vm1697_vm8 = vweird.f32 %v2942_v61 }
 0x9eb   :  { %v1270_v14 = vsub.f32 1.0, %v1269_v33  ;;  %v1433_v63 = vadd.f32 1.0, %v2944_v57  ;;  %vm1698_vm11 = vmor %vm1696_vm9, %vm1697_vm8 }
 0x9ec   :  { %v1693_v18 = vsub.f32 1.0, %v1692_v16 }
 0x9ed   :  { %v1271_v15 = vmul.f32 %v2940_v60, %v1270_v14  ;;  %2945 = vrcp.f32 %v1433_v63  ;;  %v1445_v53 = vand.u32 2147483648, %v1433_v63  ;;  %vm1439_vm14 = vweird.f32 %v1433_v63 }
 0x9ee   :  { %v1694_v36 = vmul.f32 %v2942_v61, %v1693_v18  ;;  %v1443_v62 = vand.u32 2147483647, %v1433_v63 }
 0x9ef   :  { %v1272_v27 = vadd.f32 %v2940_v60, %v1271_v15 }
 0x9f0   :  { %v1695_v37 = vadd.f32 %v2942_v61, %v1694_v36  ;;  %vm1444_vm1 = vcmp.eq.f32.partialorder %v1443_v62, 8.507059e+37 }
 0x9f1   :  { %v1276_v47 = vsel %vm1275_vm6, %v2940_v60, %v1272_v27  ;;  %v1446_v60 = vor.u32 1.1754944e-38, %v1445_v53 }
 0x9f2   :  { %v1281_v41 = vsel %vm1278_vm7, %v1280_v11, %v1276_v47  ;;  %v1699_v9 = vsel %vm1698_vm11, %v2942_v61, %v1695_v37 }
 0x9f3   :  { %v1704_v20 = vsel %vm1701_vm12, %v1703_v50, %v1699_v9  ;;  %v2946_v58 = vpop.eup %2945  ;;  %v1284_v59 = vmul.f32 %v1281_v41, %v3825_v40  ;;  %v2163_v9 = vld [vmem:[%s4499_s7 + $0x10] sm:$0xff]  ;;  %v2162_v50 = vld [vmem:[%s4499_s7 + $0x8] sm:$0xff] }
 0x9f4   :  { %v1435_v22 = vmul.f32 %v2946_v58, %v1433_v63  ;;  %vm1440_vm13 = vweird.f32 %v2946_v58  ;;  %v1707_v18 = vmul.f32 %v1704_v20, %v3829_v0 }
 0x9f5   :  { %vm1441_vm15 = vmor %vm1439_vm14, %vm1440_vm13 }
 0x9f6   :  { %v1436_v1 = vsub.f32 1.0, %v1435_v22 }
 0x9f8   :  { %v1437_v3 = vmul.f32 %v2946_v58, %v1436_v1 }
 0x9fa   :  { %v1438_v5 = vadd.f32 %v2946_v58, %v1437_v3 }
 0x9fc   :  { %v1442_v2 = vsel %vm1441_vm15, %v2946_v58, %v1438_v5 }
 0x9fd   :  { %v1447_v32 = vsel %vm1444_vm1, %v1446_v60, %v1442_v2 }
 0x9fe   :  { %v1450_v27 = vmul.f32 %v1447_v32, %v3835_v55 }
 0xa15   :  { %v1544_v12 = vpop.permute.xlu0 %1543 }
 0xa16   :  { %v1546_v13 = vmul.f32 %v1544_v12, %v3990_v10  ;;  %v1541_v12 = vmul.f32 %v3990_v10, %v3820_v30 }
 0xa18   :  { %1548 = vrot.lane.b32.xlu1 %v1546_v13, %s3155_s22 }
 0xa27   :  { %v1287_v38 = vpop.permute.xlu2 %1286 }
 0xa28   :  { %v1289_v42 = vmul.f32 %v1287_v38, %v1281_v41 }
 0xa2a   :  { %1291 = vrot.lane.b32.xlu0 %v1289_v42, %s3155_s22 }
 0xa2f   :  { %v1710_v48 = vpop.permute.xlu2 %1709 }
 0xa30   :  { %v1712_v49 = vmul.f32 %v1710_v48, %v1704_v20  ;;  %v2161_v48 = vld [vmem:[%s4499_s7] sm:$0xff] }
 0xa32   :  { %1714 = vrot.lane.b32.xlu0 %v1712_v49, %s3155_s22 }
 0xa47   :  { %v1453_v46 = vpop.permute.xlu1 %1452 }
 0xa48   :  { %v1455_v33 = vmul.f32 %v1453_v46, %v1447_v32 }
 0xa4a   :  { %1457 = vrot.lane.b32.xlu2 %v1455_v33, %s3155_s22 }
 0xa8a   :  { %v1549_v13 = vpop.permute.xlu1 %1548 }
 0xa8b   :  { %v3999_v14 = vadd.f32 %v1549_v13, %v1541_v12 }
 0xa8d   :  { %2947 = vtanh.f32 %v3999_v14 }
 0xa93   :  { %v2948_v61 = vpop.eup %2947 }
 0xa94   :  { %1554 = vrot.lane.b32.xlu2 %v2948_v61, %s3154_s21 }
 0xa9c   :  { %v1292_v15 = vpop.permute.xlu0 %1291 }
 0xa9d   :  { %v4004_v16 = vadd.f32 %v1292_v15, %v1284_v59 }
 0xa9f   :  { %2949 = vtanh.f32 %v4004_v16 }
 0xaa4   :  { %v1458_v30 = vpop.permute.xlu2 %1457  ;;  %v1715_v19 = vpop.permute.xlu0 %1714 }
 0xaa5   :  { %v2950_v56 = vpop.eup %2949  ;;  %v4009_v57 = vadd.f32 %v1458_v30, %v1450_v27  ;;  %v4011_v47 = vadd.f32 %v1715_v19, %v1707_v18 }
 0xaa6   :  { %1297 = vrot.lane.b32.xlu1 %v2950_v56, %s3154_s21 }
 0xaa7   :  { %2951 = vtanh.f32 %v4009_v57 }
 0xaa8   :  { %2953 = vtanh.f32 %v4011_v47 }
 0xaad   :  { %v2952_v40 = vpop.eup %2951 }
 0xaae   :  { %v2954_v36 = vpop.eup %2953  ;;  %1463 = vrot.lane.b32.xlu0 %v2952_v40, %s3154_s21 }
 0xaaf   :  { %1720 = vrot.lane.b32.xlu1 %v2954_v36, %s3154_s21 }
 0xaee   :  { %v1555_v0 = vpop.permute.xlu2 %1554 }
 0xaef   :  { %v1557_v55 = vmul.f32 %v1555_v0, %v3990_v10  ;;  %v59_v10 = vld [vmem:[%s4492_s0 + $0x16] sm:$0x3] }
 0xaf0   :  { %2790 = vmatmul.msk.f32.vlgmr.msrb.gmra.mxu1 %vm96_vm0, %v59_v10 }
 0xaf1   :  { %1581 = vrot.lane.b32.xlu0 %v1557_v55, %s3155_s22 }
 0xb18   :  { %v1298_v11 = vpop.permute.xlu1 %1297 }
 0xb19   :  { %v1300_v63 = vmul.f32 %v1298_v11, %v1281_v41  ;;  %v2164_v41 = vld [vmem:[%s4499_s7 + $0x18] sm:$0xff] }
 0xb1a   :  { %2228 = vmatpush.msra.mxu1 %v2164_v41 }
 0xb1b   :  { %1468 = vrot.lane.b32.xlu2 %v1300_v63, %s3155_s22 }
 0xb1c   :  { %2229 = vmatpush.msra.mxu1 %v2163_v9 }
 0xb1e   :  { %2230 = vmatpush.msra.mxu1 %v2162_v50 }
 0xb20   :  { %v1464_v38 = vpop.permute.xlu0 %1463  ;;  %2231 = vmatpush.msra.mxu1 %v2161_v48 }
 0xb21   :  { %v1721_v42 = vpop.permute.xlu1 %1720  ;;  %v1466_v37 = vmul.f32 %v1464_v38, %v1447_v32 }
 0xb22   :  { %v1723_v43 = vmul.f32 %v1721_v42, %v1704_v20 }
 0xb23   :  { %1473 = vrot.lane.b32.xlu1 %v1466_v37, %s3155_s22 }
 0xb24   :  { %1747 = vrot.lane.b32.xlu2 %v1723_v43, %s3155_s22 }
 0xb63   :  { %v1582_v20 = vpop.permute.xlu0 %1581 }
 0xb64   :  { %2775 = vmatmul.msk.f32.vlgmr.msrb.gmra.mxu3 %vm96_vm0, %v1582_v20  ;;  %2783 = vmatmul.msk.f32.vlgmr.msra.gmra.mxu0 %vm96_vm0, %v1582_v20 }
 0xb65   :  { %1939 = vmatpush.msrb.mxu3 %v3857_v52 }
 0xb67   :  { %1940 = vmatpush.msrb.mxu3 %v3864_v35 }
 0xb69   :  { %1941 = vmatpush.msrb.mxu3 %v3871_v51  ;;  %v1859_v51 = vpop.f32.mrf.mxu1 }
 0xb6b   :  { %1942 = vmatpush.msrb.mxu3 %v3878_v8 }
 0xb75   :  { %v1469_v49 = vpop.permute.xlu2 %1468 }
 0xb76   :  { %1471 = vst.msk [vmem:[#allocation2 + $0x6] sm:$0x3] %vm444_vm10, %v1469_v49  ;;  %2774 = vmatmul.msk.f32.vlgmr.msrb.gmra.mxu2 %vm96_vm0, %v1469_v49 }
 0xb77   :  { %1914 = vmatpush.msrb.mxu2 %v3895_v45 }
 0xb79   :  { %1915 = vmatpush.msrb.mxu2 %v3901_v24 }
 0xb7b   :  { %1916 = vmatpush.msrb.mxu2 %v3907_v54 }
 0xb7d   :  { %v2177_v58 = vld [vmem:[#allocation2] sm:$0xff]  ;;  %1917 = vmatpush.msrb.mxu2 %v3913_v28 }
 0xb7e   :  { %v1748_v52 = vpop.permute.xlu2 %1747  ;;  %2797 = vmatmul.msk.f32.vlgmr.msra.gmra.mxu1 %vm96_vm0, %v2177_v58 }
 0xb7f   :  { %2781 = vmatmul.msk.f32.vlgmr.msra.gmra.mxu3 %vm96_vm0, %v1748_v52  ;;  %2789 = vmatmul.msk.f32.vlgmr.msrb.gmra.mxu0 %vm96_vm0, %v1748_v52 }
 0xb80   :  { %2105 = vmatpush.msra.mxu3 %v3923_v29 }
 0xb82   :  { %2106 = vmatpush.msra.mxu3 %v3936_v6 }
 0xb84   :  { %2107 = vmatpush.msra.mxu3 %v3949_v7 }
 0xb86   :  { %2108 = vmatpush.msra.mxu3 %v3962_v21 }
 0xb95   :  { %v1474_v35 = vpop.permute.xlu1 %1473 }
 0xb96   :  { %1476 = vst.msk [vmem:[#allocation3 + $0x4] sm:$0x3] %vm444_vm10, %v1474_v35  ;;  %2780 = vmatmul.msk.f32.vlgmr.msra.gmra.mxu2 %vm96_vm0, %v1474_v35 }
 0xb97   :  { %2080 = vmatpush.msra.mxu2 %v3930_v4 }
 0xb99   :  { %2081 = vmatpush.msra.mxu2 %v3943_v23  ;;  %v2025_v23 = vpop.f32.mrf.mxu1 }
 0xb9b   :  { %2082 = vmatpush.msra.mxu2 %v3956_v25 }
 0xb9d   :  { %2083 = vmatpush.msra.mxu2 %v3969_v26 }
 0xbe1   :  { %v1836_v8 = vpop.f32.mrf.mxu0 }
 0xbe2   :  { %v1860_v45 = vadd.f32 %v1859_v51, %v1836_v8 }
 0xbe4   :  { %v1862_v24 = vadd.f32 %v3796_v39, %v1860_v45 }
 0xbe6   :  { %2955 = vtanh.f32 %v1862_v24  ;;  %v2785_v62 = vmul.f32 -1.442695, %v1862_v24 }
 0xbe7   :  { %v1602_v28 = vpop.f32.mrf.mxu3 }
 0xbec   :  { %v2956_v54 = vpop.eup %2955 }
 0xbed   :  { %1885 = vrot.lane.b32.xlu1 %v2956_v54, %s3154_s21 }
 0xbf9   :  { %v1577_v29 = vpop.f32.mrf.mxu2 }
 0xbfa   :  { %v1603_v6 = vadd.f32 %v1602_v28, %v1577_v29 }
 0xbfc   :  { %v1605_v4 = vadd.f32 %v3977_v17, %v1603_v6  ;;  %v2002_v7 = vpop.f32.mrf.mxu0 }
 0xbfd   :  { %v2026_v25 = vadd.f32 %v2025_v23, %v2002_v7 }
 0xbfe   :  { %2957 = vtanh.f32 %v1605_v4  ;;  %v2776_v46 = vmul.f32 -1.442695, %v1605_v4 }
 0xbff   :  { %v2028_v21 = vadd.f32 %v3804_v34, %v2026_v25 }
 0xc01   :  { %2959 = vtanh.f32 %v2028_v21  ;;  %v2791_v12 = vmul.f32 -1.442695, %v2028_v21 }
 0xc02   :  { %v1768_v22 = vpop.f32.mrf.mxu3 }
 0xc04   :  { %v2958_v26 = vpop.eup %2957 }
 0xc05   :  { %1628 = vrot.lane.b32.xlu0 %v2958_v26, %s3154_s21 }
 0xc07   :  { %v2960_v39 = vpop.eup %2959 }
 0xc0d   :  { %2051 = vrot.lane.b32.xlu0 %v2960_v39, %s3154_s21 }
 0xc19   :  { %v1743_v1 = vpop.f32.mrf.mxu2 }
 0xc1a   :  { %v1769_v3 = vadd.f32 %v1768_v22, %v1743_v1 }
 0xc1c   :  { %v1771_v5 = vadd.f32 %v3984_v31, %v1769_v3 }
 0xc1e   :  { %2961 = vtanh.f32 %v1771_v5  ;;  %v2782_v13 = vmul.f32 -1.442695, %v1771_v5 }
 0xc1f   :  { %2963 = vpow2.f32 %v2785_v62 }
 0xc24   :  { %v2962_v53 = vpop.eup %2961 }
 0xc25   :  { %1794 = vrot.lane.b32.xlu2 %v2962_v53, %s3154_s21  ;;  %v2964_v2 = vpop.eup %2963 }
 0xc26   :  { %v1866_v34 = vadd.f32 1.0, %v2964_v2 }
 0xc28   :  { %2965 = vrcp.f32 %v1866_v34  ;;  %v1878_v18 = vand.u32 2147483648, %v1866_v34  ;;  %vm1872_vm3 = vweird.f32 %v1866_v34  ;;  %v1876_v30 = vand.u32 2147483647, %v1866_v34 }
 0xc29   :  { %2967 = vpow2.f32 %v2776_v46 }
 0xc2a   :  { %2969 = vpow2.f32 %v2791_v12  ;;  %v1879_v36 = vor.u32 1.1754944e-38, %v1878_v18  ;;  %vm1877_vm5 = vcmp.eq.f32.partialorder %v1876_v30, 8.507059e+37 }
 0xc2b   :  { %2971 = vpow2.f32 %v2782_v13 }
 0xc2e   :  { %v2966_v60 = vpop.eup %2965 }
 0xc2f   :  { %v1868_v32 = vmul.f32 %v2966_v60, %v1866_v34  ;;  %v2968_v61 = vpop.eup %2967  ;;  %vm1873_vm2 = vweird.f32 %v2966_v60 }
 0xc30   :  { %v1609_v15 = vadd.f32 1.0, %v2968_v61  ;;  %v2970_v19 = vpop.eup %2969  ;;  %vm1874_vm4 = vmor %vm1872_vm3, %vm1873_vm2 }
 0xc31   :  { %v1869_v33 = vsub.f32 1.0, %v1868_v32  ;;  %v2972_v56 = vpop.eup %2971  ;;  %v2032_v0 = vadd.f32 1.0, %v2970_v19 }
 0xc32   :  { %2973 = vrcp.f32 %v1609_v15  ;;  %v1775_v55 = vadd.f32 1.0, %v2972_v56  ;;  %v1621_v58 = vand.u32 2147483648, %v1609_v15  ;;  %vm1615_vm7 = vweird.f32 %v1609_v15 }
 0xc33   :  { %v1870_v59 = vmul.f32 %v2966_v60, %v1869_v33  ;;  %2975 = vrcp.f32 %v2032_v0  ;;  %v1619_v52 = vand.u32 2147483647, %v1609_v15  ;;  %vm2038_vm13 = vweird.f32 %v2032_v0 }
 0xc34   :  { %2977 = vrcp.f32 %v1775_v55  ;;  %v1622_v45 = vor.u32 1.1754944e-38, %v1621_v58  ;;  %v1787_v4 = vand.u32 2147483648, %v1775_v55  ;;  %v2044_v7 = vand.u32 2147483648, %v2032_v0 }
 0xc35   :  { %v1871_v27 = vadd.f32 %v2966_v60, %v1870_v59  ;;  %vm1620_vm9 = vcmp.eq.f32.partialorder %v1619_v52, 8.507059e+37  ;;  %vm1781_vm14 = vweird.f32 %v1775_v55  ;;  %v1785_v23 = vand.u32 2147483647, %v1775_v55 }
 0xc36   :  { %v2042_v25 = vand.u32 2147483647, %v2032_v0  ;;  %v1788_v39 = vor.u32 1.1754944e-38, %v1787_v4  ;;  %v2045_v22 = vor.u32 1.1754944e-38, %v2044_v7 }
 0xc37   :  { %v1875_v40 = vsel %vm1874_vm4, %v2966_v60, %v1871_v27  ;;  %vm1786_vm2 = vcmp.eq.f32.partialorder %v1785_v23, 8.507059e+37 }
 0xc38   :  { %v4076_v63 = vsel %vm1877_vm5, %v1879_v36, %v1875_v40  ;;  %v2974_v42 = vpop.eup %2973  ;;  %vm2043_vm3 = vcmp.eq.f32.partialorder %v2042_v25, 8.507059e+37 }
 0xc39   :  { %v1611_v37 = vmul.f32 %v2974_v42, %v1609_v15  ;;  %v2976_v43 = vpop.eup %2975  ;;  %vm1616_vm6 = vweird.f32 %v2974_v42  ;;  %v1883_v34 = vmul.f32 %v4076_v63, %v3999_v14 }
 0xc3a   :  { %v2978_v10 = vpop.eup %2977  ;;  %v2034_v50 = vmul.f32 %v2976_v43, %v2032_v0  ;;  %vm1617_vm8 = vmor %vm1615_vm7, %vm1616_vm6  ;;  %vm2039_vm11 = vweird.f32 %v2976_v43 }
 0xc3b   :  { %v1612_v44 = vsub.f32 1.0, %v1611_v37  ;;  %v1777_v9 = vmul.f32 %v2978_v10, %v1775_v55  ;;  %vm1782_vm12 = vweird.f32 %v2978_v10  ;;  %vm2040_vm15 = vmor %vm2038_vm13, %vm2039_vm11  ;;  %vm2308_vm13 = vcmask 257024  }
 0xc3c   :  { %v2035_v49 = vsub.f32 1.0, %v2034_v50  ;;  %vm1783_vm1 = vmor %vm1781_vm14, %vm1782_vm12  ;;  %vm2673_vm14 = vcmask 1041409  }
 0xc3d   :  { %v1613_v41 = vmul.f32 %v2974_v42, %v1612_v44  ;;  %v1778_v20 = vsub.f32 1.0, %v1777_v9 }
 0xc3e   :  { %v2036_v8 = vmul.f32 %v2976_v43, %v2035_v49 }
 0xc3f   :  { %v1614_v48 = vadd.f32 %v2974_v42, %v1613_v41  ;;  %v1779_v51 = vmul.f32 %v2978_v10, %v1778_v20 }
 0xc40   :  { %v2037_v6 = vadd.f32 %v2976_v43, %v2036_v8 }
 0xc41   :  { %v1618_v35 = vsel %vm1617_vm8, %v2974_v42, %v1614_v48  ;;  %v1780_v29 = vadd.f32 %v2978_v10, %v1779_v51 }
 0xc42   :  { %v1623_v54 = vsel %vm1620_vm9, %v1622_v45, %v1618_v35  ;;  %v2041_v26 = vsel %vm2040_vm15, %v2976_v43, %v2037_v6  ;;  %vm2675_vm15 = vcmask 1042434  }
 0xc43   :  { %v1784_v21 = vsel %vm1783_vm1, %v2978_v10, %v1780_v29  ;;  %v2046_v5 = vsel %vm2043_vm3, %v2045_v22, %v2041_v26  ;;  %v1626_v33 = vmul.f32 %v1623_v54, %v4004_v16  ;;  %vm2677_vm1 = vcmask 1043459  }
 0xc44   :  { %v1789_v3 = vsel %vm1786_vm2, %v1788_v39, %v1784_v21  ;;  %v2049_v59 = vmul.f32 %v2046_v5, %v4011_v47  ;;  %vm2694_vm2 = vcmask 91136   ;;  %vm2679_vm3 = vcmask 1044484  }
 0xc45   :  { %v1792_v61 = vmul.f32 %v1789_v3, %v4009_v57 }
 0xc5f   :  { %v1886_v11 = vpop.permute.xlu1 %1885 }
 0xc60   :  { %v1888_v38 = vmul.f32 %v1886_v11, %v4076_v63 }
 0xc62   :  { %1890 = vrot.lane.b32.xlu2 %v1888_v38, %s3155_s22 }
 0xc77   :  { %v1629_v24 = vpop.permute.xlu0 %1628 }
 0xc78   :  { %v1631_v28 = vmul.f32 %v1629_v24, %v1623_v54 }
 0xc7a   :  { %1633 = vrot.lane.b32.xlu1 %v1631_v28, %s3155_s22 }
 0xc7f   :  { %v1795_v1 = vpop.permute.xlu2 %1794  ;;  %v2052_v53 = vpop.permute.xlu0 %2051 }
 0xc80   :  { %v1797_v62 = vmul.f32 %v1795_v1, %v1789_v3  ;;  %v2054_v2 = vmul.f32 %v2052_v53, %v2046_v5 }
 0xc82   :  { %1799 = vrot.lane.b32.xlu0 %v1797_v62, %s3155_s22  ;;  %2056 = vrot.lane.b32.xlu1 %v2054_v2, %s3155_s22 }
 0xcbc   :  { %v1891_v60 = vpop.permute.xlu2 %1890 }
 0xcbd   :  { %v1893_v46 = vadd.f32 %v1891_v60, %v1883_v34 }
 0xcbf   :  { %2979 = vtanh.f32 %v1893_v46 }
 0xcc5   :  { %v2980_v32 = vpop.eup %2979 }
 0xcc6   :  { %1896 = vrot.lane.b32.xlu0 %v2980_v32, %s3154_s21 }
 0xcec   :  { %v1634_v12 = vpop.permute.xlu1 %1633 }
 0xced   :  { %v4087_v13 = vadd.f32 %v1634_v12, %v1626_v33 }
 0xcef   :  { %2981 = vtanh.f32 %v4087_v13 }
 0xcf4   :  { %v1800_v15 = vpop.permute.xlu0 %1799  ;;  %v2057_v27 = vpop.permute.xlu1 %2056 }
 0xcf5   :  { %v2982_v14 = vpop.eup %2981  ;;  %v4092_v18 = vadd.f32 %v1800_v15, %v1792_v61  ;;  %v2059_v30 = vadd.f32 %v2057_v27, %v2049_v59 }
 0xcf6   :  { %1639 = vrot.lane.b32.xlu2 %v2982_v14, %s3154_s21 }
 0xcf7   :  { %2983 = vtanh.f32 %v4092_v18 }
 0xcf8   :  { %2985 = vtanh.f32 %v2059_v30 }
 0xcfd   :  { %v2984_v16 = vpop.eup %2983 }
 0xcfe   :  { %v2986_v19 = vpop.eup %2985  ;;  %1805 = vrot.lane.b32.xlu1 %v2984_v16, %s3154_s21 }
 0xcff   :  { %2062 = vrot.lane.b32.xlu2 %v2986_v19, %s3154_s21 }
 0xd38   :  { %v1897_v57 = vpop.permute.xlu0 %1896 }
 0xd39   :  { %v1899_v47 = vmul.f32 %v1897_v57, %v4076_v63 }
 0xd3b   :  { %1923 = vrot.lane.b32.xlu1 %v1899_v47, %s3155_s22 }
 0xd50   :  { %v1640_v56 = vpop.permute.xlu2 %1639 }
 0xd51   :  { %v1642_v40 = vmul.f32 %v1640_v56, %v1623_v54  ;;  %v2167_v56 = vld [vmem:[%s4500_s8 + $0x10] sm:$0xff] }
 0xd53   :  { %1810 = vrot.lane.b32.xlu0 %v1642_v40, %s3155_s22  ;;  %v2166_v40 = vld [vmem:[%s4500_s8 + $0x8] sm:$0xff] }
 0xd59   :  { %v2063_v36 = vpop.permute.xlu2 %2062 }
 0xd5a   :  { %v2065_v0 = vmul.f32 %v2063_v36, %v2046_v5  ;;  %v2165_v36 = vld [vmem:[%s4500_s8] sm:$0xff] }
 0xd5c   :  { %2089 = vrot.lane.b32.xlu0 %v2065_v0, %s3155_s22 }
 0xd70   :  { %v1806_v55 = vpop.permute.xlu1 %1805 }
 0xd71   :  { %v1808_v11 = vmul.f32 %v1806_v55, %v1789_v3 }
 0xd73   :  { %1815 = vrot.lane.b32.xlu2 %v1808_v11, %s3155_s22 }
 0xdad   :  { %v1924_v38 = vpop.permute.xlu1 %1923 }
 0xdae   :  { %2787 = vmatmul.msk.f32.vlgmr.msrb.gmra.mxu3 %vm96_vm0, %v1924_v38  ;;  %v2180_v38 = vld [vmem:[#allocation3 + $0x8] sm:$0xf] }
 0xdc5   :  { %v1811_v42 = vpop.permute.xlu0 %1810 }
 0xdc6   :  { %1813 = vst.msk [vmem:[#allocation2 + $0x8] sm:$0x3] %vm444_vm10, %v1811_v42  ;;  %2786 = vmatmul.msk.f32.vlgmr.msrb.gmra.mxu2 %vm96_vm0, %v1811_v42  ;;  %v2176_v42 = vld [vmem:[%s4502_s10 + $0x38] sm:$0xff] }
 0xdc7   :  { %2266 = vmatpush.msrb.mxu2 %v2176_v42 }
 0xdcd   :  { %v1816_v63 = vpop.permute.xlu2 %1815 }
 0xdce   :  { %v2090_v37 = vpop.permute.xlu0 %2089  ;;  %1818 = vst.msk [vmem:[#allocation3 + $0x2] sm:$0x3] %vm444_vm10, %v1816_v63  ;;  %2792 = vmatmul.msk.f32.vlgmr.msra.gmra.mxu2 %vm96_vm0, %v1816_v63  ;;  %v2175_v63 = vld [vmem:[%s4502_s10 + $0x30] sm:$0xff] }
 0xdcf   :  { %2793 = vmatmul.msk.f32.vlgmr.msra.gmra.mxu3 %vm96_vm0, %v2090_v37  ;;  %v2174_v37 = vld [vmem:[%s4502_s10 + $0x28] sm:$0xff]  ;;  %2267 = vmatpush.msrb.mxu2 %v2175_v63 }
 0xdd1   :  { %2268 = vmatpush.msrb.mxu2 %v2174_v37 }
 0xe31   :  { %v1944_v43 = vpop.f32.mrf.mxu3 }
 0xe49   :  { %v1919_v44 = vpop.f32.mrf.mxu2 }
 0xe4a   :  { %v1945_v10 = vadd.f32 %v1944_v43, %v1919_v44  ;;  %v2173_v43 = vld [vmem:[%s4502_s10 + $0x20] sm:$0xff]  ;;  %v2172_v44 = vld [vmem:[%s4502_s10 + $0x18] sm:$0xff] }
 0xe4b   :  { %2269 = vmatpush.msrb.mxu2 %v2173_v43 }
 0xe4c   :  { %v1947_v41 = vadd.f32 %v3977_v17, %v1945_v10  ;;  %v2171_v10 = vld [vmem:[%s4502_s10 + $0x10] sm:$0xff] }
 0xe4d   :  { %2270 = vmatpush.msrb.mxu2 %v2172_v44 }
 0xe4e   :  { %2987 = vtanh.f32 %v1947_v41  ;;  %v2788_v52 = vmul.f32 -1.442695, %v1947_v41  ;;  %v2170_v41 = vld [vmem:[%s4502_s10 + $0x8] sm:$0xff] }
 0xe4f   :  { %2271 = vmatpush.msrb.mxu2 %v2171_v10  ;;  %v2300_v10 = vld [vmem:[%s4505_s13 + $0x88] sm:$0xf] }
 0xe51   :  { %v2085_v9 = vpop.f32.mrf.mxu2  ;;  %2272 = vmatpush.msrb.mxu2 %v2170_v41  ;;  %v2302_v41 = vld [vmem:[%s4505_s13 + $0x98] sm:$0xf] }
 0xe52   :  { %v2110_v50 = vpop.f32.mrf.mxu3 }
 0xe53   :  { %v2111_v48 = vadd.f32 %v2110_v50, %v2085_v9  ;;  %v2169_v9 = vld [vmem:[%s4502_s10] sm:$0xff] }
 0xe54   :  { %v2988_v20 = vpop.eup %2987  ;;  %2273 = vmatpush.msrb.mxu2 %v2169_v9  ;;  %v2809_v50 = vld [vmem:[%s4501_s9] ss:$0 sm:$0xff]  ;;  %v2296_v9 = vld [vmem:[%s4505_s13 + $0x68] sm:$0xf] }
 0xe55   :  { %v2113_v49 = vadd.f32 %v3984_v31, %v2111_v48  ;;  %1970 = vrot.lane.b32.xlu2 %v2988_v20, %s3154_s21  ;;  %v2233_v48 = vpop.f32.mrf.mxu1 }
 0xe57   :  { %2989 = vtanh.f32 %v2113_v49  ;;  %v2794_v24 = vmul.f32 -1.442695, %v2113_v49 }
 0xe58   :  { %2991 = vpow2.f32 %v2788_v52 }
 0xe5d   :  { %v2990_v58 = vpop.eup %2989 }
 0xe5e   :  { %2136 = vrot.lane.b32.xlu1 %v2990_v58, %s3154_s21  ;;  %v2992_v35 = vpop.eup %2991 }
 0xe5f   :  { %v1951_v51 = vadd.f32 1.0, %v2992_v35 }
 0xe61   :  { %2993 = vrcp.f32 %v1951_v51  ;;  %v1963_v31 = vand.u32 2147483648, %v1951_v51  ;;  %vm1957_vm5 = vweird.f32 %v1951_v51  ;;  %v1961_v29 = vand.u32 2147483647, %v1951_v51 }
 0xe62   :  { %2995 = vpow2.f32 %v2794_v24  ;;  %v2810_v24 = vld [vmem:[%s4503_s11] ss:$0 sm:$0xff] }
 0xe63   :  { %v1964_v7 = vor.u32 1.1754944e-38, %v1963_v31  ;;  %vm1962_vm7 = vcmp.eq.f32.partialorder %v1961_v29, 8.507059e+37  ;;  %v2285_v31 = vld [vmem:[%s4505_s13 + $0x10] sm:$0xff]  ;;  %v2283_v29 = vld [vmem:[%s4505_s13] sm:$0xff] }
 0xe67   :  { %v2994_v8 = vpop.eup %2993 }
 0xe68   :  { %v1953_v17 = vmul.f32 %v2994_v8, %v1951_v51  ;;  %vm1958_vm4 = vweird.f32 %v2994_v8  ;;  %v2996_v4 = vpop.eup %2995 }
 0xe69   :  { %vm1959_vm6 = vmor %vm1957_vm5, %vm1958_vm4  ;;  %v2117_v21 = vadd.f32 1.0, %v2996_v4  ;;  %vm2681_vm4 = vcmask 1045509   ;;  %vm2683_vm5 = vcmask 1046534  }
 0xe6a   :  { %v1954_v45 = vsub.f32 1.0, %v1953_v17 }
 0xe6b   :  { %2997 = vrcp.f32 %v2117_v21  ;;  %v2129_v53 = vand.u32 2147483648, %v2117_v21  ;;  %vm2123_vm9 = vweird.f32 %v2117_v21  ;;  %v2127_v62 = vand.u32 2147483647, %v2117_v21 }
 0xe6c   :  { %v1955_v54 = vmul.f32 %v2994_v8, %v1954_v45 }
 0xe6d   :  { %v2130_v34 = vor.u32 1.1754944e-38, %v2129_v53  ;;  %vm2128_vm12 = vcmp.eq.f32.partialorder %v2127_v62, 8.507059e+37 }
 0xe6e   :  { %v1956_v28 = vadd.f32 %v2994_v8, %v1955_v54 }
 0xe70   :  { %v1960_v6 = vsel %vm1959_vm6, %v2994_v8, %v1956_v28  ;;  %v2291_v28 = vld [vmem:[%s4505_s13 + $0x40] sm:$0xff]  ;;  %vm2685_vm6 = vcmask 1047559  }
 0xe71   :  { %v1965_v23 = vsel %vm1962_vm7, %v1964_v7, %v1960_v6  ;;  %v2998_v39 = vpop.eup %2997  ;;  %vm2690_vm7 = vcmask 97280  }
 0xe72   :  { %v2119_v22 = vmul.f32 %v2998_v39, %v2117_v21  ;;  %vm2124_vm8 = vweird.f32 %v2998_v39  ;;  %v1968_v33 = vmul.f32 %v1965_v23, %v4087_v13 }
 0xe73   :  { %vm2125_vm11 = vmor %vm2123_vm9, %vm2124_vm8  ;;  %vm2410_vm8 = vcmask 1043456   ;;  %vm2698_vm9 = vcmask 1041408  }
 0xe74   :  { %v2120_v1 = vsub.f32 1.0, %v2119_v22  ;;  %v2289_v22 = vld [vmem:[%s4505_s13 + $0x30] sm:$0xff] }
 0xe76   :  { %v2121_v3 = vmul.f32 %v2998_v39, %v2120_v1  ;;  %v2287_v1 = vld [vmem:[%s4505_s13 + $0x20] sm:$0xff] }
 0xe78   :  { %v2122_v5 = vadd.f32 %v2998_v39, %v2121_v3 }
 0xe7a   :  { %v2126_v2 = vsel %vm2125_vm11, %v2998_v39, %v2122_v5  ;;  %v2299_v39 = vld [vmem:[%s4505_s13 + $0x80] sm:$0xff]  ;;  %vm2709_vm11 = vcmask 0  }
 0xe7b   :  { %v2131_v46 = vsel %vm2128_vm12, %v2130_v34, %v2126_v2 }
 0xe7c   :  { %v2134_v15 = vmul.f32 %v2131_v46, %v4092_v18  ;;  %v2168_v18 = vld [vmem:[%s4500_s8 + $0x18] sm:$0xff] }
 0xe7d   :  { %2199 = vmatpush.msra.mxu0 %v2168_v18 }
 0xe7f   :  { %2200 = vmatpush.msra.mxu0 %v2167_v56 }
 0xe81   :  { %2201 = vmatpush.msra.mxu0 %v2166_v40 }
 0xe83   :  { %2202 = vmatpush.msra.mxu0 %v2165_v36 }
 0xeaf   :  { %v1971_v25 = vpop.permute.xlu2 %1970 }
 0xeb0   :  { %v1973_v26 = vmul.f32 %v1971_v25, %v1965_v23 }
 0xeb2   :  { %1975 = vrot.lane.b32.xlu1 %v1973_v26, %s3155_s22 }
 0xed0   :  { %v2137_v60 = vpop.permute.xlu1 %2136 }
 0xed1   :  { %v2139_v32 = vmul.f32 %v2137_v60, %v2131_v46 }
 0xed3   :  { %2141 = vrot.lane.b32.xlu0 %v2139_v32, %s3155_s22  ;;  %v2295_v32 = vld [vmem:[%s4505_s13 + $0x60] sm:$0xff] }
 0xf24   :  { %v1976_v12 = vpop.permute.xlu1 %1975 }
 0xf25   :  { %v1978_v61 = vadd.f32 %v1976_v12, %v1968_v33  ;;  %v2284_v33 = vld [vmem:[%s4505_s13 + $0x8] sm:$0xf]  ;;  %v2293_v12 = vld [vmem:[%s4505_s13 + $0x50] sm:$0xff] }
 0xf27   :  { %2999 = vtanh.f32 %v1978_v61 }
 0xf2d   :  { %v3000_v59 = vpop.eup %2999 }
 0xf2e   :  { %1981 = vrot.lane.b32.xlu0 %v3000_v59, %s3154_s21 }
 0xf45   :  { %v2142_v27 = vpop.permute.xlu0 %2141 }
 0xf46   :  { %v2144_v14 = vadd.f32 %v2142_v27, %v2134_v15 }
 0xf48   :  { %3001 = vtanh.f32 %v2144_v14 }
 0xf4e   :  { %v3002_v30 = vpop.eup %3001 }
 0xf4f   :  { %2147 = vrot.lane.b32.xlu2 %v3002_v30, %s3154_s21 }
 0xfa0   :  { %v1982_v16 = vpop.permute.xlu0 %1981 }
 0xfa1   :  { %v1984_v19 = vmul.f32 %v1982_v16, %v1965_v23  ;;  %v2286_v16 = vld [vmem:[%s4505_s13 + $0x18] sm:$0xf] }
 0xfa3   :  { %2152 = vrot.lane.b32.xlu2 %v1984_v19, %s3155_s22  ;;  %v2288_v19 = vld [vmem:[%s4505_s13 + $0x28] sm:$0xf] }
 0xfa9   :  { %v2148_v57 = vpop.permute.xlu2 %2147 }
 0xfaa   :  { %v2150_v13 = vmul.f32 %v2148_v57, %v2131_v46  ;;  %v2301_v57 = vld [vmem:[%s4505_s13 + $0x90] sm:$0xff] }
 0xfac   :  { %2157 = vrot.lane.b32.xlu1 %v2150_v13, %s3155_s22 }
 0xffd   :  { %v2153_v47 = vpop.permute.xlu2 %2152 }
 0xffe   :  { %2155 = vst.msk [vmem:[#allocation2 + $0xa] sm:$0x3] %vm444_vm10, %v2153_v47 }
0x1005   :  { %v2178_v0 = vld [vmem:[#allocation2 + $0x8] sm:$0xf] }
0x1006   :  { %2798 = vmatmul.msk.f32.gmra.mxu1 %vm96_vm0, %v2178_v0  ;;  %v2292_v0 = vld [vmem:[%s4505_s13 + $0x48] sm:$0xf] }
0x101e   :  { %v2158_v55 = vpop.permute.xlu1 %2157 }
0x101f   :  { %2160 = vst.msk [vmem:[#allocation3] sm:$0x3] %vm444_vm10, %v2158_v55  ;;  %vm2251_vm10 = vcmask 523264   ;;  %v2294_v55 = vld [vmem:[%s4505_s13 + $0x58] sm:$0xf] }
0x1026   :  { %v2179_v11 = vld [vmem:[#allocation3] sm:$0xff] }
0x1027   :  { %2795 = vmatmul.msk.f32.vlgmr.msra.gmra.mxu0 %vm96_vm0, %v2179_v11  ;;  %v2290_v11 = vld [vmem:[%s4505_s13 + $0x38] sm:$0xf] }
0x102f   :  { %2796 = vmatmul.msk.f32.gmra.mxu0 %vm96_vm0, %v2180_v38 }
0x1083   :  { %v2236_v35 = vpop.f32.mrf.mxu1 }
0x10a4   :  { %v2204_v20 = vpop.f32.mrf.mxu0 }
0x10a5   :  { %v2234_v49 = vadd.f32 %v2233_v48, %v2204_v20 }
0x10a7   :  { %v2243_v58 = vadd.f32 %v2809_v50, %v2234_v49 }
0x10a9   :  { %v2245_v52 = vmax.f32 %v2243_v58, 0.0 }
0x10ab   :  { %2799 = vmatmul.msk.f32.vlgmr.msrb.gmra.mxu2 %vm2251_vm10, %v2245_v52 }
0x10ac   :  { %v2207_v51 = vpop.f32.mrf.mxu0 }
0x10ad   :  { %v2237_v8 = vadd.f32 %v2236_v35, %v2207_v51  ;;  %v2297_v35 = vld [vmem:[%s4505_s13 + $0x70] sm:$0xff]  ;;  %v2282_v51 = vld [vmem:[%s4504_s12 + $0x8] sm:$0xf] }
0x10af   :  { %v2244_v17 = vadd.f32 %v2809_v50, %v2237_v8  ;;  %v2298_v8 = vld [vmem:[%s4505_s13 + $0x78] sm:$0xf] }
0x10b1   :  { %v2246_v45 = vmax.f32 %v2244_v17, 0.0 }
0x10b3   :  { %2800 = vmatmul.msk.f32.gmra.mxu2 %vm2251_vm10, %v2246_v45 }
0x112e   :  { %v2275_v54 = vpop.f32.mrf.mxu2 }
0x112f   :  { %v4177_v6 = vadd.f32 %v2810_v24, %v2275_v54 }
0x1131   :  { %v2320_v4 = vmul.f32 %v2291_v28, %v4177_v6  ;;  %v2314_v7 = vmul.f32 %v2285_v31, %v4177_v6  ;;  %v2312_v23 = vmul.f32 %v2283_v29, %v4177_v6  ;;  %v2328_v3 = vmul.f32 %v2299_v39, %v4177_v6  ;;  %v2281_v29 = vld [vmem:[%s4504_s12] sm:$0xff]  ;;  %s3156_s12 = smov [#allocation4]  }
0x1132   :  { %v2318_v5 = vmul.f32 %v2289_v22, %v4177_v6  ;;  %v2316_v62 = vmul.f32 %v2287_v1, %v4177_v6  ;;  %v2324_v61 = vmul.f32 %v2295_v32, %v4177_v6  ;;  %v2322_v15 = vmul.f32 %v2293_v12, %v4177_v6  ;;  %s2716_s13 = sshll.u32 %s3156_s12, 4  ;;  %s2717_s13 = int_to_ptr.vmem [resolvable:$true] %s2716_s13 }
0x1133   :  { %v2356_v25 = vsel %vm96_vm0, %v2320_v4, 0.0  ;;  %v2338_v21 = vsel %vm96_vm0, %v2314_v7, 0.0  ;;  %v2332_v26 = vsel %vm96_vm0, %v2312_v23, 0.0  ;;  %v2380_v34 = vsel %vm96_vm0, %v2328_v3, 0.0 }
0x1134   :  { %2357 = vadd.xlane.f32.xlu1 %v2356_v25  ;;  %2339 = vadd.xlane.f32.xlu2 %v2338_v21  ;;  %v2350_v60 = vsel %vm96_vm0, %v2318_v5, 0.0  ;;  %v2344_v46 = vsel %vm96_vm0, %v2316_v62, 0.0  ;;  %v2368_v27 = vsel %vm96_vm0, %v2324_v61, 0.0  ;;  %v2362_v30 = vsel %vm96_vm0, %v2322_v15, 0.0 }
0x1135   :  { %2333 = vadd.xlane.f32.xlu0 %v2332_v26  ;;  %v2330_v18 = vmul.f32 %v2301_v57, %v4177_v6  ;;  %v2326_v17 = vmul.f32 %v2297_v35, %v4177_v6  ;;  %v2303_v4 = vmul.f32 %v2281_v29, %v4177_v6 }
0x1136   :  { %v2278_v53 = vpop.f32.mrf.mxu2 }
0x1137   :  { %v2279_v2 = vadd.f32 %v2810_v24, %v2278_v53  ;;  %v2386_v36 = vsel %vm96_vm0, %v2330_v18, 0.0  ;;  %v2374_v54 = vsel %vm96_vm0, %v2326_v17, 0.0  ;;  %v2305_v7 = vsel %vm96_vm0, %v2303_v4, 0.0 }
0x1138   :  { %vm2644_vm0 = vcmask 130112  }
0x1139   :  { %v2313_v59 = vmul.f32 %v2284_v33, %v2279_v2  ;;  %v2315_v13 = vmul.f32 %v2286_v16, %v2279_v2  ;;  %v2317_v47 = vmul.f32 %v2288_v19, %v2279_v2  ;;  %v2321_v38 = vmul.f32 %v2292_v0, %v2279_v2 }
0x113a   :  { %v2323_v42 = vmul.f32 %v2294_v55, %v2279_v2  ;;  %v2319_v63 = vmul.f32 %v2290_v11, %v2279_v2  ;;  %v2329_v50 = vmul.f32 %v2300_v10, %v2279_v2  ;;  %v2331_v48 = vmul.f32 %v2302_v41, %v2279_v2 }
0x113b   :  { %v2335_v14 = vsel %vm2308_vm13, %v2313_v59, 0.0  ;;  %v2341_v56 = vsel %vm2308_vm13, %v2315_v13, 0.0  ;;  %v2347_v40 = vsel %vm2308_vm13, %v2317_v47, 0.0  ;;  %v2359_v37 = vsel %vm2308_vm13, %v2321_v38, 0.0 }
0x113c   :  { %2381 = vadd.xlane.f32.xlu1 %v2380_v34  ;;  %2351 = vadd.xlane.f32.xlu2 %v2350_v60  ;;  %v2365_v43 = vsel %vm2308_vm13, %v2323_v42, 0.0  ;;  %v2353_v44 = vsel %vm2308_vm13, %v2319_v63, 0.0  ;;  %v2325_v20 = vmul.f32 %v2296_v9, %v2279_v2  ;;  %v2383_v49 = vsel %vm2308_vm13, %v2329_v50, 0.0 }
0x113d   :  { %2345 = vadd.xlane.f32.xlu0 %v2344_v46  ;;  %v2389_v58 = vsel %vm2308_vm13, %v2331_v48, 0.0  ;;  %v2304_v45 = vmul.f32 %v2282_v51, %v2279_v2  ;;  %v2327_v24 = vmul.f32 %v2298_v8, %v2279_v2 }
0x113e   :  { %v2371_v52 = vsel %vm2308_vm13, %v2325_v20, 0.0 }
0x113f   :  { %v2309_v28 = vsel %vm2308_vm13, %v2304_v45, 0.0  ;;  %v2377_v31 = vsel %vm2308_vm13, %v2327_v24, 0.0 }
0x1144   :  { %2369 = vadd.xlane.f32.xlu2 %v2368_v27  ;;  %2336 = vadd.xlane.f32.xlu1 %v2335_v14 }
0x1145   :  { %2363 = vadd.xlane.f32.xlu0 %v2362_v30 }
0x114c   :  { %2342 = vadd.xlane.f32.xlu2 %v2341_v56  ;;  %2348 = vadd.xlane.f32.xlu1 %v2347_v40 }
0x114d   :  { %2387 = vadd.xlane.f32.xlu0 %v2386_v36 }
0x1154   :  { %2360 = vadd.xlane.f32.xlu2 %v2359_v37  ;;  %2366 = vadd.xlane.f32.xlu1 %v2365_v43 }
0x1155   :  { %2354 = vadd.xlane.f32.xlu0 %v2353_v44 }
0x115c   :  { %2384 = vadd.xlane.f32.xlu2 %v2383_v49  ;;  %2390 = vadd.xlane.f32.xlu1 %v2389_v58 }
0x115d   :  { %2372 = vadd.xlane.f32.xlu0 %v2371_v52 }
0x1164   :  { %2375 = vadd.xlane.f32.xlu2 %v2374_v54  ;;  %2310 = vadd.xlane.f32.xlu1 %v2309_v28 }
0x1165   :  { %2378 = vadd.xlane.f32.xlu0 %v2377_v31 }
0x116c   :  { %2306 = vadd.xlane.f32.xlu2 %v2305_v7 }
0x11a7   :  { %v4269_v23 = vpop.xlane.xlu1 %2357  ;;  %v4271_v25 = vpop.xlane.xlu2 %2339 }
0x11a8   :  { %v2427_v21 = vsub.f32 0.0, %v4269_v23  ;;  %v4274_v26 = vpop.xlane.xlu0 %2333  ;;  %v2421_v1 = vsub.f32 0.0, %v4271_v25 }
0x11a9   :  { %v2419_v22 = vsub.f32 0.0, %v4274_v26 }
0x11aa   :  { %v2467_v39 = vand.u32 2147483647, %v2427_v21  ;;  %v2461_v2 = vand.u32 2147483647, %v2421_v1 }
0x11ab   :  { %v2459_v53 = vand.u32 2147483647, %v2419_v22 }
0x11ac   :  { %v2487_v5 = vsub.f32 0.0, %v2467_v39  ;;  %v2481_v32 = vsub.f32 0.0, %v2461_v2  ;;  %v2639_v39 = vlaneseq }
0x11ad   :  { %v2479_v46 = vsub.f32 0.0, %v2459_v53 }
0x11ae   :  { %v2515_v60 = vmul.f32 1.442695, %v2487_v5  ;;  %v2503_v30 = vmul.f32 1.442695, %v2481_v32 }
0x11af   :  { %v4280_v3 = vpop.xlane.xlu1 %2381  ;;  %v4282_v6 = vpop.xlane.xlu2 %2351  ;;  %v2499_v15 = vmul.f32 1.442695, %v2479_v46 }
0x11b0   :  { %v4286_v62 = vpop.xlane.xlu0 %2345  ;;  %v2435_v34 = vsub.f32 0.0, %v4280_v3  ;;  %3003 = vpow2.f32 %v2515_v60  ;;  %v2425_v14 = vsub.f32 0.0, %v4282_v6 }
0x11b1   :  { %v2423_v12 = vsub.f32 0.0, %v4286_v62  ;;  %3005 = vpow2.f32 %v2499_v15 }
0x11b2   :  { %v2475_v33 = vand.u32 2147483647, %v2435_v34  ;;  %v2465_v13 = vand.u32 2147483647, %v2425_v14  ;;  %3007 = vpow2.f32 %v2503_v30  ;;  %v4372_v26 = vmin.f32 %v2425_v14, 0.0 }
0x11b3   :  { %v2463_v19 = vand.u32 2147483647, %v2423_v12 }
0x11b4   :  { %v2495_v16 = vsub.f32 0.0, %v2475_v33  ;;  %v2485_v38 = vsub.f32 0.0, %v2465_v13 }
0x11b5   :  { %v2483_v56 = vsub.f32 0.0, %v2463_v19 }
0x11b6   :  { %v3004_v47 = vpop.eup %3003  ;;  %v2531_v18 = vmul.f32 1.442695, %v2495_v16  ;;  %v2511_v49 = vmul.f32 1.442695, %v2485_v38 }
0x11b7   :  { %v4294_v61 = vpop.xlane.xlu1 %2336  ;;  %v4296_v59 = vpop.xlane.xlu2 %2369  ;;  %v2547_v11 = vadd.f32 1.0, %v3004_v47  ;;  %v2507_v41 = vmul.f32 1.442695, %v2483_v56 }
0x11b8   :  { %v4298_v27 = vpop.xlane.xlu0 %2363  ;;  %v2420_v57 = vsub.f32 0.0, %v4294_v61  ;;  %v3006_v37 = vpop.eup %3005  ;;  %3009 = vpow2.f32 %v2531_v18  ;;  %v2431_v44 = vsub.f32 0.0, %v4296_v59  ;;  %v4342_v18 = vand.u32 127, %v2639_v39 }
0x11b9   :  { %v2429_v43 = vsub.f32 0.0, %v4298_v27  ;;  %v3008_v9 = vpop.eup %3007  ;;  %v2539_v20 = vadd.f32 1.0, %v3006_v37  ;;  %3011 = vlog2.f32 %v2547_v11 }
0x11ba   :  { %v2460_v0 = vand.u32 2147483647, %v2420_v57  ;;  %v2471_v35 = vand.u32 2147483647, %v2431_v44  ;;  %v2541_v8 = vadd.f32 1.0, %v3008_v9  ;;  %3013 = vpow2.f32 %v2507_v41 }
0x11bb   :  { %v2469_v52 = vand.u32 2147483647, %v2429_v43  ;;  %3015 = vpow2.f32 %v2511_v49 }
0x11bc   :  { %v2480_v50 = vsub.f32 0.0, %v2460_v0  ;;  %3017 = vlog2.f32 %v2539_v20  ;;  %v2491_v60 = vsub.f32 0.0, %v2471_v35  ;;  %v4354_v20 = vmin.f32 %v2421_v1, 0.0 }
0x11bd   :  { %v2489_v2 = vsub.f32 0.0, %v2469_v52  ;;  %3019 = vlog2.f32 %v2541_v8  ;;  %v4360_v35 = vmin.f32 %v2419_v22, 0.0 }
0x11be   :  { %v3010_v54 = vpop.eup %3009  ;;  %v2501_v28 = vmul.f32 1.442695, %v2480_v50  ;;  %v2523_v0 = vmul.f32 1.442695, %v2491_v60 }
0x11bf   :  { %v4306_v40 = vpop.xlane.xlu1 %2348  ;;  %v4308_v36 = vpop.xlane.xlu2 %2342  ;;  %v2555_v32 = vadd.f32 1.0, %v3010_v54  ;;  %v2519_v56 = vmul.f32 1.442695, %v2489_v2 }
0x11c0   :  { %v4312_v55 = vpop.xlane.xlu0 %2387  ;;  %v2424_v63 = vsub.f32 0.0, %v4306_v40  ;;  %v2422_v10 = vsub.f32 0.0, %v4308_v36  ;;  %v3012_v15 = vpop.eup %3011  ;;  %3021 = vpow2.f32 %v2501_v28  ;;  %v4376_v28 = vmin.f32 %v2423_v12, 0.0 }
0x11c1   :  { %v2437_v42 = vsub.f32 0.0, %v4312_v55  ;;  %v3014_v19 = vpop.eup %3013  ;;  %v2576_v61 = vmul.f32 0.6931472, %v3012_v15 }
0x11c2   :  { %v2464_v58 = vand.u32 2147483647, %v2424_v63  ;;  %v2462_v51 = vand.u32 2147483647, %v2422_v10  ;;  %v3016_v11 = vpop.eup %3015  ;;  %v2543_v49 = vadd.f32 1.0, %v3014_v19 }
0x11c3   :  { %v2477_v48 = vand.u32 2147483647, %v2437_v42  ;;  %v3018_v50 = vpop.eup %3017  ;;  %v2545_v1 = vadd.f32 1.0, %v3016_v11 }
0x11c4   :  { %v2484_v17 = vsub.f32 0.0, %v2464_v58  ;;  %v2482_v29 = vsub.f32 0.0, %v2462_v51  ;;  %v3020_v52 = vpop.eup %3019  ;;  %v4364_v51 = vmin.f32 %v2435_v34, 0.0 }
0x11c5   :  { %v2497_v31 = vsub.f32 0.0, %v2477_v48  ;;  %v4350_v48 = vmin.f32 %v2427_v21, 0.0 }
0x11c6   :  { %v2509_v5 = vmul.f32 1.442695, %v2484_v17  ;;  %v2505_v46 = vmul.f32 1.442695, %v2482_v29  ;;  %v3022_v25 = vpop.eup %3021  ;;  %v4383_v29 = vmin.f32 %v2420_v57, 0.0  ;;  %v4394_v57 = vmin.f32 %v2431_v44, 0.0 }
0x11c7   :  { %v4329_v45 = vpop.xlane.xlu1 %2366  ;;  %v4331_v24 = vpop.xlane.xlu2 %2360  ;;  %v2535_v30 = vmul.f32 1.442695, %v2497_v31  ;;  %v4379_v31 = vadd.s32 4294967288, %v4342_v18  ;;  %v2540_v6 = vadd.f32 1.0, %v3022_v25 }
0x11c8   :  { %v4333_v4 = vpop.xlane.xlu0 %2354  ;;  %v2430_v7 = vsub.f32 0.0, %v4329_v45  ;;  %3023 = vpow2.f32 %v2509_v5  ;;  %v2428_v47 = vsub.f32 0.0, %v4331_v24 }
0x11c9   :  { %v2426_v53 = vsub.f32 0.0, %v4333_v4  ;;  %3025 = vpow2.f32 %v2505_v46 }
0x11ca   :  { %v2470_v16 = vand.u32 2147483647, %v2430_v7  ;;  %3027 = vlog2.f32 %v2555_v32  ;;  %v2468_v41 = vand.u32 2147483647, %v2428_v47 }
0x11cb   :  { %v2466_v33 = vand.u32 2147483647, %v2426_v53  ;;  %3029 = vpow2.f32 %v2535_v30 }
0x11cc   :  { %v2490_v37 = vsub.f32 0.0, %v2470_v16  ;;  %v2488_v23 = vsub.f32 0.0, %v2468_v41 }
0x11cd   :  { %v2486_v13 = vsub.f32 0.0, %v2466_v33 }
0x11ce   :  { %v3024_v54 = vpop.eup %3023  ;;  %v2521_v22 = vmul.f32 1.442695, %v2490_v37  ;;  %v2517_v3 = vmul.f32 1.442695, %v2488_v23  ;;  %v4404_v23 = vmin.f32 %v2429_v43, 0.0 }
0x11cf   :  { %v2513_v38 = vmul.f32 1.442695, %v2486_v13  ;;  %v4346_v9 = vpop.xlane.xlu1 %2390  ;;  %v4366_v21 = vpop.xlane.xlu2 %2384  ;;  %v2544_v62 = vadd.f32 1.0, %v3024_v54  ;;  %v2564_v54 = vmul.f32 0.6931472, %v3020_v52 }
0x11d0   :  { %v4356_v58 = vpop.xlane.xlu0 %2372  ;;  %v2438_v17 = vsub.f32 0.0, %v4346_v9  ;;  %v3026_v34 = vpop.eup %3025  ;;  %v2436_v60 = vsub.f32 0.0, %v4366_v21 }
0x11d1   :  { %3031 = vpow2.f32 %v2513_v38  ;;  %v2432_v8 = vsub.f32 0.0, %v4356_v58  ;;  %v4385_v39 = vpop.eup %3027  ;;  %v2542_v14 = vadd.f32 1.0, %v3026_v34 }
0x11d2   :  { %3033 = vpow2.f32 %v2519_v56  ;;  %v3030_v2 = vpop.eup %3029  ;;  %v2478_v12 = vand.u32 2147483647, %v2438_v17  ;;  %v2476_v19 = vand.u32 2147483647, %v2436_v60 }
0x11d3   :  { %3035 = vpow2.f32 %v2523_v0  ;;  %v2472_v5 = vand.u32 2147483647, %v2432_v8  ;;  %v2560_v0 = vmul.f32 0.6931472, %v3018_v50  ;;  %v2557_v44 = vadd.f32 1.0, %v3030_v2 }
0x11d4   :  { %3037 = vlog2.f32 %v2543_v49  ;;  %v2498_v16 = vsub.f32 0.0, %v2478_v12  ;;  %v2496_v37 = vsub.f32 0.0, %v2476_v19  ;;  %v2607_v49 = vsub.f32 %v4350_v48, %v2576_v61 }
0x11d5   :  { %3039 = vpow2.f32 %v2517_v3  ;;  %v2492_v32 = vsub.f32 0.0, %v2472_v5  ;;  %v4413_v48 = vmin.f32 %v2424_v63, 0.0  ;;  %v4417_v5 = vmin.f32 %v2437_v42, 0.0 }
0x11d6   :  { %3041 = vlog2.f32 %v2545_v1  ;;  %v2537_v38 = vmul.f32 1.442695, %v2498_v16  ;;  %v2533_v3 = vmul.f32 1.442695, %v2496_v37  ;;  %v2601_v12 = vsub.f32 %v4354_v20, %v2564_v54 }
0x11d7   :  { %v3032_v46 = vpop.eup %3031  ;;  %3043 = vpow2.f32 %v2521_v22  ;;  %v2525_v11 = vmul.f32 1.442695, %v2492_v32  ;;  %v4408_v25 = vpop.xlane.xlu2 %2375  ;;  %v2592_v32 = vmul.f32 0.6931472, %v4385_v39  ;;  %v2442_v19 = vmin.f32 %v2422_v10, 0.0 }
0x11d8   :  { %v3034_v33 = vpop.eup %3033  ;;  %3045 = vlog2.f32 %v2542_v14  ;;  %v2546_v30 = vadd.f32 1.0, %v3032_v46  ;;  %v4398_v13 = vpop.xlane.xlu0 %2378  ;;  %v2433_v52 = vsub.f32 0.0, %v4408_v25  ;;  %v2446_v10 = vmin.f32 %v2426_v53, 0.0 }
0x11d9   :  { %v3036_v56 = vpop.eup %3035  ;;  %3047 = vlog2.f32 %v2540_v6  ;;  %v2434_v15 = vsub.f32 0.0, %v4398_v13  ;;  %v2599_v6 = vsub.f32 %v4360_v35, %v2560_v0  ;;  %v2549_v14 = vadd.f32 1.0, %v3034_v33 }
0x11da   :  { %v3038_v59 = vpop.eup %3037  ;;  %3049 = vlog2.f32 %v2544_v62  ;;  %v4421_v62 = vperm.slane %v2607_v49, %v4342_v18  ;;  %v2551_v35 = vadd.f32 1.0, %v3036_v56  ;;  %v2473_v55 = vand.u32 2147483647, %v2433_v52 }
0x11db   :  { %v3040_v41 = vpop.eup %3039  ;;  %3051 = vlog2.f32 %v2546_v30  ;;  %v2474_v50 = vand.u32 2147483647, %v2434_v15  ;;  %v4427_v61 = vperm.slane %v2599_v6, %v4342_v18  ;;  %v2568_v16 = vmul.f32 0.6931472, %v3038_v59 }
0x11dc   :  { %v3042_v1 = vpop.eup %3041  ;;  %v2548_v22 = vadd.f32 1.0, %v3040_v41  ;;  %3053 = vpow2.f32 %v2525_v11  ;;  %v2493_v20 = vsub.f32 0.0, %v2473_v55  ;;  %v2615_v59 = vsub.f32 %v4364_v51, %v2592_v32 }
0x11dd   :  { %v3044_v34 = vpop.eup %3043  ;;  %3055 = vpow2.f32 %v2537_v38  ;;  %v2494_v27 = vsub.f32 0.0, %v2474_v50  ;;  %v2572_v0 = vmul.f32 0.6931472, %v3042_v1  ;;  %v2646_v50 = vperm.slane %v2601_v12, %v4342_v18 }
0x11de   :  { %v3046_v43 = vpop.eup %3045  ;;  %3057 = vlog2.f32 %v2557_v44  ;;  %v2550_v46 = vadd.f32 1.0, %v3044_v34  ;;  %v2527_v39 = vmul.f32 1.442695, %v2493_v20  ;;  %v2603_v34 = vsub.f32 %v4376_v28, %v2568_v16 }
0x11df   :  { %v3048_v2 = vpop.eup %3047  ;;  %3059 = vpow2.f32 %v2533_v3  ;;  %v2529_v40 = vmul.f32 1.442695, %v2494_v27  ;;  %v2566_v33 = vmul.f32 0.6931472, %v3046_v43  ;;  %v2605_v6 = vsub.f32 %v4372_v26, %v2572_v0 }
0x11e0   :  { %v3050_v63 = vpop.eup %3049  ;;  %3061 = vlog2.f32 %v2548_v22  ;;  %v2562_v11 = vmul.f32 0.6931472, %v3048_v2  ;;  %v2450_v53 = vmin.f32 %v2430_v7, 0.0  ;;  %v2667_v26 = vperm.slane %v2615_v59, %v4342_v18 }
0x11e1   :  { %v3052_v42 = vpop.eup %3051  ;;  %3063 = vpow2.f32 %v2529_v40  ;;  %v2570_v37 = vmul.f32 0.6931472, %v3050_v63  ;;  %v2602_v54 = vsub.f32 %v2442_v19, %v2566_v33  ;;  %v2649_v12 = vperm.slane %v2603_v34, %v4342_v18 }
0x11e2   :  { %v3054_v30 = vpop.eup %3053  ;;  %3065 = vlog2.f32 %v2549_v14  ;;  %v2574_v1 = vmul.f32 0.6931472, %v3052_v42  ;;  %v2600_v27 = vsub.f32 %v4383_v29, %v2562_v11  ;;  %v2448_v55 = vmin.f32 %v2428_v47, 0.0 }
0x11e3   :  { %v3056_v56 = vpop.eup %3055  ;;  %3067 = vlog2.f32 %v2551_v35  ;;  %v2552_v44 = vadd.f32 1.0, %v3054_v30  ;;  %v2604_v51 = vsub.f32 %v4413_v48, %v2570_v37  ;;  %v2647_v4 = vperm.slane %v2602_v54, %v4379_v31 }
0x11e4   :  { %v3058_v38 = vpop.eup %3057  ;;  %3069 = vlog2.f32 %v2550_v46  ;;  %v2558_v41 = vadd.f32 1.0, %v3056_v56  ;;  %v2606_v40 = vsub.f32 %v2446_v10, %v2574_v1  ;;  %v2652_v48 = vperm.slane %v2605_v6, %v4342_v18 }
0x11e5   :  { %v3060_v49 = vpop.eup %3059  ;;  %3071 = vlog2.f32 %v2552_v44  ;;  %v2596_v14 = vmul.f32 0.6931472, %v3058_v38  ;;  %v2643_v45 = vperm.slane %v2600_v27, %v4379_v31  ;;  %v2650_v33 = vperm.slane %v2604_v51, %v4379_v31 }
0x11e6   :  { %v3062_v36 = vpop.eup %3061  ;;  %3073 = vlog2.f32 %v2558_v41  ;;  %v2556_v22 = vadd.f32 1.0, %v3060_v49  ;;  %v2452_v16 = vmin.f32 %v2432_v8, 0.0  ;;  %v2458_v19 = vmin.f32 %v2438_v17, 0.0 }
0x11e7   :  { %v3064_v3 = vpop.eup %3063  ;;  %3075 = vpow2.f32 %v2527_v39  ;;  %v2578_v29 = vmul.f32 0.6931472, %v3062_v36  ;;  %v2617_v32 = vsub.f32 %v4417_v5, %v2596_v14  ;;  %v2648_v56 = vsel %vm2644_vm0, %v2647_v4, %v2646_v50 }
0x11e8   :  { %v3066_v43 = vpop.eup %3065  ;;  %3077 = vlog2.f32 %v2556_v22  ;;  %v2554_v2 = vadd.f32 1.0, %v3064_v3  ;;  %v2653_v47 = vperm.slane %v2606_v40, %v4379_v31  ;;  %v2456_v37 = vmin.f32 %v2436_v60, 0.0 }
0x11e9   :  { %v3068_v35 = vpop.eup %3067  ;;  %v2580_v46 = vmul.f32 0.6931472, %v3066_v43  ;;  %v2608_v0 = vsub.f32 %v2448_v55, %v2578_v29  ;;  %v2670_v8 = vperm.slane %v2617_v32, %v4342_v18  ;;  %v2645_v9 = vsel %vm2644_vm0, %v2643_v45, %v4427_v61  ;;  %v2307_v55 = vpop.xlane.xlu2 %2306 }
0x11ea   :  { %v3070_v28 = vpop.eup %3069  ;;  %3079 = vlog2.f32 %v2554_v2  ;;  %v2584_v7 = vmul.f32 0.6931472, %v3068_v35  ;;  %v2651_v17 = vsel %vm2644_vm0, %v2650_v33, %v2649_v12  ;;  %v2674_v59 = vsel %vm2673_vm14, %v2648_v56, %v2645_v9 }
0x11eb   :  { %v3072_v63 = vpop.eup %3071  ;;  %v2582_v38 = vmul.f32 0.6931472, %v3070_v28  ;;  %v2654_v54 = vsel %vm2644_vm0, %v2653_v47, %v2652_v48  ;;  %v2656_v21 = vperm.slane %v2608_v0, %v4379_v31  ;;  %v2454_v61 = vmin.f32 %v2434_v15, 0.0 }
0x11ec   :  { %v3074_v42 = vpop.eup %3073  ;;  %v2586_v11 = vmul.f32 0.6931472, %v3072_v63  ;;  %v2609_v22 = vsub.f32 %v4404_v23, %v2580_v46  ;;  %v2611_v3 = vsub.f32 %v4394_v57, %v2584_v7  ;;  %v2676_v34 = vsel %vm2675_vm15, %v2651_v17, %v2674_v59 }
0x11ed   :  { %v3076_v30 = vpop.eup %3075  ;;  %v2598_v20 = vmul.f32 0.6931472, %v3074_v42  ;;  %v2610_v36 = vsub.f32 %v2450_v53, %v2582_v38  ;;  %v2678_v43 = vsel %vm2677_vm1, %v2654_v54, %v2676_v34  ;;  %v2657_v13 = vsel %vm2644_vm0, %v2656_v21, %v4421_v62 }
0x11ee   :  { %v3078_v24 = vpop.eup %3077  ;;  %v2553_v44 = vadd.f32 1.0, %v3076_v30  ;;  %v2612_v60 = vsub.f32 %v2452_v16, %v2586_v11  ;;  %v2453_v57 = vmin.f32 %v2433_v52, 0.0  ;;  %v2658_v4 = vperm.slane %v2609_v22, %v4342_v18 }
0x11ef   :  { %v2618_v5 = vsub.f32 %v2458_v19, %v2598_v20  ;;  %v2594_v41 = vmul.f32 0.6931472, %v3078_v24  ;;  %v2659_v15 = vperm.slane %v2610_v36, %v4379_v31  ;;  %v2661_v53 = vperm.slane %v2611_v3, %v4342_v18 }
0x11f0   :  { %v3080_v58 = vpop.eup %3079  ;;  %3081 = vlog2.f32 %v2553_v44  ;;  %v2662_v51 = vperm.slane %v2612_v60, %v4379_v31  ;;  %v2680_v40 = vsel %vm2679_vm3, %v2657_v13, %v2678_v43  ;;  %v2394_v45 = vand.u32 2147483647, %v2307_v55 }
0x11f1   :  { %v2671_v39 = vperm.slane %v2618_v5, %v4379_v31  ;;  %v2616_v49 = vsub.f32 %v2456_v37, %v2594_v41  ;;  %v2590_v50 = vmul.f32 0.6931472, %v3080_v58  ;;  %v2660_v25 = vsel %vm2644_vm0, %v2659_v15, %v2658_v4 }
0x11f2   :  { %v2663_v62 = vsel %vm2644_vm0, %v2662_v51, %v2661_v53  ;;  %v2682_v52 = vsel %vm2681_vm4, %v2660_v25, %v2680_v40  ;;  %v2396_v32 = vsub.f32 0.0, %v2394_v45  ;;  %v2392_v44 = vmin.f32 %v2307_v55, 0.0 }
0x11f3   :  { %v2668_v10 = vperm.slane %v2616_v49, %v4379_v31  ;;  %v2672_v1 = vsel %vm2644_vm0, %v2671_v39, %v2670_v8  ;;  %v2614_v6 = vsub.f32 %v2454_v61, %v2590_v50  ;;  %v2684_v12 = vsel %vm2683_vm5, %v2663_v62, %v2682_v52 }
0x11f4   :  { %v2398_v30 = vmul.f32 1.442695, %v2396_v32 }
0x11f5   :  { %v2669_v27 = vsel %vm2644_vm0, %v2668_v10, %v2667_v26  ;;  %v2665_v28 = vperm.slane %v2614_v6, %v4379_v31  ;;  %v2311_v31 = vpop.xlane.xlu1 %2310 }
0x11f6   :  { %v3082_v14 = vpop.eup %3081  ;;  %v2687_v2 = vsel %vm2673_vm14, %v2672_v1, %v2669_v27  ;;  %v2395_v42 = vand.u32 2147483647, %v2311_v31  ;;  %v2393_v11 = vmin.f32 %v2311_v31, 0.0 }
0x11f7   :  { %v2588_v23 = vmul.f32 0.6931472, %v3082_v14  ;;  %v2695_v35 = vsel %vm2694_vm2, %v2687_v2, 0.0 }
0x11f8   :  { %2696 = vadd.xlane.f32.xlu0 %v2695_v35  ;;  %v2397_v7 = vsub.f32 0.0, %v2395_v42 }
0x11f9   :  { %v2613_v26 = vsub.f32 %v2453_v57, %v2588_v23 }
0x11fa   :  { %v2400_v33 = vmul.f32 1.442695, %v2397_v7 }
0x11fb   :  { %v2664_v29 = vperm.slane %v2613_v26, %v4342_v18 }
0x11fc   :  { %3083 = vpow2.f32 %v2400_v33 }
0x11fd   :  { %v2666_v63 = vsel %vm2644_vm0, %v2665_v28, %v2664_v29  ;;  %3085 = vpow2.f32 %v2398_v30 }
0x11fe   :  { %v2686_v48 = vsel %vm2685_vm6, %v2666_v63, %v2684_v12 }
0x11ff   :  { %v2691_v46 = vsel %vm2690_vm7, %v2686_v48, 0.0 }
0x1200   :  { %2692 = vadd.xlane.f32.xlu1 %v2691_v46 }
0x1202   :  { %v3084_v18 = vpop.eup %3083 }
0x1203   :  { %v3086_v16 = vpop.eup %3085  ;;  %v2403_v19 = vadd.f32 1.0, %v3084_v18 }
0x1204   :  { %v2402_v20 = vadd.f32 1.0, %v3086_v16 }
0x1205   :  { %3087 = vlog2.f32 %v2403_v19 }
0x1206   :  { %3089 = vlog2.f32 %v2402_v20 }
0x120b   :  { %v3088_v56 = vpop.eup %3087 }
0x120c   :  { %v3090_v24 = vpop.eup %3089  ;;  %v2407_v47 = vmul.f32 0.6931472, %v3088_v56 }
0x120d   :  { %v2405_v0 = vmul.f32 0.6931472, %v3090_v24 }
0x120e   :  { %v2409_v38 = vsub.f32 %v2393_v11, %v2407_v47 }
0x120f   :  { %v2408_v5 = vsub.f32 %v2392_v44, %v2405_v0 }
0x1210   :  { %v2411_v37 = vsel %vm2410_vm8, %v2409_v38, 0.0 }
0x1211   :  { %v2412_v41 = vadd.f32 %v2411_v37, %v2408_v5 }
0x1213   :  { %v2413_v58 = vrot.slane %v2412_v41, 4 }
0x1215   :  { %v2414_v8 = vadd.f32 %v2413_v58, %v2412_v41 }
0x1217   :  { %v2415_v49 = vrot.slane %v2414_v8, 2 }
0x1219   :  { %v2416_v54 = vadd.f32 %v2415_v49, %v2414_v8 }
0x121b   :  { %v2417_v10 = vrot.slane %v2416_v54, 1 }
0x121d   :  { %v2418_v22 = vadd.f32 %v2417_v10, %v2416_v54 }
0x126b   :  { %v2697_v9 = vpop.xlane.xlu0 %2696 }
0x126c   :  { %v2699_v17 = vsel %vm2698_vm9, %v2697_v9, 0.0 }
0x1273   :  { %v2693_v39 = vpop.xlane.xlu1 %2692 }
0x1274   :  { %v2700_v50 = vadd.f32 %v2699_v17, %v2693_v39 }
0x1276   :  { %v2701_v59 = vrot.slane %v2700_v50, 4 }
0x1278   :  { %v2702_v21 = vadd.f32 %v2701_v59, %v2700_v50 }
0x127a   :  { %v2703_v60 = vrot.slane %v2702_v21, 2 }
0x127c   :  { %v2704_v36 = vadd.f32 %v2703_v60, %v2702_v21 }
0x127e   :  { %v2705_v61 = vrot.slane %v2704_v36, 1 }
0x1280   :  { %v2706_v1 = vadd.f32 %v2705_v61, %v2704_v36 }
0x1282   :  { %v2707_v3 = vadd.f32 %v2706_v1, %v2418_v22 }
0x1284   :  { %v2708_v34 = vsub.f32 0.0, %v2707_v3 }
0x1286   :  { %2710 = vst.msk [vmem:[#allocation4] sm:$0x1] %vm2709_vm11, %v2708_v34 }
0x1287   :  { %2721 = dma.vmem_to_hbm [thread:$0]  %s2717_s13, 16, %s2719_s27, [#allocation5]  }
0x1288   :  { %3151 = dma.done.wait [#allocation5], 16  }
0x1289   :  { %3152 = vsyncadd [#allocation5], 4294967280 }
0x128a   :  { %2726 = vsyncpa [#allocation5], 1 }

</bundles_post_ra>
